<compile_context>
chip_gen: v7x
topology: tpu7x:2x2x1
jax: 0.10.0
libtpu: 0.0.40
codegen_flags: <defaults>
</compile_context>

<pallas_src>
import functools
import math

import jax
import jax.numpy as jnp
from jax import lax
from jax.experimental import pallas as pl
from jax.experimental.pallas import tpu as pltpu


# -----------------------------------------------------------------------------
# Pallas kernel: one batch element per grid step.
# -----------------------------------------------------------------------------
def _ca_mamba_kernel(
    x_ref,        # (1, L, D)
    c_ref,        # (1, L, d_state) or (L, d_state)
    gamma_ref,    # (1, D)
    beta_ref,     # (1, D)
    w_in_x_ref,   # (D, d_inner)           bf16
    w_in_z_ref,   # (D, d_inner)           bf16
    w_conv_ref,   # (d_conv, d_inner)      f32 (VPU)
    b_conv_ref,   # (1, d_inner)
    w_dtb_ref,    # (d_inner, n_dtb_pad)   bf16, [w_x_dt@w_dt | w_x_b | 0pad]
    b_dt_ref,     # (1, d_inner)
    at_ref,       # (d_state, d_inner)     A^T = -exp(A_log)^T, f32
    d_skip_ref,   # (1, d_inner)
    w_out_ref,    # (d_inner, dim_pad)     bf16
    o_ref,        # (1, L, dim_pad)
    dt_s,         # scratch (L, d_inner)   dt, reused as y after each chunk
    b_s,          # scratch (L, d_state)
    g_s,          # scratch (L, d_inner)   silu(z)
    xp_s,         # scratch (L + pad, d_inner)  padded conv input, then u
    dA_s,         # scratch (T, d_state, d_inner)  lane-dense on d_inner
    dBu_s,        # scratch (T, d_state, d_inner)  (reused as h history)
    *,
    c_has_batch: bool,
    d_inner: int,
    d_state: int,
):
    L = x_ref.shape[1]
    d_conv = w_conv_ref.shape[0]
    T = dA_s.shape[0]
    n_chunks = L // T
    pad = xp_s.shape[0] - L

    # ---- LayerNorm (eps = 1e-5, PyTorch default) ----
    x = x_ref[0].astype(jnp.float32)                      # (L, D)
    mu = jnp.mean(x, axis=-1, keepdims=True)
    var = jnp.mean((x - mu) ** 2, axis=-1, keepdims=True)
    xn = (x - mu) * lax.rsqrt(var + 1e-5)
    xn = xn * gamma_ref[...] + beta_ref[...]

    # ---- in_proj (bias=False): two bf16 lane-aligned matmuls, f32 accumulate ----
    xn_b = xn.astype(jnp.bfloat16)
    x_in = jnp.dot(xn_b, w_in_x_ref[...], preferred_element_type=jnp.float32)
    z = jnp.dot(xn_b, w_in_z_ref[...], preferred_element_type=jnp.float32)
    g_s[...] = z * jax.nn.sigmoid(z)                      # gate, bounded live range

    # ---- causal depthwise conv1d over L via pre-padded scratch ----
    # (pad rows re-zeroed every step: cheap, and safe under megacore splitting)
    xp_s[pl.ds(0, pad), :] = jnp.zeros((pad, d_inner), jnp.float32)
    xp_s[pl.ds(pad, L), :] = x_in                         # sublane-aligned write
    acc = jnp.zeros((L, d_inner), jnp.float32)
    for k in range(d_conv):                               # static unroll
        off_k = pad - (d_conv - 1) + k                    # static offsets
        acc = acc + xp_s[pl.ds(off_k, L), :] * w_conv_ref[k:k + 1, :]
    acc = acc + b_conv_ref[...]
    u = acc * jax.nn.sigmoid(acc)                         # SiLU
    xp_s[pl.ds(pad, L), :] = u                            # alias: x_in is dead now

    # ---- fused dt|B projection: one lane-dense bf16 matmul, then split ----
    dtb = jnp.dot(u.astype(jnp.bfloat16), w_dtb_ref[...],
                  preferred_element_type=jnp.float32)     # (L, n_dtb_pad)
    dt_s[...] = jax.nn.softplus(dtb[:, :d_inner] + b_dt_ref[...])
    b_s[...] = dtb[:, d_inner:d_inner + d_state]

    A_T = at_ref[...]                                     # (d_state, d_inner)
    d_skip = d_skip_ref[...]                              # (1, d_inner)

    # ---- chunked selective scan over L (C comes from C_SA) ----
    def chunk_body(c, h):
        off = pl.multiple_of(c * T, T)
        dt_c = dt_s[pl.ds(off, T), :]                     # (T, d_inner)
        u_c = xp_s[pl.ds(pad + off, T), :]                # (T, d_inner)
        b_c = b_s[pl.ds(off, T), :]                       # (T, d_state)
        if c_has_batch:
            c_c = c_ref[0, pl.ds(off, T), :].astype(jnp.float32)
        else:
            c_c = c_ref[pl.ds(off, T), :].astype(jnp.float32)

        # Vectorized precompute for the whole chunk, lane-dense on d_inner.
        dA_s[...] = jnp.exp(dt_c[:, None, :] * A_T[None, :, :])
        dBu_s[...] = (dt_c * u_c)[:, None, :] * b_c[:, :, None]

        # Serial recurrence: two multiply-adds per step; h history overwrites
        # the dBu buffer in place.
        def step(t, h_carry):
            h_new = dA_s[t] * h_carry + dBu_s[t]
            dBu_s[t] = h_new
            return h_new

        h = lax.fori_loop(0, T, step, h, unroll=True)

        # One chunked contraction over d_state + one block store for y.
        y_c = jnp.sum(dBu_s[...] * c_c[:, :, None], axis=1)   # (T, d_inner)
        dt_s[pl.ds(off, T), :] = y_c + d_skip * u_c            # dt rows are dead
        return h

    h0 = jnp.zeros((d_state, d_inner), jnp.float32)
    lax.fori_loop(0, n_chunks, chunk_body, h0)

    # ---- SiLU gate with z, out_proj (bias=False, lane-dense bf16 matmul) ----
    y = dt_s[...] * g_s[...]
    o_ref[0] = jnp.dot(y.astype(jnp.bfloat16), w_out_ref[...],
                       preferred_element_type=jnp.float32).astype(o_ref.dtype)


# -----------------------------------------------------------------------------
# Wrapper
# -----------------------------------------------------------------------------
def _pick_chunk(L):
    for t in (32, 16, 8, 4, 2, 1):
        if L % t == 0:
            return t
    return 1


def ca_mamba_layer(x, c_sa, p):
    B, L, dim = x.shape
    d_inner, d_state = p["A"].shape
    d_conv = p["w_conv"].shape[0]
    f32, bf16 = jnp.float32, jnp.bfloat16

    # Wrapper-side weight prep (constant under jit).  Fuse the tiny dt_rank
    # chain in f32 FIRST, then concatenate the B projection and cast to bf16.
    w_dtf = p["w_x_dt"].astype(f32) @ p["w_dt"].astype(f32)
    n_dtb = d_inner + d_state
    n_dtb_pad = ((n_dtb + 127) // 128) * 128
    w_dtb = jnp.concatenate([w_dtf, p["w_x_b"].astype(f32)], axis=1)
    if n_dtb_pad != n_dtb:
        w_dtb = jnp.pad(w_dtb, ((0, 0), (0, n_dtb_pad - n_dtb)))
    w_dtb = w_dtb.astype(bf16)

    w_in_x = p["w_in"][:, :d_inner].astype(bf16)
    w_in_z = p["w_in"][:, d_inner:].astype(bf16)

    # Lane-dense output: pad model dim to a multiple of 128, strip pad after.
    dim_pad = ((dim + 127) // 128) * 128
    w_out = p["w_out"].astype(f32)
    if dim_pad != dim:
        w_out = jnp.pad(w_out, ((0, 0), (0, dim_pad - dim)))
    w_out = w_out.astype(bf16)

    # A^T so d_inner rides the lanes in the scan; stays f32 (VPU/EUP path).
    a_t = p["A"].T.astype(f32)                             # (d_state, d_inner)

    # C_SA: do NOT materialize a batch broadcast; a 2-D C_SA gets a constant
    # block index and stays resident across the grid.
    c_has_batch = (c_sa.ndim == 3)
    if c_has_batch:
        assert c_sa.shape == (B, L, d_state)
        c_spec = pl.BlockSpec((1, L, d_state), lambda b: (b, 0, 0))
    else:
        assert c_sa.shape == (L, d_state)
        c_spec = pl.BlockSpec((L, d_state), lambda b: (0, 0))

    T = _pick_chunk(L)
    pad = max(8, 8 * ((d_conv - 1 + 7) // 8))

    full2d = lambda a: pl.BlockSpec(a.shape, lambda b: (0, 0))

    in_specs = [
        pl.BlockSpec((1, L, dim), lambda b: (b, 0, 0)),    # x
        c_spec,                                            # C_SA
        full2d(p["gamma"]), full2d(p["beta"]),
        full2d(w_in_x), full2d(w_in_z),
        full2d(p["w_conv"]), full2d(p["b_conv"]),
        full2d(w_dtb), full2d(p["b_dt"]),
        full2d(a_t), full2d(p["D"]),
        full2d(w_out),
    ]
    out_specs = pl.BlockSpec((1, L, dim_pad), lambda b: (b, 0, 0))

    scratch_shapes = [
        pltpu.VMEM((L, d_inner), f32),                     # dt / y
        pltpu.VMEM((L, d_state), f32),                     # B
        pltpu.VMEM((L, d_inner), f32),                     # g = silu(z)
        pltpu.VMEM((L + pad, d_inner), f32),               # padded conv in / u
        pltpu.VMEM((T, d_state, d_inner), f32),            # dA chunk
        pltpu.VMEM((T, d_state, d_inner), f32),            # dBu chunk / h history
    ]

    # ---- VMEM budget: generation aware, no double counting ----
    def _nb(shape, dtype):
        return math.prod(shape) * jnp.dtype(dtype).itemsize

    scratch_bytes = sum((
        _nb((L, d_inner), f32), _nb((L, d_state), f32), _nb((L, d_inner), f32),
        _nb((L + pad, d_inner), f32),
        _nb((T, d_state, d_inner), f32), _nb((T, d_state, d_inner), f32),
    ))
    stream_bytes = 2 * (_nb((1, L, dim), x.dtype)
                        + _nb((L, d_state), c_sa.dtype)
                        + _nb((1, L, dim_pad), f32))       # double-buffered blocks
    weight_arrays = (p["gamma"], p["beta"], w_in_x, w_in_z, p["w_conv"],
                     p["b_conv"], w_dtb, p["b_dt"], a_t, p["D"], w_out)
    weight_bytes = 2 * sum(_nb(w.shape, w.dtype) for w in weight_arrays)
    need = scratch_bytes + stream_bytes + weight_bytes
    try:
        vmem_cap = int(pltpu.get_tpu_info().vmem_capacity_bytes)
    except Exception:
        vmem_cap = 64 * 2**20                              # conservative fallback
    vmem_limit = int(max(16 * 2**20,
                         min(int(0.85 * vmem_cap), int(1.5 * need))))

    # ---- Cost estimate so XLA schedules the surrounding graph well ----
    matmul_flops = 2 * B * L * (dim * 2 * d_inner + d_inner * n_dtb_pad
                                + d_inner * dim_pad)
    scan_flops = 6 * B * L * d_inner * d_state
    cost = pl.CostEstimate(
        flops=int(matmul_flops + scan_flops),
        transcendentals=int(B * L * d_inner * (d_state + 4)),
        bytes_accessed=int(x.size * x.dtype.itemsize
                           + c_sa.size * c_sa.dtype.itemsize
                           + B * L * dim_pad * 4
                           + sum(w.size * w.dtype.itemsize
                                 for w in weight_arrays)),
    )

    kernel = functools.partial(_ca_mamba_kernel, c_has_batch=c_has_batch,
                               d_inner=d_inner, d_state=d_state)

    out = pl.pallas_call(
        kernel,
        out_shape=jax.ShapeDtypeStruct((B, L, dim_pad), f32),
        grid=(B,),
        in_specs=in_specs,
        out_specs=out_specs,
        scratch_shapes=scratch_shapes,
        compiler_params=pltpu.CompilerParams(
            dimension_semantics=("parallel",),
            vmem_limit_bytes=vmem_limit,
        ),
        cost_estimate=cost,
    )(x, c_sa, p["gamma"], p["beta"], w_in_x, w_in_z,
      p["w_conv"], p["b_conv"], w_dtb, p["b_dt"],
      a_t, p["D"], w_out)

    if dim_pad != dim:
        out = out[:, :, :dim]
    return out


# -----------------------------------------------------------------------------
# Deterministic parameter init (shapes follow CA_Mamba(d_model=dim, ...))
# -----------------------------------------------------------------------------
def init_params(dim, d_state=64, d_conv=4, expand=2, seed=42):
    d_inner = expand * dim
    dt_rank = math.ceil(dim / 16)
    ks = jax.random.split(jax.random.PRNGKey(seed), 8)
    n = lambda k, s, sc: (sc * jax.random.normal(k, s)).astype(jnp.float32)
    inv_softplus = lambda v: float(jnp.log(jnp.expm1(jnp.asarray(v))))
    return {
        "gamma": jnp.ones((1, dim), jnp.float32),
        "beta": jnp.zeros((1, dim), jnp.float32),
        "w_in": n(ks[0], (dim, 2 * d_inner), 0.05),
        "w_conv": n(ks[1], (d_conv, d_inner), 0.10),
        "b_conv": jnp.zeros((1, d_inner), jnp.float32),
        "w_x_dt": n(ks[2], (d_inner, dt_rank), 0.10),
        "w_x_b": n(ks[3], (d_inner, d_state), 0.10),
        "w_dt": n(ks[4], (dt_rank, d_inner), 0.10),
        "b_dt": jnp.full((1, d_inner), inv_softplus(0.05), jnp.float32),
        # A = -exp(A_log) with the canonical Mamba init A_log = log(arange(1, N+1))
        "A": -jnp.broadcast_to(
            jnp.arange(1, d_state + 1, dtype=jnp.float32), (d_inner, d_state)
        ),
        "D": jnp.ones((1, d_inner), jnp.float32),
        "w_out": n(ks[5], (d_inner, dim), 0.05),
    }


# -----------------------------------------------------------------------------
# Pure-JAX f32 reference for validation (unfused weights)
# -----------------------------------------------------------------------------
def ref_forward(x, c_sa, p):
    B, L, dim = x.shape
    d_inner, d_state = p["A"].shape
    d_conv = p["w_conv"].shape[0]
    if c_sa.ndim == 2:
        c_sa = jnp.broadcast_to(c_sa[None], (B,) + c_sa.shape)

    mu = jnp.mean(x, -1, keepdims=True)
    var = jnp.mean((x - mu) ** 2, -1, keepdims=True)
    xn = (x - mu) / jnp.sqrt(var + 1e-5) * p["gamma"] + p["beta"]

    xz = xn @ p["w_in"]
    x_in, z = xz[..., :d_inner], xz[..., d_inner:]

    xp = jnp.pad(x_in, ((0, 0), (d_conv - 1, 0), (0, 0)))
    conv = sum(xp[:, k:k + L, :] * p["w_conv"][k] for k in range(d_conv))
    conv = conv + p["b_conv"]
    u = conv * jax.nn.sigmoid(conv)

    dt = jax.nn.softplus(u @ p["w_x_dt"] @ p["w_dt"] + p["b_dt"])
    Bm = u @ p["w_x_b"]
    A = p["A"]

    def step(h, inp):
        dt_t, u_t, b_t, c_t = inp
        dA = jnp.exp(dt_t[..., None] * A)
        dBu = (dt_t * u_t)[..., None] * b_t[:, None, :]
        h = dA * h + dBu
        y = jnp.sum(h * c_t[:, None, :], -1) + p["D"] * u_t
        return h, y

    inputs = tuple(jnp.swapaxes(a, 0, 1) for a in (dt, u, Bm, c_sa))
    h0 = jnp.zeros((B, d_inner, d_state), jnp.float32)
    _, ys = lax.scan(step, h0, inputs)
    y = jnp.swapaxes(ys, 0, 1)
    y = y * (z * jax.nn.sigmoid(z))
    return y @ p["w_out"]


if __name__ == "__main__":
    B, L, dim = 2, 8, 32
    d_state, d_conv, expand = 64, 4, 2

    params = init_params(dim, d_state=d_state, d_conv=d_conv, expand=expand)

    kx, kc = jax.random.split(jax.random.PRNGKey(0))
    x = jax.random.normal(kx, (B, L, dim), jnp.float32)
    c_sa = jax.random.normal(kc, (B, L, d_state), jnp.float32)

    # 3-D C_SA path (per-batch C).  Tolerance accounts for bf16 MXU matmuls.
    out = ca_mamba_layer(x, c_sa, params)
    jax.block_until_ready(out)
    ref = ref_forward(x, c_sa, params)
    assert out.shape == (B, L, dim)
    tol = 2e-2 * max(1.0, float(jnp.max(jnp.abs(ref))))
    err = float(jnp.max(jnp.abs(out - ref)))
    assert err < tol, f"3D C_SA mismatch vs reference, max abs err = {err}"

    # 2-D C_SA path (shared C, kept resident, no batch broadcast in HBM)
    c2d = c_sa[0]
    out2 = ca_mamba_layer(x, c2d, params)
    jax.block_until_ready(out2)
    ref2 = ref_forward(x, c2d, params)
    tol2 = 2e-2 * max(1.0, float(jnp.max(jnp.abs(ref2))))
    err2 = float(jnp.max(jnp.abs(out2 - ref2)))
    assert err2 < tol2, f"2D C_SA mismatch vs reference, max abs err = {err2}"

    print("KERNEL_OK")
</pallas_src>

<mosaic_0001>
module attributes {stable_mosaic.version = 11 : i64} {
  func.func @_ca_mamba_kernel(%arg0: i32, %arg1: memref<1x8x32xf32, #tpu.memory_space<vmem>>, %arg2: memref<1x8x64xf32, #tpu.memory_space<vmem>>, %arg3: memref<1x32xf32, #tpu.memory_space<vmem>>, %arg4: memref<1x32xf32, #tpu.memory_space<vmem>>, %arg5: memref<32x64xbf16, #tpu.memory_space<vmem>>, %arg6: memref<32x64xbf16, #tpu.memory_space<vmem>>, %arg7: memref<4x64xf32, #tpu.memory_space<vmem>>, %arg8: memref<1x64xf32, #tpu.memory_space<vmem>>, %arg9: memref<64x128xbf16, #tpu.memory_space<vmem>>, %arg10: memref<1x64xf32, #tpu.memory_space<vmem>>, %arg11: memref<64x64xf32, #tpu.memory_space<vmem>>, %arg12: memref<1x64xf32, #tpu.memory_space<vmem>>, %arg13: memref<64x128xbf16, #tpu.memory_space<vmem>>, %arg14: memref<1x8x128xf32, #tpu.memory_space<vmem>>, %arg15: memref<8x64xf32, #tpu.memory_space<vmem>>, %arg16: memref<8x64xf32, #tpu.memory_space<vmem>>, %arg17: memref<8x64xf32, #tpu.memory_space<vmem>>, %arg18: memref<16x64xf32, #tpu.memory_space<vmem>>, %arg19: memref<8x64x64xf32, #tpu.memory_space<vmem>>, %arg20: memref<8x64x64xf32, #tpu.memory_space<vmem>>) attributes {dimension_semantics = [#tpu.dimension_semantics<parallel>], iteration_bounds = array<i64: 2>, scalar_prefetch = 0 : i64, scratch_operands = 6 : i64, tpu.core_type = #tpu.core_type<tc>, window_params = [{transform_indices = @transform_0, window_bounds = array<i64: 1, 8, 32>}, {transform_indices = @transform_1, window_bounds = array<i64: 1, 8, 64>}, {pipeline_mode = #tpu.pipeline_mode<synchronous>, transform_indices = @transform_2, window_bounds = array<i64: 1, 32>}, {pipeline_mode = #tpu.pipeline_mode<synchronous>, transform_indices = @transform_3, window_bounds = array<i64: 1, 32>}, {pipeline_mode = #tpu.pipeline_mode<synchronous>, transform_indices = @transform_4, window_bounds = array<i64: 32, 64>}, {pipeline_mode = #tpu.pipeline_mode<synchronous>, transform_indices = @transform_5, window_bounds = array<i64: 32, 64>}, {pipeline_mode = #tpu.pipeline_mode<synchronous>, transform_indices = @transform_6, window_bounds = array<i64: 4, 64>}, {pipeline_mode = #tpu.pipeline_mode<synchronous>, transform_indices = @transform_7, window_bounds = array<i64: 1, 64>}, {pipeline_mode = #tpu.pipeline_mode<synchronous>, transform_indices = @transform_8, window_bounds = array<i64: 64, 128>}, {pipeline_mode = #tpu.pipeline_mode<synchronous>, transform_indices = @transform_9, window_bounds = array<i64: 1, 64>}, {pipeline_mode = #tpu.pipeline_mode<synchronous>, transform_indices = @transform_10, window_bounds = array<i64: 64, 64>}, {pipeline_mode = #tpu.pipeline_mode<synchronous>, transform_indices = @transform_11, window_bounds = array<i64: 1, 64>}, {pipeline_mode = #tpu.pipeline_mode<synchronous>, transform_indices = @transform_12, window_bounds = array<i64: 64, 128>}, {transform_indices = @transform_13, window_bounds = array<i64: 1, 8, 128>}]} {
    %c0 = arith.constant 0 : index
    %c0_0 = arith.constant 0 : index
    %c0_1 = arith.constant 0 : index
    %0 = vector.load %arg1[%c0, %c0_0, %c0_1] : memref<1x8x32xf32, #tpu.memory_space<vmem>>, vector<1x8x32xf32>
    %1 = vector.shape_cast %0 : vector<1x8x32xf32> to vector<8x32xf32>
    %cst = arith.constant dense<0.000000e+00> : vector<8xf32>
    %2 = vector.multi_reduction <add>, %1, %cst [1] : vector<8x32xf32> to vector<8xf32>
    %3 = vector.shape_cast %2 : vector<8xf32> to vector<8x1xf32>
    %cst_2 = arith.constant 3.200000e+01 : f32
    %4 = vector.broadcast %cst_2 : f32 to vector<8x1xf32>
    %5 = arith.divf %3, %4 : vector<8x1xf32>
    %6 = vector.broadcast %5 : vector<8x1xf32> to vector<8x32xf32>
    %7 = arith.subf %1, %6 : vector<8x32xf32>
    %8 = arith.mulf %7, %7 : vector<8x32xf32>
    %cst_3 = arith.constant dense<0.000000e+00> : vector<8xf32>
    %9 = vector.multi_reduction <add>, %8, %cst_3 [1] : vector<8x32xf32> to vector<8xf32>
    %10 = vector.shape_cast %9 : vector<8xf32> to vector<8x1xf32>
    %cst_4 = arith.constant 3.200000e+01 : f32
    %11 = vector.broadcast %cst_4 : f32 to vector<8x1xf32>
    %12 = arith.divf %10, %11 : vector<8x1xf32>
    %13 = vector.broadcast %5 : vector<8x1xf32> to vector<8x32xf32>
    %14 = arith.subf %1, %13 : vector<8x32xf32>
    %cst_5 = arith.constant 9.99999974E-6 : f32
    %15 = vector.broadcast %cst_5 : f32 to vector<8x1xf32>
    %16 = arith.addf %12, %15 : vector<8x1xf32>
    %17 = math.rsqrt %16 : vector<8x1xf32>
    %18 = vector.broadcast %17 : vector<8x1xf32> to vector<8x32xf32>
    %19 = arith.mulf %14, %18 : vector<8x32xf32>
    %c0_6 = arith.constant 0 : index
    %c0_7 = arith.constant 0 : index
    %20 = vector.load %arg3[%c0_6, %c0_7] : memref<1x32xf32, #tpu.memory_space<vmem>>, vector<1x32xf32>
    %21 = vector.broadcast %20 : vector<1x32xf32> to vector<8x32xf32>
    %22 = arith.mulf %19, %21 : vector<8x32xf32>
    %c0_8 = arith.constant 0 : index
    %c0_9 = arith.constant 0 : index
    %23 = vector.load %arg4[%c0_8, %c0_9] : memref<1x32xf32, #tpu.memory_space<vmem>>, vector<1x32xf32>
    %24 = vector.broadcast %23 : vector<1x32xf32> to vector<8x32xf32>
    %25 = arith.addf %22, %24 : vector<8x32xf32>
    %26 = arith.truncf %25 : vector<8x32xf32> to vector<8x32xbf16>
    %c0_10 = arith.constant 0 : index
    %c0_11 = arith.constant 0 : index
    %27 = vector.load %arg5[%c0_10, %c0_11] : memref<32x64xbf16, #tpu.memory_space<vmem>>, vector<32x64xbf16>
    %cst_12 = arith.constant dense<0.000000e+00> : vector<8x64xf32>
    %28 = tpu.matmul %26, %27, %cst_12 {dimension_numbers = #tpu.dot_dimension_numbers<[1], [0], [0], [1], [0, 0, 1, 1], [], []>} : vector<8x32xbf16>, vector<32x64xbf16>, vector<8x64xf32> -> vector<8x64xf32>
    %c0_13 = arith.constant 0 : index
    %c0_14 = arith.constant 0 : index
    %29 = vector.load %arg6[%c0_13, %c0_14] : memref<32x64xbf16, #tpu.memory_space<vmem>>, vector<32x64xbf16>
    %cst_15 = arith.constant dense<0.000000e+00> : vector<8x64xf32>
    %30 = tpu.matmul %26, %29, %cst_15 {dimension_numbers = #tpu.dot_dimension_numbers<[1], [0], [0], [1], [0, 0, 1, 1], [], []>} : vector<8x32xbf16>, vector<32x64xbf16>, vector<8x64xf32> -> vector<8x64xf32>
    %31 = arith.negf %30 : vector<8x64xf32>
    %32 = math.exp %31 : vector<8x64xf32>
    %cst_16 = arith.constant 1.000000e+00 : f32
    %33 = vector.broadcast %cst_16 : f32 to vector<8x64xf32>
    %34 = arith.addf %33, %32 : vector<8x64xf32>
    %35 = arith.divf %33, %34 : vector<8x64xf32>
    %36 = arith.mulf %30, %35 : vector<8x64xf32>
    %c0_17 = arith.constant 0 : index
    %c0_18 = arith.constant 0 : index
    %37 = vector.load %arg17[%c0_17, %c0_18] : memref<8x64xf32, #tpu.memory_space<vmem>>, vector<8x64xf32>
    tpu.vector_store %arg17[%c0_17, %c0_18], %36 {strides = array<i32>} : memref<8x64xf32, #tpu.memory_space<vmem>>, vector<8x64xf32>,
    %cst_19 = arith.constant 0.000000e+00 : f32
    %38 = vector.broadcast %cst_19 : f32 to vector<8x64xf32>
    %c0_20 = arith.constant 0 : index
    %c0_21 = arith.constant 0 : index
    %39 = vector.load %arg18[%c0_20, %c0_21] : memref<16x64xf32, #tpu.memory_space<vmem>>, vector<8x64xf32>
    tpu.vector_store %arg18[%c0_20, %c0_21], %38 {strides = array<i32>} : memref<16x64xf32, #tpu.memory_space<vmem>>, vector<8x64xf32>,
    %c8 = arith.constant 8 : index
    %c0_22 = arith.constant 0 : index
    %40 = vector.load %arg18[%c8, %c0_22] : memref<16x64xf32, #tpu.memory_space<vmem>>, vector<8x64xf32>
    tpu.vector_store %arg18[%c8, %c0_22], %28 {strides = array<i32>} : memref<16x64xf32, #tpu.memory_space<vmem>>, vector<8x64xf32>,
    %cst_23 = arith.constant 0.000000e+00 : f32
    %41 = vector.broadcast %cst_23 : f32 to vector<8x64xf32>
    %c5 = arith.constant 5 : index
    %c0_24 = arith.constant 0 : index
    %42 = vector.load %arg18[%c5, %c0_24] : memref<16x64xf32, #tpu.memory_space<vmem>>, vector<8x64xf32>
    %c0_25 = arith.constant 0 : index
    %c0_26 = arith.constant 0 : index
    %43 = vector.load %arg7[%c0_25, %c0_26] : memref<4x64xf32, #tpu.memory_space<vmem>>, vector<1x64xf32>
    %44 = vector.broadcast %43 : vector<1x64xf32> to vector<8x64xf32>
    %45 = arith.mulf %42, %44 : vector<8x64xf32>
    %46 = arith.addf %41, %45 : vector<8x64xf32>
    %c6 = arith.constant 6 : index
    %c0_27 = arith.constant 0 : index
    %47 = vector.load %arg18[%c6, %c0_27] : memref<16x64xf32, #tpu.memory_space<vmem>>, vector<8x64xf32>
    %c1 = arith.constant 1 : index
    %c0_28 = arith.constant 0 : index
    %48 = vector.load %arg7[%c1, %c0_28] : memref<4x64xf32, #tpu.memory_space<vmem>>, vector<1x64xf32>
    %49 = vector.broadcast %48 : vector<1x64xf32> to vector<8x64xf32>
    %50 = arith.mulf %47, %49 : vector<8x64xf32>
    %51 = arith.addf %46, %50 : vector<8x64xf32>
    %c7 = arith.constant 7 : index
    %c0_29 = arith.constant 0 : index
    %52 = vector.load %arg18[%c7, %c0_29] : memref<16x64xf32, #tpu.memory_space<vmem>>, vector<8x64xf32>
    %c2 = arith.constant 2 : index
    %c0_30 = arith.constant 0 : index
    %53 = vector.load %arg7[%c2, %c0_30] : memref<4x64xf32, #tpu.memory_space<vmem>>, vector<1x64xf32>
    %54 = vector.broadcast %53 : vector<1x64xf32> to vector<8x64xf32>
    %55 = arith.mulf %52, %54 : vector<8x64xf32>
    %56 = arith.addf %51, %55 : vector<8x64xf32>
    %c8_31 = arith.constant 8 : index
    %c0_32 = arith.constant 0 : index
    %57 = vector.load %arg18[%c8_31, %c0_32] : memref<16x64xf32, #tpu.memory_space<vmem>>, vector<8x64xf32>
    %c3 = arith.constant 3 : index
    %c0_33 = arith.constant 0 : index
    %58 = vector.load %arg7[%c3, %c0_33] : memref<4x64xf32, #tpu.memory_space<vmem>>, vector<1x64xf32>
    %59 = vector.broadcast %58 : vector<1x64xf32> to vector<8x64xf32>
    %60 = arith.mulf %57, %59 : vector<8x64xf32>
    %61 = arith.addf %56, %60 : vector<8x64xf32>
    %c0_34 = arith.constant 0 : index
    %c0_35 = arith.constant 0 : index
    %62 = vector.load %arg8[%c0_34, %c0_35] : memref<1x64xf32, #tpu.memory_space<vmem>>, vector<1x64xf32>
    %63 = vector.broadcast %62 : vector<1x64xf32> to vector<8x64xf32>
    %64 = arith.addf %61, %63 : vector<8x64xf32>
    %65 = arith.negf %64 : vector<8x64xf32>
    %66 = math.exp %65 : vector<8x64xf32>
    %cst_36 = arith.constant 1.000000e+00 : f32
    %67 = vector.broadcast %cst_36 : f32 to vector<8x64xf32>
    %68 = arith.addf %67, %66 : vector<8x64xf32>
    %69 = arith.divf %67, %68 : vector<8x64xf32>
    %70 = arith.mulf %64, %69 : vector<8x64xf32>
    %c8_37 = arith.constant 8 : index
    %c0_38 = arith.constant 0 : index
    %71 = vector.load %arg18[%c8_37, %c0_38] : memref<16x64xf32, #tpu.memory_space<vmem>>, vector<8x64xf32>
    tpu.vector_store %arg18[%c8_37, %c0_38], %70 {strides = array<i32>} : memref<16x64xf32, #tpu.memory_space<vmem>>, vector<8x64xf32>,
    %72 = arith.truncf %70 : vector<8x64xf32> to vector<8x64xbf16>
    %c0_39 = arith.constant 0 : index
    %c0_40 = arith.constant 0 : index
    %73 = vector.load %arg9[%c0_39, %c0_40] : memref<64x128xbf16, #tpu.memory_space<vmem>>, vector<64x128xbf16>
    %cst_41 = arith.constant dense<0.000000e+00> : vector<8x128xf32>
    %74 = tpu.matmul %72, %73, %cst_41 {dimension_numbers = #tpu.dot_dimension_numbers<[1], [0], [0], [1], [0, 0, 1, 1], [], []>} : vector<8x64xbf16>, vector<64x128xbf16>, vector<8x128xf32> -> vector<8x128xf32>
    %75 = vector.extract_strided_slice %74 {offsets = [0, 0], sizes = [8, 64], strides = [1, 1]} : vector<8x128xf32> to vector<8x64xf32>
    %c0_42 = arith.constant 0 : index
    %c0_43 = arith.constant 0 : index
    %76 = vector.load %arg10[%c0_42, %c0_43] : memref<1x64xf32, #tpu.memory_space<vmem>>, vector<1x64xf32>
    %77 = vector.broadcast %76 : vector<1x64xf32> to vector<8x64xf32>
    %78 = arith.addf %75, %77 : vector<8x64xf32>
    %cst_44 = arith.constant 0.000000e+00 : f32
    %79 = vector.broadcast %cst_44 : f32 to vector<8x64xf32>
    %80 = arith.maximumf %78, %79 : vector<8x64xf32>
    %81 = vector.broadcast %cst_44 : f32 to vector<8x64xf32>
    %82 = arith.subf %78, %81 : vector<8x64xf32>
    %83 = arith.cmpf one, %82, %82 : vector<8x64xf32>
    %84 = vector.broadcast %cst_44 : f32 to vector<8x64xf32>
    %85 = arith.addf %78, %84 : vector<8x64xf32>
    %86 = math.absf %82 : vector<8x64xf32>
    %cst_45 = arith.constant 0.000000e+00 : f32
    %87 = vector.broadcast %cst_45 : f32 to vector<8x64xf32>
    %88 = arith.subf %87, %86 : vector<8x64xf32>
    %89 = math.exp %88 : vector<8x64xf32>
    %90 = math.log1p %89 : vector<8x64xf32>
    %91 = arith.addf %80, %90 : vector<8x64xf32>
    %92 = arith.select %83, %85, %91 : vector<8x64xi1>, vector<8x64xf32>
    %c0_46 = arith.constant 0 : index
    %c0_47 = arith.constant 0 : index
    %93 = vector.load %arg15[%c0_46, %c0_47] : memref<8x64xf32, #tpu.memory_space<vmem>>, vector<8x64xf32>
    tpu.vector_store %arg15[%c0_46, %c0_47], %92 {strides = array<i32>} : memref<8x64xf32, #tpu.memory_space<vmem>>, vector<8x64xf32>,
    %94 = vector.extract_strided_slice %74 {offsets = [0, 64], sizes = [8, 64], strides = [1, 1]} : vector<8x128xf32> to vector<8x64xf32>
    %c0_48 = arith.constant 0 : index
    %c0_49 = arith.constant 0 : index
    %95 = vector.load %arg16[%c0_48, %c0_49] : memref<8x64xf32, #tpu.memory_space<vmem>>, vector<8x64xf32>
    tpu.vector_store %arg16[%c0_48, %c0_49], %94 {strides = array<i32>} : memref<8x64xf32, #tpu.memory_space<vmem>>, vector<8x64xf32>,
    %c0_50 = arith.constant 0 : index
    %c0_51 = arith.constant 0 : index
    %96 = vector.load %arg11[%c0_50, %c0_51] : memref<64x64xf32, #tpu.memory_space<vmem>>, vector<64x64xf32>
    %c0_52 = arith.constant 0 : index
    %c0_53 = arith.constant 0 : index
    %97 = vector.load %arg12[%c0_52, %c0_53] : memref<1x64xf32, #tpu.memory_space<vmem>>, vector<1x64xf32>
    %cst_54 = arith.constant 0.000000e+00 : f32
    %98 = vector.broadcast %cst_54 : f32 to vector<64x64xf32>
    %c0_i32 = arith.constant 0 : i32
    %c8_i32 = arith.constant 8 : i32
    %99 = arith.muli %c0_i32, %c8_i32 : i32
    %100 = tpu.assume_multiple %99, 8 : i32
    %101 = arith.index_cast %100 : i32 to index
    %c0_55 = arith.constant 0 : index
    %102 = vector.load %arg15[%101, %c0_55] : memref<8x64xf32, #tpu.memory_space<vmem>>, vector<8x64xf32>
    %c8_i32_56 = arith.constant 8 : i32
    %103 = arith.addi %c8_i32_56, %100 : i32
    %104 = arith.index_cast %103 : i32 to index
    %c0_57 = arith.constant 0 : index
    %105 = vector.load %arg18[%104, %c0_57] : memref<16x64xf32, #tpu.memory_space<vmem>>, vector<8x64xf32>
    %106 = arith.index_cast %100 : i32 to index
    %c0_58 = arith.constant 0 : index
    %107 = vector.load %arg16[%106, %c0_58] : memref<8x64xf32, #tpu.memory_space<vmem>>, vector<8x64xf32>
    %c0_59 = arith.constant 0 : index
    %108 = arith.index_cast %100 : i32 to index
    %c0_60 = arith.constant 0 : index
    %109 = vector.load %arg2[%c0_59, %108, %c0_60] : memref<1x8x64xf32, #tpu.memory_space<vmem>>, vector<1x8x64xf32>
    %110 = vector.shape_cast %109 : vector<1x8x64xf32> to vector<8x64xf32>
    %111 = vector.shape_cast %102 : vector<8x64xf32> to vector<8x1x64xf32>
    %112 = vector.shape_cast %96 : vector<64x64xf32> to vector<1x64x64xf32>
    %113 = vector.broadcast %111 : vector<8x1x64xf32> to vector<8x64x64xf32>
    %114 = vector.broadcast %112 : vector<1x64x64xf32> to vector<8x64x64xf32>
    %115 = arith.mulf %113, %114 : vector<8x64x64xf32>
    %116 = math.exp %115 : vector<8x64x64xf32>
    %c0_61 = arith.constant 0 : index
    %c0_62 = arith.constant 0 : index
    %c0_63 = arith.constant 0 : index
    %117 = vector.load %arg19[%c0_61, %c0_62, %c0_63] : memref<8x64x64xf32, #tpu.memory_space<vmem>>, vector<8x64x64xf32>
    tpu.vector_store %arg19[%c0_61, %c0_62, %c0_63], %116 {strides = array<i32>} : memref<8x64x64xf32, #tpu.memory_space<vmem>>, vector<8x64x64xf32>,
    %118 = arith.mulf %102, %105 : vector<8x64xf32>
    %119 = vector.shape_cast %118 : vector<8x64xf32> to vector<8x1x64xf32>
    %120 = vector.shape_cast %107 : vector<8x64xf32> to vector<8x64x1xf32>
    %121 = vector.broadcast %119 : vector<8x1x64xf32> to vector<8x64x64xf32>
    %122 = vector.broadcast %120 : vector<8x64x1xf32> to vector<8x64x64xf32>
    %123 = arith.mulf %121, %122 : vector<8x64x64xf32>
    %c0_64 = arith.constant 0 : index
    %c0_65 = arith.constant 0 : index
    %c0_66 = arith.constant 0 : index
    %124 = vector.load %arg20[%c0_64, %c0_65, %c0_66] : memref<8x64x64xf32, #tpu.memory_space<vmem>>, vector<8x64x64xf32>
    tpu.vector_store %arg20[%c0_64, %c0_65, %c0_66], %123 {strides = array<i32>} : memref<8x64x64xf32, #tpu.memory_space<vmem>>, vector<8x64x64xf32>,
    %c0_i32_67 = arith.constant 0 : i32
    %125 = arith.index_cast %c0_i32_67 : i32 to index
    %c0_68 = arith.constant 0 : index
    %c0_69 = arith.constant 0 : index
    %126 = vector.load %arg19[%125, %c0_68, %c0_69] : memref<8x64x64xf32, #tpu.memory_space<vmem>>, vector<1x64x64xf32>
    %127 = vector.shape_cast %126 : vector<1x64x64xf32> to vector<64x64xf32>
    %128 = arith.mulf %127, %98 : vector<64x64xf32>
    %129 = arith.index_cast %c0_i32_67 : i32 to index
    %c0_70 = arith.constant 0 : index
    %c0_71 = arith.constant 0 : index
    %130 = vector.load %arg20[%129, %c0_70, %c0_71] : memref<8x64x64xf32, #tpu.memory_space<vmem>>, vector<1x64x64xf32>
    %131 = vector.shape_cast %130 : vector<1x64x64xf32> to vector<64x64xf32>
    %132 = arith.addf %128, %131 : vector<64x64xf32>
    %133 = arith.index_cast %c0_i32_67 : i32 to index
    %c0_72 = arith.constant 0 : index
    %c0_73 = arith.constant 0 : index
    %134 = vector.load %arg20[%133, %c0_72, %c0_73] : memref<8x64x64xf32, #tpu.memory_space<vmem>>, vector<1x64x64xf32>
    %135 = vector.shape_cast %134 : vector<1x64x64xf32> to vector<64x64xf32>
    %136 = vector.shape_cast %132 : vector<64x64xf32> to vector<1x64x64xf32>
    tpu.vector_store %arg20[%133, %c0_72, %c0_73], %136 {strides = array<i32>} : memref<8x64x64xf32, #tpu.memory_space<vmem>>, vector<1x64x64xf32>,
    %c1_i32 = arith.constant 1 : i32
    %137 = arith.index_cast %c1_i32 : i32 to index
    %c0_74 = arith.constant 0 : index
    %c0_75 = arith.constant 0 : index
    %138 = vector.load %arg19[%137, %c0_74, %c0_75] : memref<8x64x64xf32, #tpu.memory_space<vmem>>, vector<1x64x64xf32>
    %139 = vector.shape_cast %138 : vector<1x64x64xf32> to vector<64x64xf32>
    %140 = arith.mulf %139, %132 : vector<64x64xf32>
    %141 = arith.index_cast %c1_i32 : i32 to index
    %c0_76 = arith.constant 0 : index
    %c0_77 = arith.constant 0 : index
    %142 = vector.load %arg20[%141, %c0_76, %c0_77] : memref<8x64x64xf32, #tpu.memory_space<vmem>>, vector<1x64x64xf32>
    %143 = vector.shape_cast %142 : vector<1x64x64xf32> to vector<64x64xf32>
    %144 = arith.addf %140, %143 : vector<64x64xf32>
    %145 = arith.index_cast %c1_i32 : i32 to index
    %c0_78 = arith.constant 0 : index
    %c0_79 = arith.constant 0 : index
    %146 = vector.load %arg20[%145, %c0_78, %c0_79] : memref<8x64x64xf32, #tpu.memory_space<vmem>>, vector<1x64x64xf32>
    %147 = vector.shape_cast %146 : vector<1x64x64xf32> to vector<64x64xf32>
    %148 = vector.shape_cast %144 : vector<64x64xf32> to vector<1x64x64xf32>
    tpu.vector_store %arg20[%145, %c0_78, %c0_79], %148 {strides = array<i32>} : memref<8x64x64xf32, #tpu.memory_space<vmem>>, vector<1x64x64xf32>,
    %c2_i32 = arith.constant 2 : i32
    %149 = arith.index_cast %c2_i32 : i32 to index
    %c0_80 = arith.constant 0 : index
    %c0_81 = arith.constant 0 : index
    %150 = vector.load %arg19[%149, %c0_80, %c0_81] : memref<8x64x64xf32, #tpu.memory_space<vmem>>, vector<1x64x64xf32>
    %151 = vector.shape_cast %150 : vector<1x64x64xf32> to vector<64x64xf32>
    %152 = arith.mulf %151, %144 : vector<64x64xf32>
    %153 = arith.index_cast %c2_i32 : i32 to index
    %c0_82 = arith.constant 0 : index
    %c0_83 = arith.constant 0 : index
    %154 = vector.load %arg20[%153, %c0_82, %c0_83] : memref<8x64x64xf32, #tpu.memory_space<vmem>>, vector<1x64x64xf32>
    %155 = vector.shape_cast %154 : vector<1x64x64xf32> to vector<64x64xf32>
    %156 = arith.addf %152, %155 : vector<64x64xf32>
    %157 = arith.index_cast %c2_i32 : i32 to index
    %c0_84 = arith.constant 0 : index
    %c0_85 = arith.constant 0 : index
    %158 = vector.load %arg20[%157, %c0_84, %c0_85] : memref<8x64x64xf32, #tpu.memory_space<vmem>>, vector<1x64x64xf32>
    %159 = vector.shape_cast %158 : vector<1x64x64xf32> to vector<64x64xf32>
    %160 = vector.shape_cast %156 : vector<64x64xf32> to vector<1x64x64xf32>
    tpu.vector_store %arg20[%157, %c0_84, %c0_85], %160 {strides = array<i32>} : memref<8x64x64xf32, #tpu.memory_space<vmem>>, vector<1x64x64xf32>,
    %c3_i32 = arith.constant 3 : i32
    %161 = arith.index_cast %c3_i32 : i32 to index
    %c0_86 = arith.constant 0 : index
    %c0_87 = arith.constant 0 : index
    %162 = vector.load %arg19[%161, %c0_86, %c0_87] : memref<8x64x64xf32, #tpu.memory_space<vmem>>, vector<1x64x64xf32>
    %163 = vector.shape_cast %162 : vector<1x64x64xf32> to vector<64x64xf32>
    %164 = arith.mulf %163, %156 : vector<64x64xf32>
    %165 = arith.index_cast %c3_i32 : i32 to index
    %c0_88 = arith.constant 0 : index
    %c0_89 = arith.constant 0 : index
    %166 = vector.load %arg20[%165, %c0_88, %c0_89] : memref<8x64x64xf32, #tpu.memory_space<vmem>>, vector<1x64x64xf32>
    %167 = vector.shape_cast %166 : vector<1x64x64xf32> to vector<64x64xf32>
    %168 = arith.addf %164, %167 : vector<64x64xf32>
    %169 = arith.index_cast %c3_i32 : i32 to index
    %c0_90 = arith.constant 0 : index
    %c0_91 = arith.constant 0 : index
    %170 = vector.load %arg20[%169, %c0_90, %c0_91] : memref<8x64x64xf32, #tpu.memory_space<vmem>>, vector<1x64x64xf32>
    %171 = vector.shape_cast %170 : vector<1x64x64xf32> to vector<64x64xf32>
    %172 = vector.shape_cast %168 : vector<64x64xf32> to vector<1x64x64xf32>
    tpu.vector_store %arg20[%169, %c0_90, %c0_91], %172 {strides = array<i32>} : memref<8x64x64xf32, #tpu.memory_space<vmem>>, vector<1x64x64xf32>,
    %c4_i32 = arith.constant 4 : i32
    %173 = arith.index_cast %c4_i32 : i32 to index
    %c0_92 = arith.constant 0 : index
    %c0_93 = arith.constant 0 : index
    %174 = vector.load %arg19[%173, %c0_92, %c0_93] : memref<8x64x64xf32, #tpu.memory_space<vmem>>, vector<1x64x64xf32>
    %175 = vector.shape_cast %174 : vector<1x64x64xf32> to vector<64x64xf32>
    %176 = arith.mulf %175, %168 : vector<64x64xf32>
    %177 = arith.index_cast %c4_i32 : i32 to index
    %c0_94 = arith.constant 0 : index
    %c0_95 = arith.constant 0 : index
    %178 = vector.load %arg20[%177, %c0_94, %c0_95] : memref<8x64x64xf32, #tpu.memory_space<vmem>>, vector<1x64x64xf32>
    %179 = vector.shape_cast %178 : vector<1x64x64xf32> to vector<64x64xf32>
    %180 = arith.addf %176, %179 : vector<64x64xf32>
    %181 = arith.index_cast %c4_i32 : i32 to index
    %c0_96 = arith.constant 0 : index
    %c0_97 = arith.constant 0 : index
    %182 = vector.load %arg20[%181, %c0_96, %c0_97] : memref<8x64x64xf32, #tpu.memory_space<vmem>>, vector<1x64x64xf32>
    %183 = vector.shape_cast %182 : vector<1x64x64xf32> to vector<64x64xf32>
    %184 = vector.shape_cast %180 : vector<64x64xf32> to vector<1x64x64xf32>
    tpu.vector_store %arg20[%181, %c0_96, %c0_97], %184 {strides = array<i32>} : memref<8x64x64xf32, #tpu.memory_space<vmem>>, vector<1x64x64xf32>,
    %c5_i32 = arith.constant 5 : i32
    %185 = arith.index_cast %c5_i32 : i32 to index
    %c0_98 = arith.constant 0 : index
    %c0_99 = arith.constant 0 : index
    %186 = vector.load %arg19[%185, %c0_98, %c0_99] : memref<8x64x64xf32, #tpu.memory_space<vmem>>, vector<1x64x64xf32>
    %187 = vector.shape_cast %186 : vector<1x64x64xf32> to vector<64x64xf32>
    %188 = arith.mulf %187, %180 : vector<64x64xf32>
    %189 = arith.index_cast %c5_i32 : i32 to index
    %c0_100 = arith.constant 0 : index
    %c0_101 = arith.constant 0 : index
    %190 = vector.load %arg20[%189, %c0_100, %c0_101] : memref<8x64x64xf32, #tpu.memory_space<vmem>>, vector<1x64x64xf32>
    %191 = vector.shape_cast %190 : vector<1x64x64xf32> to vector<64x64xf32>
    %192 = arith.addf %188, %191 : vector<64x64xf32>
    %193 = arith.index_cast %c5_i32 : i32 to index
    %c0_102 = arith.constant 0 : index
    %c0_103 = arith.constant 0 : index
    %194 = vector.load %arg20[%193, %c0_102, %c0_103] : memref<8x64x64xf32, #tpu.memory_space<vmem>>, vector<1x64x64xf32>
    %195 = vector.shape_cast %194 : vector<1x64x64xf32> to vector<64x64xf32>
    %196 = vector.shape_cast %192 : vector<64x64xf32> to vector<1x64x64xf32>
    tpu.vector_store %arg20[%193, %c0_102, %c0_103], %196 {strides = array<i32>} : memref<8x64x64xf32, #tpu.memory_space<vmem>>, vector<1x64x64xf32>,
    %c6_i32 = arith.constant 6 : i32
    %197 = arith.index_cast %c6_i32 : i32 to index
    %c0_104 = arith.constant 0 : index
    %c0_105 = arith.constant 0 : index
    %198 = vector.load %arg19[%197, %c0_104, %c0_105] : memref<8x64x64xf32, #tpu.memory_space<vmem>>, vector<1x64x64xf32>
    %199 = vector.shape_cast %198 : vector<1x64x64xf32> to vector<64x64xf32>
    %200 = arith.mulf %199, %192 : vector<64x64xf32>
    %201 = arith.index_cast %c6_i32 : i32 to index
    %c0_106 = arith.constant 0 : index
    %c0_107 = arith.constant 0 : index
    %202 = vector.load %arg20[%201, %c0_106, %c0_107] : memref<8x64x64xf32, #tpu.memory_space<vmem>>, vector<1x64x64xf32>
    %203 = vector.shape_cast %202 : vector<1x64x64xf32> to vector<64x64xf32>
    %204 = arith.addf %200, %203 : vector<64x64xf32>
    %205 = arith.index_cast %c6_i32 : i32 to index
    %c0_108 = arith.constant 0 : index
    %c0_109 = arith.constant 0 : index
    %206 = vector.load %arg20[%205, %c0_108, %c0_109] : memref<8x64x64xf32, #tpu.memory_space<vmem>>, vector<1x64x64xf32>
    %207 = vector.shape_cast %206 : vector<1x64x64xf32> to vector<64x64xf32>
    %208 = vector.shape_cast %204 : vector<64x64xf32> to vector<1x64x64xf32>
    tpu.vector_store %arg20[%205, %c0_108, %c0_109], %208 {strides = array<i32>} : memref<8x64x64xf32, #tpu.memory_space<vmem>>, vector<1x64x64xf32>,
    %c7_i32 = arith.constant 7 : i32
    %209 = arith.index_cast %c7_i32 : i32 to index
    %c0_110 = arith.constant 0 : index
    %c0_111 = arith.constant 0 : index
    %210 = vector.load %arg19[%209, %c0_110, %c0_111] : memref<8x64x64xf32, #tpu.memory_space<vmem>>, vector<1x64x64xf32>
    %211 = vector.shape_cast %210 : vector<1x64x64xf32> to vector<64x64xf32>
    %212 = arith.mulf %211, %204 : vector<64x64xf32>
    %213 = arith.index_cast %c7_i32 : i32 to index
    %c0_112 = arith.constant 0 : index
    %c0_113 = arith.constant 0 : index
    %214 = vector.load %arg20[%213, %c0_112, %c0_113] : memref<8x64x64xf32, #tpu.memory_space<vmem>>, vector<1x64x64xf32>
    %215 = vector.shape_cast %214 : vector<1x64x64xf32> to vector<64x64xf32>
    %216 = arith.addf %212, %215 : vector<64x64xf32>
    %217 = arith.index_cast %c7_i32 : i32 to index
    %c0_114 = arith.constant 0 : index
    %c0_115 = arith.constant 0 : index
    %218 = vector.load %arg20[%217, %c0_114, %c0_115] : memref<8x64x64xf32, #tpu.memory_space<vmem>>, vector<1x64x64xf32>
    %219 = vector.shape_cast %218 : vector<1x64x64xf32> to vector<64x64xf32>
    %220 = vector.shape_cast %216 : vector<64x64xf32> to vector<1x64x64xf32>
    tpu.vector_store %arg20[%217, %c0_114, %c0_115], %220 {strides = array<i32>} : memref<8x64x64xf32, #tpu.memory_space<vmem>>, vector<1x64x64xf32>,
    %c8_i32_116 = arith.constant 8 : i32
    %c0_117 = arith.constant 0 : index
    %c0_118 = arith.constant 0 : index
    %c0_119 = arith.constant 0 : index
    %221 = vector.load %arg20[%c0_117, %c0_118, %c0_119] : memref<8x64x64xf32, #tpu.memory_space<vmem>>, vector<8x64x64xf32>
    %222 = vector.shape_cast %110 : vector<8x64xf32> to vector<8x64x1xf32>
    %223 = vector.broadcast %222 : vector<8x64x1xf32> to vector<8x64x64xf32>
    %224 = arith.mulf %221, %223 : vector<8x64x64xf32>
    %cst_120 = arith.constant dense<0.000000e+00> : vector<8x64xf32>
    %225 = vector.multi_reduction <add>, %224, %cst_120 [1] : vector<8x64x64xf32> to vector<8x64xf32>
    %226 = vector.broadcast %97 : vector<1x64xf32> to vector<8x64xf32>
    %227 = arith.mulf %226, %105 : vector<8x64xf32>
    %228 = arith.addf %225, %227 : vector<8x64xf32>
    %229 = arith.index_cast %100 : i32 to index
    %c0_121 = arith.constant 0 : index
    %230 = vector.load %arg15[%229, %c0_121] : memref<8x64xf32, #tpu.memory_space<vmem>>, vector<8x64xf32>
    tpu.vector_store %arg15[%229, %c0_121], %228 {strides = array<i32>} : memref<8x64xf32, #tpu.memory_space<vmem>>, vector<8x64xf32>,
    %c1_i32_122 = arith.constant 1 : i32
    %c0_123 = arith.constant 0 : index
    %c0_124 = arith.constant 0 : index
    %231 = vector.load %arg15[%c0_123, %c0_124] : memref<8x64xf32, #tpu.memory_space<vmem>>, vector<8x64xf32>
    %c0_125 = arith.constant 0 : index
    %c0_126 = arith.constant 0 : index
    %232 = vector.load %arg17[%c0_125, %c0_126] : memref<8x64xf32, #tpu.memory_space<vmem>>, vector<8x64xf32>
    %233 = arith.mulf %231, %232 : vector<8x64xf32>
    %234 = arith.truncf %233 : vector<8x64xf32> to vector<8x64xbf16>
    %c0_127 = arith.constant 0 : index
    %c0_128 = arith.constant 0 : index
    %235 = vector.load %arg13[%c0_127, %c0_128] : memref<64x128xbf16, #tpu.memory_space<vmem>>, vector<64x128xbf16>
    %cst_129 = arith.constant dense<0.000000e+00> : vector<8x128xf32>
    %236 = tpu.matmul %234, %235, %cst_129 {dimension_numbers = #tpu.dot_dimension_numbers<[1], [0], [0], [1], [0, 0, 1, 1], [], []>} : vector<8x64xbf16>, vector<64x128xbf16>, vector<8x128xf32> -> vector<8x128xf32>
    %c0_130 = arith.constant 0 : index
    %c0_131 = arith.constant 0 : index
    %c0_132 = arith.constant 0 : index
    %237 = vector.load %arg14[%c0_130, %c0_131, %c0_132] : memref<1x8x128xf32, #tpu.memory_space<vmem>>, vector<1x8x128xf32>
    %238 = vector.shape_cast %237 : vector<1x8x128xf32> to vector<8x128xf32>
    %239 = vector.shape_cast %236 : vector<8x128xf32> to vector<1x8x128xf32>
    tpu.vector_store %arg14[%c0_130, %c0_131, %c0_132], %239 {strides = array<i32>} : memref<1x8x128xf32, #tpu.memory_space<vmem>>, vector<1x8x128xf32>,
    return
  }
  func.func @transform_0(%arg0: i32) -> (i32, i32, i32) {
    %c0_i32 = arith.constant 0 : i32
    %c0_i32_0 = arith.constant 0 : i32
    %c0_i32_1 = arith.constant 0 : i32
    return %arg0, %c0_i32, %c0_i32_0 : i32, i32, i32
  }
  func.func @transform_1(%arg0: i32) -> (i32, i32, i32) {
    %c0_i32 = arith.constant 0 : i32
    %c0_i32_0 = arith.constant 0 : i32
    %c0_i32_1 = arith.constant 0 : i32
    return %arg0, %c0_i32, %c0_i32_0 : i32, i32, i32
  }
  func.func @transform_2(%arg0: i32) -> (i32, i32) {
    %c0_i32 = arith.constant 0 : i32
    %c0_i32_0 = arith.constant 0 : i32
    %c0_i32_1 = arith.constant 0 : i32
    return %c0_i32, %c0_i32_0 : i32, i32
  }
  func.func @transform_3(%arg0: i32) -> (i32, i32) {
    %c0_i32 = arith.constant 0 : i32
    %c0_i32_0 = arith.constant 0 : i32
    %c0_i32_1 = arith.constant 0 : i32
    return %c0_i32, %c0_i32_0 : i32, i32
  }
  func.func @transform_4(%arg0: i32) -> (i32, i32) {
    %c0_i32 = arith.constant 0 : i32
    %c0_i32_0 = arith.constant 0 : i32
    %c0_i32_1 = arith.constant 0 : i32
    return %c0_i32, %c0_i32_0 : i32, i32
  }
  func.func @transform_5(%arg0: i32) -> (i32, i32) {
    %c0_i32 = arith.constant 0 : i32
    %c0_i32_0 = arith.constant 0 : i32
    %c0_i32_1 = arith.constant 0 : i32
    return %c0_i32, %c0_i32_0 : i32, i32
  }
  func.func @transform_6(%arg0: i32) -> (i32, i32) {
    %c0_i32 = arith.constant 0 : i32
    %c0_i32_0 = arith.constant 0 : i32
    %c0_i32_1 = arith.constant 0 : i32
    return %c0_i32, %c0_i32_0 : i32, i32
  }
  func.func @transform_7(%arg0: i32) -> (i32, i32) {
    %c0_i32 = arith.constant 0 : i32
    %c0_i32_0 = arith.constant 0 : i32
    %c0_i32_1 = arith.constant 0 : i32
    return %c0_i32, %c0_i32_0 : i32, i32
  }
  func.func @transform_8(%arg0: i32) -> (i32, i32) {
    %c0_i32 = arith.constant 0 : i32
    %c0_i32_0 = arith.constant 0 : i32
    %c0_i32_1 = arith.constant 0 : i32
    return %c0_i32, %c0_i32_0 : i32, i32
  }
  func.func @transform_9(%arg0: i32) -> (i32, i32) {
    %c0_i32 = arith.constant 0 : i32
    %c0_i32_0 = arith.constant 0 : i32
    %c0_i32_1 = arith.constant 0 : i32
    return %c0_i32, %c0_i32_0 : i32, i32
  }
  func.func @transform_10(%arg0: i32) -> (i32, i32) {
    %c0_i32 = arith.constant 0 : i32
    %c0_i32_0 = arith.constant 0 : i32
    %c0_i32_1 = arith.constant 0 : i32
    return %c0_i32, %c0_i32_0 : i32, i32
  }
  func.func @transform_11(%arg0: i32) -> (i32, i32) {
    %c0_i32 = arith.constant 0 : i32
    %c0_i32_0 = arith.constant 0 : i32
    %c0_i32_1 = arith.constant 0 : i32
    return %c0_i32, %c0_i32_0 : i32, i32
  }
  func.func @transform_12(%arg0: i32) -> (i32, i32) {
    %c0_i32 = arith.constant 0 : i32
    %c0_i32_0 = arith.constant 0 : i32
    %c0_i32_1 = arith.constant 0 : i32
    return %c0_i32, %c0_i32_0 : i32, i32
  }
  func.func @transform_13(%arg0: i32) -> (i32, i32, i32) {
    %c0_i32 = arith.constant 0 : i32
    %c0_i32_0 = arith.constant 0 : i32
    %c0_i32_1 = arith.constant 0 : i32
    return %arg0, %c0_i32, %c0_i32_0 : i32, i32, i32
  }
}

</mosaic_0001>

<bundles_post_ra>
// kernel: tpu_custom_call.1
= control target key start
LH: loop header
LB: loop body
LE: loop exit
PB: predicated region body
PF: predicated region fallthrough
CT: control target
= control target key end

     0   :  { %s5130_s0 = inlined_call_operand.hbm [shape: f32[2,8,32], index: 0, kind: input, shape index: {}]   ;;  %s5131_s1 = inlined_call_operand.hbm [shape: f32[2,8,64], index: 1, kind: input, shape index: {}]   ;;  %s5132_s2 = inlined_call_operand.vmem [shape: f32[1,32], index: 2, kind: input, shape index: {}]   ;;  %s5133_s3 = inlined_call_operand.vmem [shape: f32[1,32], index: 3, kind: input, shape index: {}]   ;;  %s5134_s4 = inlined_call_operand.hbm [shape: bf16[32,64], index: 4, kind: input, shape index: {}]   ;;  %s5135_s5 = inlined_call_operand.hbm [shape: bf16[32,64], index: 5, kind: input, shape index: {}]   ;;  %s5136_s6 = inlined_call_operand.vmem [shape: f32[4,64], index: 6, kind: input, shape index: {}]   ;;  %s5137_s7 = inlined_call_operand.vmem [shape: f32[1,64], index: 7, kind: input, shape index: {}]   ;;  %s5138_s8 = inlined_call_operand.hbm [shape: bf16[64,128], index: 8, kind: input, shape index: {}]   ;;  %s5139_s9 = inlined_call_operand.vmem [shape: f32[1,64], index: 9, kind: input, shape index: {}]   ;;  %s5140_s10 = inlined_call_operand.hbm [shape: f32[64,64], index: 10, kind: input, shape index: {}]   ;;  %s5141_s11 = inlined_call_operand.vmem [shape: f32[1,64], index: 11, kind: input, shape index: {}]   ;;  %s5142_s12 = inlined_call_operand.vmem [shape: bf16[64,128], index: 12, kind: input, shape index: {}]   ;;  %s5143_s13 = inlined_call_operand.hbm [shape: f32[2,8,128], index: 13, kind: output, shape index: {}]  }
   0x1   :  { %5159 = sst [smem:[#allocation48_spill]] %s5134_s4 }
   0x2   :  { %5160 = sst [smem:[#allocation49_spill]] %s5135_s5 }
   0x3   :  { %5161 = sst [smem:[#allocation50_spill]] %s5137_s7 }
   0x4   :  { %5162 = sst [smem:[#allocation51_spill]] %s5138_s8 }
   0x5   :  { %5163 = sst [smem:[#allocation52_spill]] %s5139_s9 }
   0x6   :  { %5164 = sst [smem:[#allocation53_spill]] %s5140_s10 }
   0x7   :  { %5165 = sst [smem:[#allocation54_spill]] %s5141_s11 }
   0x8   :  { %5166 = sst [smem:[#allocation55_spill]] %s5142_s12 }
   0x9   :  { %5167 = sst [smem:[#allocation56_spill]] %s5143_s13 }
   0xa   :  { %18 = vsyncpa [#allocation9], 0 }
   0xb   :  { %20 = vsyncpa [#allocation9 + $0x1], 0 }
   0xc   :  { %21 = vsyncpa [#allocation12], 0 }
   0xd   :  { %23 = vsyncpa [#allocation12 + $0x1], 0 }
   0xe   :  { %24 = vsyncpa [#allocation15], 0 }
   0xf   :  { %25 = vsyncpa [#allocation18], 0 }
  0x10   :  { %26 = vsyncpa [#allocation10], 0 }
  0x11   :  { %28 = vsyncpa [#allocation10 + $0x1], 0  ;;  %s3628_s25 = smov 0   ;;  %s3630_s26 = smov 0  }
  0x12   :  { %s3632_s27 = smov 0   ;;  %s3634_s28 = smov 0  }
  0x13 LB: > { %s3543_s29 = smov [#allocation13]   ;;  %s3649_s14 = sadd.s32 4294967295, %s3541_s28   ;;  %s3541_s28 = sphi %s3634_s28, %s5252_s28   ;;  %s3537_s27 = sphi %s3632_s27, %s5251_s27   ;;  %s3533_s26 = sphi %s3630_s26, %s5250_s26   ;;  %s3529_s25 = sphi %s3628_s25, %s5249_s25  }
  0x14   : > { %s366_s30 = sshll.u32 %s3543_s29, 4  ;;  %p2926_p0 = scmp.ge.s32.totalorder %s3541_s28, 1  ;;  %s3654_s30 = int_to_ptr.vmem [resolvable:$true] %s366_s30 }
  0x15   : > { %p5146_p1 = scmp.eq.s32.totalorder %s3649_s14, 0  ;;  %p348_p2 = scmp.lt.s32.totalorder %s3541_s28, 3 }
  0x16   : > { %s3544_s16 = smov [#allocation14]   ;;  %s3545_s19 = smov [#allocation16]  }
  0x17   : > { %p3656_p3 = pnand %p2926_p0, %p348_p2  ;;  %s379_s17 = sshll.u32 %s3544_s16, 4  ;;  %s3669_s17 = int_to_ptr.vmem [resolvable:$true] %s379_s17 }
  0x18   : > { %s398_s20 = sshll.u32 %s3545_s19, 4  ;;  %s5170_s4 = sld [smem:[#allocation48_spill]]  ;;  %s3671_s20 = int_to_ptr.vmem [resolvable:$true] %s398_s20 }
  0x19   : > { %s5168_s15 = scalar_select %p3656_p3, 1, 0 }
  0x1a   : > { %p3053_p5 = pneg %p3656_p3 }
  0x1c   : > { %p3665_p6 = pnand %p3053_p5, %p5146_p1 }
  0x1e   : > { %s3287_s23 = scalar_lea.hbm %s5170_s4, 256  ;;  %p3681_p8 = pneg %p3665_p6 }
  0x1f   : > { %p3288_p7 = scmp.ne.s32.totalorder %s5170_s4, %s3287_s23  ;;  %p3294_p11 = scmp.lt.u32.totalorder %s3287_s23, %s5170_s4 }
  0x21   : > { %p3290_p9 = pnand %p3681_p8, %p3288_p7 }
  0x23   : > { %p3291_p10 = pneg %p3290_p9 }
  0x25   : > { %p3296_p12 = pnand %p3294_p11, %p3291_p10 }
  0x27   : > { %3299 = shalt.err (!%p3296_p12)
}
  0x28   : > { %s3300_s21 = scalar_lea.vmem %s3654_s30, 256  ;;  %p3308_p5 = scmp.lt.s32.totalorder %s3654_s30, %s3654_s30 }
  0x29   : > { %p3301_p13 = scmp.ne.s32.totalorder %s3654_s30, %s3300_s21  ;;  %p3309_p4 = scmp.lt.s32.totalorder %s3300_s21, %s3300_s21 }
  0x2b   : > { %p3303_p0 = pnand %p3301_p13, %p3681_p8  ;;  %p3310_p7 = por %p3309_p4, %p3308_p5 }
  0x2d   : > { %p3304_p2 = pneg %p3303_p0 }
  0x2f   : > { %p3311_p9 = pnand %p3310_p7, %p3304_p2 }
  0x31   : > { %3314 = shalt.err (!%p3311_p9)
}
  0x32   : > { %s3546_s22 = smov 64   ;;  %s3547_s13 = smov 4  }
  0x33   : > { %3056 = dma.hbm_to_vmem [thread:$0]  (!%p3665_p6), %s5170_s4, 256, %s3654_s30, [#allocation12], %s3546_s22, %s3546_s22, %s3547_s13  }
  0x34   : > { %s5172_s5 = sld [smem:[#allocation49_spill]] }
  0x3a   : > { %s3315_s21 = scalar_lea.hbm %s5172_s5, 256 }
  0x3b   : > { %p3316_p4 = scmp.ne.s32.totalorder %s5172_s5, %s3315_s21  ;;  %p3322_p12 = scmp.lt.u32.totalorder %s3315_s21, %s5172_s5 }
  0x3d   : > { %p3318_p10 = pnand %p3316_p4, %p3681_p8 }
  0x3f   : > { %p3319_p11 = pneg %p3318_p10 }
  0x41   : > { %p3324_p13 = pnand %p3322_p12, %p3319_p11 }
  0x43   : > { %3327 = shalt.err (!%p3324_p13)
}
  0x44   : > { %s3328_s30 = scalar_lea.vmem %s3669_s17, 256  ;;  %p3336_p7 = scmp.lt.s32.totalorder %s3669_s17, %s3669_s17 }
  0x45   : > { %p3329_p0 = scmp.ne.s32.totalorder %s3669_s17, %s3328_s30  ;;  %p3337_p9 = scmp.lt.s32.totalorder %s3328_s30, %s3328_s30 }
  0x47   : > { %p3331_p2 = pnand %p3329_p0, %p3681_p8  ;;  %p3338_p4 = por %p3337_p9, %p3336_p7 }
  0x49   : > { %p3332_p5 = pneg %p3331_p2 }
  0x4b   : > { %p3339_p10 = pnand %p3338_p4, %p3332_p5 }
  0x4d   : > { %3342 = shalt.err (!%p3339_p10)
}
  0x4e   : > { %3059 = dma.hbm_to_vmem [thread:$0]  (!%p3665_p6), %s5172_s5, 256, %s3669_s17, [#allocation15], %s3546_s22, %s3546_s22, %s3547_s13  }
  0x4f   : > { %s5173_s8 = sld [smem:[#allocation51_spill]] }
  0x55   : > { %s3343_s23 = scalar_lea.hbm %s5173_s8, 512 }
  0x56   : > { %p3344_p11 = scmp.ne.s32.totalorder %s5173_s8, %s3343_s23  ;;  %p3350_p0 = scmp.lt.u32.totalorder %s3343_s23, %s5173_s8 }
  0x58   : > { %p3346_p12 = pnand %p3344_p11, %p3681_p8 }
  0x5a   : > { %p3347_p13 = pneg %p3346_p12 }
  0x5c   : > { %p3352_p2 = pnand %p3350_p0, %p3347_p13 }
  0x5e   : > { %3355 = shalt.err (!%p3352_p2)
}
  0x5f   : > { %s3356_s17 = scalar_lea.vmem %s3671_s20, 512  ;;  %p3364_p4 = scmp.lt.s32.totalorder %s3671_s20, %s3671_s20 }
  0x60   : > { %p3357_p5 = scmp.ne.s32.totalorder %s3671_s20, %s3356_s17  ;;  %p3365_p10 = scmp.lt.s32.totalorder %s3356_s17, %s3356_s17 }
  0x62   : > { %p3359_p7 = pnand %p3357_p5, %p3681_p8  ;;  %p3366_p11 = por %p3365_p10, %p3364_p4 }
  0x64   : > { %p3360_p9 = pneg %p3359_p7 }
  0x66   : > { %p3367_p12 = pnand %p3366_p11, %p3360_p9 }
  0x68   : > { %3370 = shalt.err (!%p3367_p12)
}
  0x69   : > { %3062 = dma.hbm_to_vmem [thread:$0]  (!%p3665_p6), %s5173_s8, 512, %s3671_s20, [#allocation15], %s3546_s22, %s3546_s22, %s3547_s13  }
  0x6a   : > { %s3548_s9 = smov [#allocation17]   ;;  %s5174_s10 = sld [smem:[#allocation53_spill]] }
  0x6b   : > { %s414_s11 = sshll.u32 %s3548_s9, 4  ;;  %s415_s11 = int_to_ptr.vmem [resolvable:$true] %s414_s11 }
  0x70   : > { %s3371_s24 = scalar_lea.hbm %s5174_s10, 1024 }
  0x71   : > { %p3372_p13 = scmp.ne.s32.totalorder %s5174_s10, %s3371_s24  ;;  %p3378_p5 = scmp.lt.u32.totalorder %s3371_s24, %s5174_s10 }
  0x73   : > { %p3374_p0 = pnand %p3372_p13, %p3681_p8 }
  0x75   : > { %p3375_p2 = pneg %p3374_p0 }
  0x77   : > { %p3380_p7 = pnand %p3378_p5, %p3375_p2 }
  0x79   : > { %3383 = shalt.err (!%p3380_p7)
}
  0x7a   : > { %s3384_s20 = scalar_lea.vmem %s415_s11, 1024  ;;  %p3392_p11 = scmp.lt.s32.totalorder %s415_s11, %s415_s11 }
  0x7b   : > { %p3385_p9 = scmp.ne.s32.totalorder %s415_s11, %s3384_s20  ;;  %p3393_p12 = scmp.lt.s32.totalorder %s3384_s20, %s3384_s20 }
  0x7d   : > { %p3387_p4 = pnand %p3385_p9, %p3681_p8  ;;  %p3394_p1 = por %p3393_p12, %p3392_p11 }
  0x7f   : > { %p3388_p10 = pneg %p3387_p4 }
  0x81   : > { %p3395_p3 = pnand %p3394_p1, %p3388_p10 }
  0x83   : > { %3398 = shalt.err (!%p3395_p3)
}
  0x84   : > { %s3549_s22 = smov 128   ;;  %s3550_s16 = smov 8  }
  0x85   : > { %3065 = dma.hbm_to_vmem [thread:$0]  (!%p3665_p6), %s5174_s10, 1024, %s415_s11, [#allocation18], %s3549_s22, %s3549_s22, %s3550_s16  }
  0x86   : > { %s2925_s7 = sadd.s32 4294967294, %s3541_s28   ;;  %s3777_s9 = sadd.s32 1, %s3541_s28  }
  0x87   : > { %s38_s12 = ssub.s32 %s3541_s28, %s3777_s9  ;;  %s41_s23 = sadd.s32 1, %s3537_s27 }
  0x88   : > { %p39_p1 = scmp.eq.s32.totalorder %s38_s12, 0  ;;  %p48_p3 = scmp.ne.s32.totalorder %s3537_s27, %s3533_s26 }
  0x89   : > { %p49_p8 = scmp.eq.s32.totalorder %s3541_s28, 0  ;;  %p54_p13 = scmp.ne.s32.totalorder %s3533_s26, %s3529_s25 }
  0x8a   : > { %s3788_s24 = scalar_select %p39_p1, %s3537_s27, %s41_s23  }
  0x8b   : > { %p3790_p0 = por %p49_p8, %p48_p3  ;;  %p5177_p2 = scmp.eq.s32.totalorder %s3649_s14, 0 }
  0x8c   : > { %5175 = sst [smem:[#allocation26_spill]] %s3788_s24  ;;  %p335_p5 = scmp.eq.s32.totalorder %s3649_s14, 1 }
  0x8d   : > { %p3796_p6 = por %p5177_p2, %p54_p13  ;;  %p341_p7 = scmp.eq.s32.totalorder %s2925_s7, 1 }
  0x8e   : > { %p3081_p9 = scmp.lt.s32.totalorder %s3541_s28, 2  ;;  %s434_s29 = sand.u32 1, %s3537_s27  }
  0x8f   : > { %s5178_s11 = scalar_select %p3796_p6, 1, 0 }
  0x90   : > { %p3803_p4 = por %p335_p5, %p48_p3  ;;  %p3807_p10 = por %p341_p7, %p54_p13 }
  0x91   : > { %s3811_s17 = sshll.u32 %s434_s29, 3  ;;  %s2933_s20 = sshll.u32 %s3541_s28, 7 }
  0x92   : > { %s5179_s19 = scalar_select %p3803_p4, 1, 0 }
  0x93   : > { %s5180_s21 = scalar_select %p3807_p10, 1, 0 }
  0x94   : > { %s3817_s13 = scalar_lea.hbm %s5130_s0, %s2933_s20  ;;  %s438_s30 = scalar_lea.vmem [#allocation8], %s3811_s17 }
  0x95   : > { %s445_s7 = sshll.u32 %s438_s30, 4  ;;  %p3824_p11 = pnand %p3081_p9, %p3790_p0  ;;  %s3820_s7 = int_to_ptr.vmem [resolvable:$true] %s445_s7 }
  0x96   : > { %s3831_s22 = scalar_lea.hbm %s5131_s1, %s2933_s20  ;;  %s452_s16 = sand.u32 1, %s3541_s28  }
  0x97   : > { %s435_s5 = scalar_lea.sflag [#allocation9], %s434_s29  ;;  %s3399_s8 = scalar_lea.hbm %s3817_s13, 128 }
  0x98   : > { %p3400_p12 = scmp.ne.s32.totalorder %s3817_s13, %s3399_s8  ;;  %p3401_p1 = pneg %p3824_p11 }
  0x99   : > { %s3404_s10 = scalar_lea.hbm %s5130_s0, 256  ;;  %p3405_p13 = scmp.lt.u32.totalorder %s3817_s13, %s5130_s0 }
  0x9a   : > { %p3402_p3 = pnand %p3401_p1, %p3400_p12  ;;  %p3406_p0 = scmp.lt.u32.totalorder %s3404_s10, %s3399_s8 }
  0x9b   : > { %p3408_p5 = scmp.lt.u32.totalorder %s3399_s8, %s3817_s13 }
  0x9c   : > { %p3403_p8 = pneg %p3402_p3  ;;  %p3407_p2 = por %p3406_p0, %p3405_p13 }
  0x9e   : > { %p3409_p7 = por %p3408_p5, %p3407_p2 }
  0xa0   : > { %p3410_p9 = pnand %p3409_p7, %p3403_p8 }
  0xa2   : > { %3413 = shalt.err (!%p3410_p9)
}
  0xa3   : > { %s3414_s29 = scalar_lea.vmem %s3820_s7, 128  ;;  %s3551_s20 = smov [#allocation8]  }
  0xa4   : > { %p3415_p12 = scmp.ne.s32.totalorder %s3820_s7, %s3414_s29  ;;  %s3419_s23 = sshll.u32 %s3551_s20, 4  ;;  %s3420_s23 = int_to_ptr.vmem [resolvable:$false] %s3419_s23 }
  0xa5   : > { %s3421_s24 = scalar_lea.vmem %s3420_s23, 256  ;;  %p3422_p4 = scmp.lt.s32.totalorder %s3820_s7, %s3420_s23 }
  0xa6   : > { %p3417_p3 = pnand %p3415_p12, %p3401_p1  ;;  %p3423_p13 = scmp.lt.s32.totalorder %s3421_s24, %s3414_s29 }
  0xa8   : > { %p3418_p10 = pneg %p3417_p3  ;;  %p3424_p0 = por %p3423_p13, %p3422_p4 }
  0xaa   : > { %p3425_p2 = pnand %p3424_p0, %p3418_p10 }
  0xac   : > { %3428 = shalt.err (!%p3425_p2)
}
  0xad   : > { %3069 = dma.hbm_to_vmem [thread:$0]  (!%p3824_p11), %s3817_s13, 128, %s3820_s7, %s435_s5  }
  0xae   : > { %s456_s8 = scalar_lea.vmem [#allocation11], %s3811_s17  ;;  %s453_s18 = scalar_lea.sflag [#allocation12], %s452_s16 }
  0xaf   : > { %s463_s10 = sshll.u32 %s456_s8, 4  ;;  %s3429_s30 = scalar_lea.hbm %s3831_s22, 128  ;;  %s464_s10 = int_to_ptr.vmem [resolvable:$true] %s463_s10 }
  0xb0   : > { %p3430_p4 = scmp.ne.s32.totalorder %s3831_s22, %s3429_s30  ;;  %s3434_s20 = scalar_lea.hbm %s5131_s1, 256 }
  0xb1   : > { %p3435_p5 = scmp.lt.u32.totalorder %s3831_s22, %s5131_s1  ;;  %p3436_p7 = scmp.lt.u32.totalorder %s3434_s20, %s3429_s30 }
  0xb2   : > { %p3432_p10 = pnand %p3430_p4, %p3401_p1  ;;  %p3438_p12 = scmp.lt.u32.totalorder %s3429_s30, %s3831_s22 }
  0xb3   : > { %p3437_p9 = por %p3436_p7, %p3435_p5 }
  0xb4   : > { %p3433_p8 = pneg %p3432_p10 }
  0xb5   : > { %p3439_p3 = por %p3438_p12, %p3437_p9 }
  0xb7   : > { %p3440_p13 = pnand %p3439_p3, %p3433_p8 }
  0xb9   : > { %3443 = shalt.err (!%p3440_p13)
}
  0xba   : > { %s3444_s5 = scalar_lea.vmem %s464_s10, 128  ;;  %s3552_s17 = smov [#allocation11]  }
  0xbb   : > { %p3445_p0 = scmp.ne.s32.totalorder %s464_s10, %s3444_s5  ;;  %s3449_s13 = sshll.u32 %s3552_s17, 4  ;;  %s3450_s13 = int_to_ptr.vmem [resolvable:$false] %s3449_s13 }
  0xbc   : > { %s3451_s7 = scalar_lea.vmem %s3450_s13, 256  ;;  %p3452_p10 = scmp.lt.s32.totalorder %s464_s10, %s3450_s13 }
  0xbd   : > { %p3447_p2 = pnand %p3445_p0, %p3401_p1  ;;  %p3453_p6 = scmp.lt.s32.totalorder %s3451_s7, %s3444_s5 }
  0xbf   : > { %p3448_p4 = pneg %p3447_p2  ;;  %p3454_p5 = por %p3453_p6, %p3452_p10 }
  0xc1   : > { %p3455_p7 = pnand %p3454_p5, %p3448_p4 }
  0xc3   : > { %3458 = shalt.err (!%p3455_p7)
}
  0xc4   : > { %3072 = dma.hbm_to_vmem [thread:$0]  (!%p3824_p11), %s3831_s22, 128, %s464_s10, %s453_s18  }
  0xc5   : > { %p5182_p8 = scmp.ne.s32.totalorder %s5168_s15, 0 }
  0xc7   : > { %472 = sbr.rel (%p5182_p8) target bundleno = 1673 (0x689), region = 72 }
  0xce   : > { %s3884_s16 = sand.u32 1, %s3533_s26   ;;  %p5183_p6 = scmp.ne.s32.totalorder %s5178_s11, 0 }
  0xcf   : > { %s3887_s8 = sshll.u32 %s3884_s16, 3  ;;  %s475_s30 = scalar_lea.sflag [#allocation9], %s3884_s16 }
  0xd0   : > { %s478_s4 = scalar_lea.vmem [#allocation8], %s3887_s8 }
  0xd1   : > { %3504 = dma.done.wait (%p5183_p6), %s475_s30, 128  }
  0xd2   : > { %3506 = vsyncadd (%p5183_p6), %s475_s30, 4294967168  ;;  %s483_s15 = sand.u32 1, %s3649_s14   ;;  %s487_s22 = scalar_lea.vmem [#allocation11], %s3887_s8 }
  0xd3   : > { %s484_s12 = scalar_lea.sflag [#allocation12], %s483_s15 }
  0xd4   : > { %3508 = dma.done.wait (%p5183_p6), %s484_s12, 128  }
  0xd5   : > { %3510 = vsyncadd (%p5183_p6), %s484_s12, 4294967168  ;;  %p5184_p11 = scmp.eq.s32.totalorder %s3649_s14, 0 }
  0xd7   : > { %3512 = dma.done.wait (%p5184_p11), [#allocation12], 256   ;;  %p5185_p1 = pmov %p5184_p11 }
  0xd9   : > { %3514 = vsyncadd (%p5185_p1), [#allocation12], 4294967040  ;;  %p5186_p9 = pmov %p5185_p1 }
  0xda   : > { %p5187_p12 = pmov %p5185_p1 }
  0xdb   : > { %3516 = dma.done.wait (%p5186_p9), [#allocation15], 768  }
  0xdc   : > { %3518 = vsyncadd (%p5187_p12), [#allocation15], 4294966528  ;;  %p5188_p3 = pmov %p5185_p1 }
  0xdd   : > { %p5189_p13 = pmov %p5185_p1 }
  0xde   : > { %3520 = dma.done.wait (%p5188_p3), [#allocation18], 1024  }
  0xdf   : > { %3522 = vsyncadd (%p5189_p13), [#allocation18], 4294966272  ;;  %vm553_vm0 = vcmask 261120   ;;  %v552_v0 = vld [vmem:[%s478_s4] sm:$0xff]  ;;  %v3132_v8 = vld [vmem:[#allocation14] sm:$0xff]   ;;  %v5150_v9 = vmov 0.0   ;;  %v887_v26 = vlaneseq }
  0xe0   : > { %v554_v1 = vsel %vm553_vm0, %v552_v0, 0.0  ;;  %v3131_v7 = vld [vmem:[#allocation13] sm:$0xff]   ;;  %2991 = vmatprep.subr.bf16.mxu0 %v5150_v9  ;;  %2999 = vmatprep.subr.bf16.mxu1 %v5150_v9  ;;  %v3133_v10 = vld [vmem:[#allocation13 + $0x8] sm:$0xff]   ;;  %v3134_v11 = vld [vmem:[#allocation14 + $0x8] sm:$0xff]   ;;  %vm3554_vm1 = vmmov 0   ;;  %vm707_vm2 = vcmask 523264  }
  0xe1   : > { %555 = vadd.xlane.f32.xlu0 %v554_v1  ;;  %2992 = vmatpush3.bf16.msra.mxu0 %v3131_v7  ;;  %v2944_v16 = vld [vmem:[%s5132_s2] ss:$0 sm:$0xff]  ;;  %709 = vst.msk [vmem:[#allocation5] sm:$0xff] %vm707_vm2, %v5150_v9  ;;  %v3135_v22 = vld [vmem:[#allocation16] sm:$0xff]   ;;  %v3136_v23 = vld [vmem:[#allocation16 + $0x8] sm:$0xff]   ;;  %v3942_v27 = vshrl.u32 %v887_v26, 7 }
  0xe2   : > { %3000 = vmatpush3.bf16.msra.mxu1 %v3132_v8  ;;  %2993 = vmatprep.subr.bf16.mxu0 %v5150_v9  ;;  %v2945_v18 = vld [vmem:[%s5133_s3] ss:$0 sm:$0xff]  ;;  %v3137_v24 = vld [vmem:[#allocation16 + $0x10] sm:$0xff]   ;;  %v2954_v55 = vld [vmem:[%s5136_s6 + $0x1] ss:$0 sm:$0xff]  ;;  %s5190_s12 = sld [smem:[#allocation50_spill]] }
  0xe3   : > { %3001 = vmatprep.subr.bf16.mxu1 %v5150_v9  ;;  %2995 = vmatprep.mubr.msk.bf16.mxu0 %vm3554_vm1, %v5150_v9  ;;  %v3138_v25 = vld [vmem:[#allocation16 + $0x18] sm:$0xff]   ;;  %v5157_v29 = vsub.s32 1, %v3942_v27  ;;  %v5158_v30 = vsub.s32 2, %v3942_v27  ;;  %v3953_v32 = vsub.s32 0, %v3942_v27  ;;  %v5156_v35 = vsub.s32 3, %v3942_v27  ;;  %s5191_s10 = sld [smem:[#allocation52_spill]] }
  0xe4   : > { %3003 = vmatprep.mubr.msk.bf16.mxu1 %vm3554_vm1, %v5150_v9  ;;  %v881_v28 = vld [vmem:[%s487_s22] sm:$0xff]  ;;  %v5155_v37 = vsub.s32 4, %v3942_v27  ;;  %v5154_v39 = vsub.s32 5, %v3942_v27  ;;  %v5153_v41 = vsub.s32 6, %v3942_v27  ;;  %v5152_v43 = vsub.s32 7, %v3942_v27  ;;  %s3555_s18 = smov 64  }
  0xe5   : > { %2994 = vmatpush3.bf16.msra.mxu0 %v3133_v10  ;;  %v3950_v31 = vrot.slane %v881_v28, %v5157_v29  ;;  %v3958_v33 = vrot.slane %v881_v28, %v5158_v30  ;;  %v3963_v34 = vrot.slane %v881_v28, %v3953_v32  ;;  %v3970_v36 = vrot.slane %v881_v28, %v5156_v35  ;;  %v2953_v54 = vld [vmem:[%s5136_s6] ss:$0 sm:$0xff]  ;;  %v2955_v56 = vld [vmem:[%s5136_s6 + $0x2] ss:$0 sm:$0xff]  ;;  %v2956_v63 = vld [vmem:[%s5136_s6 + $0x3] ss:$0 sm:$0xff] }
  0xe6   : > { %3002 = vmatpush3.bf16.msra.mxu1 %v3134_v11  ;;  %3007 = vmatprep.subr.bf16.mxu0 %v5150_v9  ;;  %v3979_v38 = vrot.slane %v881_v28, %v5155_v37  ;;  %v3988_v40 = vrot.slane %v881_v28, %v5154_v39  ;;  %v3997_v42 = vrot.slane %v881_v28, %v5153_v41  ;;  %s5220_s23 = sld [smem:[#allocation55_spill]]  ;;  %vm2677_vm5 = vcmask 1041409   ;;  %s550_s22 = scalar_lea.vmem [#allocation19], %s3887_s8 }
  0xe7   : > { %3019 = vmatprep.subr.bf16.mxu1 %v5150_v9  ;;  %2169 = vbcast.lane.b32.xlu1 %v3950_v31, 264  ;;  %v4008_v44 = vrot.slane %v881_v28, %v5152_v43  ;;  %vm2680_vm6 = vcmask 1042434   ;;  %vm2683_vm7 = vcmask 1043459   ;;  %vm2686_vm8 = vcmask 1044484   ;;  %s2793_s11 = sshll.u32 %s550_s22, 4  ;;  %s5244_s20 = sld [smem:[#allocation56_spill]]  ;;  %s5083_s11 = int_to_ptr.vmem [resolvable:$true] %s2793_s11 }
  0xe8   : > { %vm2689_vm9 = vcmask 1045509   ;;  %vm2692_vm10 = vcmask 1046534   ;;  %vm2695_vm11 = vcmask 1047559   ;;  %s2780_s5 = scalar_lea.sflag [#allocation10], %s3884_s16  ;;  %s3459_s17 = scalar_lea.vmem %s5083_s11, 128 }
  0xe9   : > { %p3460_p0 = scmp.ne.s32.totalorder %s5083_s11, %s3459_s17  ;;  %p5245_p2 = scmp.ne.s32.totalorder %s5179_s19, 0 }
  0xeb   : > { %2204 = vbcast.lane.b32.xlu1 %v3958_v33, 264  ;;  %p3461_p4 = pnand %p3460_p0, %p5245_p2 }
  0xed   : > { %p3462_p10 = pneg %p3461_p4 }
  0xef   : > { %2134 = vbcast.lane.b32.xlu1 %v3963_v34, 264 }
  0xf3   : > { %2235 = vbcast.lane.b32.xlu1 %v3970_v36, 256 }
  0xf7   : > { %2208 = vbcast.lane.b32.xlu1 %v3958_v33, 272 }
  0xfb   : > { %2274 = vbcast.lane.b32.xlu1 %v3979_v38, 264 }
  0xff   : > { %2177 = vbcast.lane.b32.xlu1 %v3950_v31, 280 }
 0x103   : > { %2305 = vbcast.lane.b32.xlu1 %v3988_v40, 256 }
 0x107   : > { %2212 = vbcast.lane.b32.xlu1 %v3958_v33, 280 }
 0x10b   : > { %2340 = vbcast.lane.b32.xlu1 %v3997_v42, 256 }
 0x10f   : > { %2142 = vbcast.lane.b32.xlu1 %v3963_v34, 280 }
 0x113   : > { %2247 = vbcast.lane.b32.xlu1 %v3970_v36, 280 }
 0x117   : > { %2375 = vbcast.lane.b32.xlu1 %v4008_v44, 256 }
 0x11b   : > { %2216 = vbcast.lane.b32.xlu1 %v3958_v33, 288 }
 0x11f   : > { %2348 = vbcast.lane.b32.xlu1 %v3997_v42, 272 }
 0x123   : > { %2185 = vbcast.lane.b32.xlu1 %v3950_v31, 296 }
 0x127   : > { %2317 = vbcast.lane.b32.xlu1 %v3988_v40, 280 }
 0x12b   : > { %2220 = vbcast.lane.b32.xlu1 %v3958_v33, 296 }
 0x12f   : > { %2352 = vbcast.lane.b32.xlu1 %v3997_v42, 280 }
 0x133   : > { %2189 = vbcast.lane.b32.xlu1 %v3950_v31, 304 }
 0x137   : > { %2321 = vbcast.lane.b32.xlu1 %v3988_v40, 288 }
 0x13b   : > { %2224 = vbcast.lane.b32.xlu1 %v3958_v33, 304 }
 0x13f   : > { %2356 = vbcast.lane.b32.xlu1 %v3997_v42, 288 }
 0x143   : > { %2193 = vbcast.lane.b32.xlu1 %v3950_v31, 312 }
 0x147   : > { %2325 = vbcast.lane.b32.xlu1 %v3988_v40, 296 }
 0x14b   : > { %2228 = vbcast.lane.b32.xlu1 %v3958_v33, 312 }
 0x16e   : > { %v556_v2 = vpop.xlane.xlu0 %555 }
 0x16f   : > { %v558_v3 = vmul.f32 0.03125, %v556_v2 }
 0x171   : > { %v559_v4 = vsub.f32 %v552_v0, %v558_v3 }
 0x173   : > { %v560_v5 = vmul.f32 %v559_v4, %v559_v4 }
 0x175   : > { %v561_v6 = vsel %vm553_vm0, %v560_v5, 0.0 }
 0x176   : > { %562 = vadd.xlane.f32.xlu0 %v561_v6  ;;  %v2957_v6 = vld [vmem:[%s5190_s12] ss:$0 sm:$0xff]  ;;  %s5243_s12 = sld [smem:[#allocation54_spill]] }
 0x18c   : > { %2165 = vbcast.lane.b32.xlu0 %v3950_v31, 256 }
 0x190   : > { %2200 = vbcast.lane.b32.xlu0 %v3958_v33, 256 }
 0x194   : > { %2130 = vbcast.lane.b32.xlu0 %v3963_v34, 256 }
 0x198   : > { %2173 = vbcast.lane.b32.xlu0 %v3950_v31, 272 }
 0x19c   : > { %2239 = vbcast.lane.b32.xlu0 %v3970_v36, 264 }
 0x1a0   : > { %2270 = vbcast.lane.b32.xlu0 %v3979_v38, 256 }
 0x1a4   : > { %2138 = vbcast.lane.b32.xlu0 %v3963_v34, 272 }
 0x1a8   : > { %2243 = vbcast.lane.b32.xlu0 %v3970_v36, 272 }
 0x1ac   : > { %2309 = vbcast.lane.b32.xlu0 %v3988_v40, 264 }
 0x1b0   : > { %2278 = vbcast.lane.b32.xlu0 %v3979_v38, 272 }
 0x1b4   : > { %2344 = vbcast.lane.b32.xlu0 %v3997_v42, 264 }
 0x1b8   : > { %2181 = vbcast.lane.b32.xlu0 %v3950_v31, 288 }
 0x1bc   : > { %2313 = vbcast.lane.b32.xlu0 %v3988_v40, 272 }
 0x1c0   : > { %2379 = vbcast.lane.b32.xlu0 %v4008_v44, 264 }
 0x1c4   : > { %2282 = vbcast.lane.b32.xlu0 %v3979_v38, 280 }
 0x1c8   : > { %2146 = vbcast.lane.b32.xlu0 %v3963_v34, 288 }
 0x1cc   : > { %2251 = vbcast.lane.b32.xlu0 %v3970_v36, 288 }
 0x1d0   : > { %2383 = vbcast.lane.b32.xlu0 %v4008_v44, 272 }
 0x1d4   : > { %2286 = vbcast.lane.b32.xlu0 %v3979_v38, 288 }
 0x1d8   : > { %2150 = vbcast.lane.b32.xlu0 %v3963_v34, 296 }
 0x1dc   : > { %2255 = vbcast.lane.b32.xlu0 %v3970_v36, 296 }
 0x1e0   : > { %2387 = vbcast.lane.b32.xlu0 %v4008_v44, 280 }
 0x1e4   : > { %2290 = vbcast.lane.b32.xlu0 %v3979_v38, 296 }
 0x1e8   : > { %2154 = vbcast.lane.b32.xlu0 %v3963_v34, 304 }
 0x1ec   : > { %2259 = vbcast.lane.b32.xlu0 %v3970_v36, 304 }
 0x1f0   : > { %2391 = vbcast.lane.b32.xlu0 %v4008_v44, 288 }
 0x203   : > { %v563_v12 = vpop.xlane.xlu0 %562 }
 0x204   : > { %v564_v13 = vmul.f32 0.03125, %v563_v12 }
 0x206   : > { %v565_v14 = vadd.f32 1e-05, %v564_v13 }
 0x208   : > { %3144 = vrsqrt.f32 %v565_v14 }
 0x212   : > { %v3145_v15 = vpop.eup %3144 }
 0x213   : > { %v567_v17 = vmul.f32 %v3145_v15, %v559_v4 }
 0x215   : > { %v575_v19 = vmul.f32 %v2944_v16, %v567_v17 }
 0x217   : > { %v583_v20 = vadd.f32 %v2945_v18, %v575_v19  ;;  %v4058_v18 = vpop.permute.xlu1 %2169 }
 0x219   : > { %v584_v21 = vpack.c.bf16 %v583_v20, %v583_v20 }
 0x21b   : > { %2996 = vmatmul.mubr.msk.bf16.vlgmr.msra.gmra.mrb[0].mxu0 %vm553_vm0, %v584_v21  ;;  %3004 = vmatmul.mubr.msk.bf16.vlgmr.msra.gmra.mrb[0].mxu1 %vm553_vm0, %v584_v21  ;;  %v4060_v19 = vpop.permute.xlu1 %2204 }
 0x21c   : > { %3015 = vmatprep.mubr.msk.bf16.mxu0 %vm3554_vm1, %v5150_v9  ;;  %3027 = vmatprep.mubr.msk.bf16.mxu1 %vm3554_vm1, %v5150_v9 }
 0x21d   : > { %3008 = vmatpush3.bf16.msra.mxu0 %v3135_v22 }
 0x21e   : > { %3009 = vmatprep.subr.bf16.mxu0 %v5150_v9 }
 0x21f   : > { %v4062_v20 = vpop.permute.xlu1 %2134 }
 0x221   : > { %3010 = vmatpush3.bf16.msra.mxu0 %v3136_v23 }
 0x222   : > { %3011 = vmatprep.subr.bf16.mxu0 %v5150_v9 }
 0x223   : > { %v4064_v21 = vpop.permute.xlu1 %2235 }
 0x225   : > { %3012 = vmatpush3.bf16.msra.mxu0 %v3137_v24 }
 0x226   : > { %3013 = vmatprep.subr.bf16.mxu0 %v5150_v9 }
 0x227   : > { %v4066_v22 = vpop.permute.xlu1 %2208 }
 0x229   : > { %3014 = vmatpush3.bf16.msra.mxu0 %v3138_v25  ;;  %v2964_v25 = vld [vmem:[%s5191_s10] ss:$0 sm:$0xff]  ;;  %s2972_s10 = sshll.u32 %s3649_s14, 7  ;;  %s3557_s14 = smov [#allocation19]  }
 0x22a   : > { %s5088_s24 = scalar_lea.hbm %s5244_s20, %s2972_s10  ;;  %s3463_s8 = sshll.u32 %s3557_s14, 4  ;;  %s3464_s8 = int_to_ptr.vmem [resolvable:$false] %s3463_s8 }
 0x22b   : > { %v4068_v23 = vpop.permute.xlu1 %2274  ;;  %s3465_s13 = scalar_lea.vmem %s3464_s8, 256  ;;  %p3466_p5 = scmp.lt.s32.totalorder %s5083_s11, %s3464_s8 }
 0x22c   : > { %p3467_p7 = scmp.lt.s32.totalorder %s3465_s13, %s3459_s17 }
 0x22e   : > { %p3468_p8 = por %p3467_p7, %p3466_p5 }
 0x22f   : > { %v4070_v24 = vpop.permute.xlu1 %2177 }
 0x230   : > { %p3469_p6 = pnand %p3468_p8, %p3462_p10 }
 0x233   : > { %v4075_v33 = vpop.permute.xlu1 %2305 }
 0x2ee   : > { %v638_v45 = vpop.f32.mrb[0].mxu0  ;;  %v694_v46 = vpop.f32.mrb[0].mxu1 }
 0x2ef   : > { %710 = vst.msk [vmem:[#allocation5 + $0x8] sm:$0xff] %vm707_vm2, %v638_v45  ;;  %v2952_v47 = vmul.f32 -1.442695, %v694_v46  ;;  %v2997_v48 = vpop.f32.mrb[1].mxu0  ;;  %v3005_v49 = vpop.f32.mrb[1].mxu1 }
 0x2f0   : > { %v641_v50 = vpop.f32.mrb[2].mxu0  ;;  %v697_v51 = vpop.f32.mrb[2].mxu1 }
 0x2f1   : > { %3146 = vpow2.f32 %v2952_v47  ;;  %v2998_v52 = vpop.f32.mrb[3].mxu0  ;;  %v3006_v53 = vpop.f32.mrb[3].mxu1 }
 0x2f2   : > { %v4077_v50 = vpop.permute.xlu1 %2212 }
 0x2f6   : > { %v711_v57 = vld [vmem:[#allocation5 + $0x5] sm:$0xff]  ;;  %v4079_v51 = vpop.permute.xlu1 %2340 }
 0x2f7   : > { %v719_v58 = vld [vmem:[#allocation5 + $0x6] sm:$0xff]  ;;  %v717_v60 = vmul.f32 %v2953_v54, %v711_v57  ;;  %5192 = vst [vmem:[#allocation27_spill] sm:$0xff] %v4079_v51 }
 0x2f8   : > { %v727_v59 = vld [vmem:[#allocation5 + $0x7] sm:$0xff]  ;;  %v725_v61 = vmul.f32 %v2954_v55, %v719_v58 }
 0x2f9   : > { %v735_v62 = vld [vmem:[#allocation5 + $0x8] sm:$0xff]  ;;  %v733_v1 = vmul.f32 %v2955_v56, %v727_v59 }
 0x2fa   : > { %v726_v0 = vadd.f32 %v725_v61, %v717_v60  ;;  %v741_v4 = vmul.f32 %v2956_v63, %v735_v62  ;;  %v4081_v53 = vpop.permute.xlu1 %2142 }
 0x2fb   : > { %v3147_v2 = vpop.eup %3146 }
 0x2fc   : > { %v734_v3 = vadd.f32 %v733_v1, %v726_v0  ;;  %v703_v5 = vadd.f32 1.0, %v3147_v2  ;;  %v3556_v0 = vmov 1966171168  }
 0x2fd   : > { %v885_v1 = vunpack.c.l.s4 %v3556_v0  ;;  %v4140_v0 = vld [vmem:[#allocation17 + $0x20] sm:$0xff] }
 0x2fe   : > { %v742_v7 = vadd.f32 %v741_v4, %v734_v3  ;;  %3148 = vrcp.f32 %v703_v5  ;;  %v4083_v56 = vpop.permute.xlu1 %2247 }
 0x300   : > { %v750_v8 = vadd.f32 %v2957_v6, %v742_v7  ;;  %v886_v6 = vunpack.c.0.s8 %v885_v1 }
 0x302   : > { %v2958_v10 = vmul.f32 -1.442695, %v750_v8  ;;  %v4085_v59 = vpop.permute.xlu1 %2375  ;;  %v4091_v7 = vsub.s32 %v886_v6, %v3942_v27 }
 0x303   : > { %5193 = vst [vmem:[#allocation28_spill] sm:$0xff] %v4085_v59 }
 0x304   : > { %3150 = vpow2.f32 %v2958_v10 }
 0x306   : > { %v4087_v4 = vpop.permute.xlu1 %2216 }
 0x308   : > { %v3149_v11 = vpop.eup %3148 }
 0x309   : > { %v706_v12 = vmul.f32 %v3149_v11, %v694_v46 }
 0x30b   : > { %708 = vst.msk [vmem:[#allocation4] sm:$0xff] %vm707_vm2, %v706_v12 }
 0x30e   : > { %v3151_v13 = vpop.eup %3150 }
 0x30f   : > { %v754_v14 = vadd.f32 1.0, %v3151_v13 }
 0x311   : > { %3152 = vrcp.f32 %v754_v14 }
 0x31b   : > { %v3153_v15 = vpop.eup %3152 }
 0x31c   : > { %v757_v16 = vmul.f32 %v3153_v15, %v750_v8  ;;  %v4093_v8 = vpop.permute.xlu1 %2348 }
 0x31d   : > { %5194 = vst [vmem:[#allocation29_spill] sm:$0xff] %v4093_v8 }
 0x31e   : > { %758 = vst.msk [vmem:[#allocation5 + $0x8] sm:$0xff] %vm707_vm2, %v757_v16  ;;  %v759_v17 = vpack.c.bf16 %v757_v16, %v757_v16 }
 0x320   : > { %3016 = vmatmul.mubr.msk.bf16.vlgmr.msra.gmra.mrb[4].mxu0 %vm707_vm2, %v759_v17  ;;  %v4100_v14 = vpop.permute.xlu1 %2185  ;;  %v4103_v17 = vld [vmem:[#allocation17] sm:$0xff] }
 0x3f3   : > { %v829_v26 = vpop.f32.mrb[4].mxu0 }
 0x3f4   : > { %v842_v28 = vadd.f32 %v2964_v25, %v829_v26  ;;  %863 = vrot.lane.b32.xlu1 %v829_v26, %s3555_s18  ;;  %v3017_v31 = vpop.f32.mrb[5].mxu0 }
 0x3f5   : > { %v832_v45 = vpop.f32.mrb[6].mxu0  ;;  %v4113_v31 = vld [vmem:[#allocation17 + $0x10] sm:$0xff] }
 0x3f6   : > { %v846_v46 = vand.u32 2147483647, %v842_v28  ;;  %v3018_v47 = vpop.f32.mrb[7].mxu0  ;;  %v843_v63 = vmax.f32 %v842_v28, 0.0  ;;  %vm844_vm4 = vcmp.ne.f32.partialorder %v842_v28, %v842_v28  ;;  %v4115_v45 = vld [vmem:[#allocation17 + $0x28] sm:$0xff] }
 0x3f7   : > { %v4119_v47 = vld [vmem:[#allocation17 + $0x18] sm:$0xff] }
 0x3f8   : > { %v847_v48 = vsub.f32 0.0, %v846_v46 }
 0x3fa   : > { %v848_v49 = vmul.f32 1.442695, %v847_v48 }
 0x3fc   : > { %3154 = vpow2.f32 %v848_v49 }
 0x406   : > { %v3155_v52 = vpop.eup %3154 }
 0x407   : > { %v850_v54 = vadd.f32 1.0, %v3155_v52  ;;  %v853_v55 = vmul.f32 -0.5, %v3155_v52  ;;  %v856_v58 = vand.u32 2147483647, %v3155_v52 }
 0x409   : > { %3156 = vlog2.f32 %v850_v54  ;;  %v854_v57 = vadd.f32 1.0, %v853_v55  ;;  %vm857_vm3 = vcmp.lt.f32.partialorder %v856_v58, 0.0004427343  ;;  %v4126_v54 = vpop.permute.xlu1 %2317 }
 0x40a   : > { %5195 = vst [vmem:[#allocation30_spill] sm:$0xff] %v4126_v54 }
 0x40b   : > { %v855_v62 = vmul.f32 %v3155_v52, %v854_v57 }
 0x413   : > { %v3157_v60 = vpop.eup %3156 }
 0x414   : > { %v852_v61 = vmul.f32 0.6931472, %v3157_v60 }
 0x416   : > { %v858_v2 = vsel %vm857_vm3, %v855_v62, %v852_v61 }
 0x417   : > { %v859_v3 = vadd.f32 %v858_v2, %v843_v63  ;;  %v4138_v63 = vld [vmem:[#allocation17 + $0x30] sm:$0xff] }
 0x419   : > { %v860_v5 = vsel %vm844_vm4, %v842_v28, %v859_v3  ;;  %v4111_v28 = vld [vmem:[#allocation17 + $0x8] sm:$0xff] }
 0x41a   : > { %861 = vst.msk [vmem:[#allocation2] sm:$0xff] %vm707_vm2, %v860_v5 }
 0x421   : > { %v4095_v10 = vld [vmem:[#allocation2] sm:$0xff] }
 0x422   : > { %v890_v11 = vrot.slane %v4095_v10, %v4091_v7  ;;  %v883_v48 = vcombine.high %v4095_v10, %v4095_v10 }
 0x424   : > { %v898_v12 = vcombine.high %v890_v11, %v890_v11  ;;  %v906_v13 = vrot.slane %v890_v11, %v4091_v7  ;;  %v897_v5 = vrot.slane %v883_v48, %v4091_v7 }
 0x426   : > { %v920_v15 = vrot.slane %v898_v12, %v4091_v7  ;;  %v928_v16 = vcombine.high %v906_v13, %v906_v13  ;;  %v4106_v25 = vrot.slane %v906_v13, %v3953_v32 }
 0x428   : > { %v4109_v26 = vrot.slane %v920_v15, %v3953_v32  ;;  %v972_v46 = vmul.f32 %v4106_v25, %v4103_v17  ;;  %v930_v49 = vcombine.high %v920_v15, %v920_v15  ;;  %v4124_v52 = vrot.slane %v928_v16, %v3953_v32 }
 0x429   : > { %v973_v57 = vmul.f32 %v4106_v25, %v4111_v28  ;;  %v974_v58 = vmul.f32 %v4106_v25, %v4113_v31  ;;  %v977_v60 = vmul.f32 %v4106_v25, %v4115_v45  ;;  %v975_v61 = vmul.f32 %v4106_v25, %v4119_v47 }
 0x42a   : > { %v1036_v55 = vmul.f32 1.442695, %v972_v46  ;;  %v980_v62 = vmul.f32 %v4109_v26, %v4103_v17  ;;  %v4144_v6 = vrot.slane %v930_v49, %v3953_v32  ;;  %v988_v12 = vmul.f32 %v4124_v52, %v4103_v17  ;;  %v4152_v46 = vpop.permute.xlu1 %2220 }
 0x42b   : > { %v1038_v1 = vmul.f32 1.442695, %v973_v57  ;;  %v1040_v2 = vmul.f32 1.442695, %v974_v58  ;;  %v1046_v3 = vmul.f32 1.442695, %v977_v60  ;;  %v978_v15 = vmul.f32 %v4106_v25, %v4138_v63 }
 0x42c   : > { %3158 = vpow2.f32 %v1036_v55  ;;  %v1042_v11 = vmul.f32 1.442695, %v975_v61  ;;  %v1052_v13 = vmul.f32 1.442695, %v980_v62  ;;  %v981_v16 = vmul.f32 %v4109_v26, %v4111_v28 }
 0x42d   : > { %3160 = vpow2.f32 %v1038_v1  ;;  %v1068_v55 = vmul.f32 1.442695, %v988_v12  ;;  %v976_v48 = vmul.f32 %v4106_v25, %v4140_v0  ;;  %v985_v49 = vmul.f32 %v4109_v26, %v4115_v45 }
 0x42e   : > { %3162 = vpow2.f32 %v1040_v2  ;;  %v1048_v57 = vmul.f32 1.442695, %v978_v15  ;;  %v4159_v58 = vrot.slane %v897_v5, %v4091_v7  ;;  %v1054_v60 = vmul.f32 1.442695, %v981_v16  ;;  %v4171_v9 = vpop.permute.xlu1 %2352 }
 0x42f   : > { %3164 = vpow2.f32 %v1046_v3  ;;  %v982_v61 = vmul.f32 %v4109_v26, %v4113_v31  ;;  %v1044_v62 = vmul.f32 1.442695, %v976_v48  ;;  %v990_v1 = vmul.f32 %v4124_v52, %v4113_v31  ;;  %5196 = vst [vmem:[#allocation31_spill] sm:$0xff] %v4171_v9 }
 0x430   : > { %3166 = vpow2.f32 %v1042_v11  ;;  %v996_v2 = vmul.f32 %v4144_v6, %v4103_v17  ;;  %v1062_v12 = vmul.f32 1.442695, %v985_v49  ;;  %v983_v3 = vmul.f32 %v4109_v26, %v4119_v47 }
 0x431   : > { %3168 = vpow2.f32 %v1052_v13  ;;  %v1056_v15 = vmul.f32 1.442695, %v982_v61  ;;  %v986_v11 = vmul.f32 %v4109_v26, %v4138_v63  ;;  %v899_v16 = vcombine.high %v897_v5, %v897_v5  ;;  %v4181_v61 = vld [vmem:[#allocation17 + $0x38] sm:$0xff] }
 0x432   : > { %3170 = vpow2.f32 %v1068_v55  ;;  %v1072_v13 = vmul.f32 1.442695, %v990_v1  ;;  %v989_v48 = vmul.f32 %v4124_v52, %v4111_v28  ;;  %v4177_v55 = vrot.slane %v4159_v58, %v3953_v32  ;;  %v4197_v35 = vpop.permute.xlu1 %2189 }
 0x433   : > { %3172 = vpow2.f32 %v1048_v57  ;;  %v1084_v49 = vmul.f32 1.442695, %v996_v2  ;;  %v998_v57 = vmul.f32 %v4144_v6, %v4113_v31  ;;  %v1058_v5 = vmul.f32 1.442695, %v983_v3 }
 0x434   : > { %3174 = vpow2.f32 %v1054_v60  ;;  %v984_v60 = vmul.f32 %v4109_v26, %v4140_v0  ;;  %v1064_v41 = vmul.f32 1.442695, %v986_v11  ;;  %v993_v39 = vmul.f32 %v4124_v52, %v4115_v45 }
 0x435   : > { %3176 = vpow2.f32 %v1044_v62  ;;  %v1070_v2 = vmul.f32 1.442695, %v989_v48  ;;  %v979_v37 = vmul.f32 %v4106_v25, %v4181_v61  ;;  %v1088_v3 = vmul.f32 1.442695, %v998_v57 }
 0x436   : > { %v3159_v43 = vpop.eup %3158  ;;  %3178 = vpow2.f32 %v1062_v12  ;;  %v4192_v12 = vrot.slane %v899_v16, %v4091_v7  ;;  %v991_v25 = vmul.f32 %v4124_v52, %v4119_v47  ;;  %v1078_v16 = vmul.f32 1.442695, %v993_v39 }
 0x437   : > { %1164 = vst.msk [vmem:[#allocation6] sm:$0xff] %vm707_vm2, %v3159_v43  ;;  %v3161_v1 = vpop.eup %3160  ;;  %3180 = vpow2.f32 %v1056_v15  ;;  %v1004_v15 = vmul.f32 %v4177_v55, %v4103_v17  ;;  %v929_v29 = vcombine.high %v4159_v58, %v4159_v58 }
 0x438   : > { %v3163_v62 = vpop.eup %3162  ;;  %1165 = vst.msk [vmem:[#allocation6 + $0x8] sm:$0xff] %vm707_vm2, %v3161_v1  ;;  %3182 = vpow2.f32 %v1072_v13  ;;  %v1060_v13 = vmul.f32 1.442695, %v984_v60  ;;  %v1050_v1 = vmul.f32 1.442695, %v979_v37 }
 0x439   : > { %v3165_v43 = vpop.eup %3164  ;;  %1166 = vst.msk [vmem:[#allocation6 + $0x10] sm:$0xff] %vm707_vm2, %v3163_v62  ;;  %3184 = vpow2.f32 %v1084_v49  ;;  %v994_v49 = vmul.f32 %v4124_v52, %v4138_v63  ;;  %v4210_v62 = vrot.slane %v4192_v12, %v3953_v32  ;;  %v1100_v39 = vmul.f32 1.442695, %v1004_v15 }
 0x43a   : > { %v3167_v11 = vpop.eup %3166  ;;  %1169 = vst.msk [vmem:[#allocation6 + $0x28] sm:$0xff] %vm707_vm2, %v3165_v43  ;;  %3186 = vpow2.f32 %v1058_v5  ;;  %v997_v5 = vmul.f32 %v4144_v6, %v4111_v28  ;;  %v1074_v37 = vmul.f32 1.442695, %v991_v25 }
 0x43b   : > { %v3169_v48 = vpop.eup %3168  ;;  %1167 = vst.msk [vmem:[#allocation6 + $0x18] sm:$0xff] %vm707_vm2, %v3167_v11  ;;  %3188 = vpow2.f32 %v1064_v41  ;;  %v1006_v41 = vmul.f32 %v4177_v55, %v4113_v31 }
 0x43c   : > { %v3171_v57 = vpop.eup %3170  ;;  %1172 = vst.msk [vmem:[#allocation6 + $0x40] sm:$0xff] %vm707_vm2, %v3169_v48  ;;  %3190 = vpow2.f32 %v1070_v2  ;;  %v992_v2 = vmul.f32 %v4124_v52, %v4140_v0  ;;  %v1080_v48 = vmul.f32 1.442695, %v994_v49  ;;  %v1012_v49 = vmul.f32 %v4210_v62, %v4103_v17 }
 0x43d   : > { %v3173_v60 = vpop.eup %3172  ;;  %1180 = vst.msk [vmem:[#allocation6 + $0x80] sm:$0xff] %vm707_vm2, %v3171_v57  ;;  %3192 = vpow2.f32 %v1088_v3  ;;  %v1001_v3 = vmul.f32 %v4144_v6, %v4115_v45  ;;  %v4221_v57 = vpop.permute.xlu1 %2321 }
 0x43e   : > { %v3175_v43 = vpop.eup %3174  ;;  %1170 = vst.msk [vmem:[#allocation6 + $0x30] sm:$0xff] %vm707_vm2, %v3173_v60  ;;  %3194 = vpow2.f32 %v1060_v13  ;;  %5197 = vst [vmem:[#allocation32_spill] sm:$0xff] %v4221_v57  ;;  %v1086_v60 = vmul.f32 1.442695, %v997_v5  ;;  %v987_v13 = vmul.f32 %v4109_v26, %v4181_v61  ;;  %v999_v5 = vmul.f32 %v4144_v6, %v4119_v47  ;;  %v1727_v57 = vld [vmem:[#allocation6] sm:$0xff] }
 0x43f   : > { %v3177_v11 = vpop.eup %3176  ;;  %1173 = vst.msk [vmem:[#allocation6 + $0x48] sm:$0xff] %vm707_vm2, %v3175_v43  ;;  %3196 = vpow2.f32 %v1078_v16  ;;  %v1104_v16 = vmul.f32 1.442695, %v1006_v41  ;;  %v1094_v58 = vmul.f32 1.442695, %v1001_v3  ;;  %v1014_v3 = vmul.f32 %v4210_v62, %v4113_v31  ;;  %v1728_v54 = vld [vmem:[#allocation6 + $0x8] sm:$0xff] }
 0x440   : > { %v3179_v15 = vpop.eup %3178  ;;  %1168 = vst.msk [vmem:[#allocation6 + $0x20] sm:$0xff] %vm707_vm2, %v3177_v11  ;;  %3198 = vpow2.f32 %v1050_v1  ;;  %v1076_v1 = vmul.f32 1.442695, %v992_v2  ;;  %v1066_v11 = vmul.f32 1.442695, %v987_v13 }
 0x441   : > { %v3181_v25 = vpop.eup %3180  ;;  %1177 = vst.msk [vmem:[#allocation6 + $0x68] sm:$0xff] %vm707_vm2, %v3179_v15  ;;  %3200 = vpow2.f32 %v1100_v39  ;;  %v1002_v39 = vmul.f32 %v4144_v6, %v4138_v63  ;;  %v4241_v15 = vrot.slane %v929_v29, %v3953_v32  ;;  %v1000_v29 = vmul.f32 %v4144_v6, %v4140_v0 }
 0x442   : > { %v3183_v43 = vpop.eup %3182  ;;  %1174 = vst.msk [vmem:[#allocation6 + $0x50] sm:$0xff] %vm707_vm2, %v3181_v25  ;;  %3202 = vpow2.f32 %v1074_v37  ;;  %v1005_v37 = vmul.f32 %v4177_v55, %v4111_v28  ;;  %v4243_v25 = vpop.permute.xlu0 %2165 }
 0x443   : > { %v3185_v26 = vpop.eup %3184  ;;  %1182 = vst.msk [vmem:[#allocation6 + $0x90] sm:$0xff] %vm707_vm2, %v3183_v43  ;;  %3204 = vpow2.f32 %v1080_v48  ;;  %v1116_v48 = vmul.f32 1.442695, %v1012_v49 }
 0x444   : > { %v3187_v41 = vpop.eup %3186  ;;  %1188 = vst.msk [vmem:[#allocation6 + $0xc0] sm:$0xff] %vm707_vm2, %v3185_v26  ;;  %3206 = vpow2.f32 %v1086_v60  ;;  %v4248_v26 = vpop.permute.xlu1 %2224  ;;  %v1090_v60 = vmul.f32 1.442695, %v999_v5  ;;  %v1102_v30 = vmul.f32 1.442695, %v1005_v37  ;;  %v1007_v37 = vmul.f32 %v4177_v55, %v4119_v47 }
 0x445   : > { %v3189_v2 = vpop.eup %3188  ;;  %1175 = vst.msk [vmem:[#allocation6 + $0x58] sm:$0xff] %vm707_vm2, %v3187_v41  ;;  %3208 = vpow2.f32 %v1104_v16  ;;  %v1096_v41 = vmul.f32 1.442695, %v1002_v39  ;;  %v1009_v16 = vmul.f32 %v4177_v55, %v4115_v45  ;;  %v1020_v39 = vmul.f32 %v4241_v15, %v4103_v17 }
 0x446   : > { %v3191_v43 = vpop.eup %3190  ;;  %1178 = vst.msk [vmem:[#allocation6 + $0x70] sm:$0xff] %vm707_vm2, %v3189_v2  ;;  %3210 = vpow2.f32 %v1076_v1  ;;  %v995_v1 = vmul.f32 %v4124_v52, %v4181_v61  ;;  %v931_v2 = vcombine.high %v4192_v12, %v4192_v12 }
 0x447   : > { %v3193_v13 = vpop.eup %3192  ;;  %1181 = vst.msk [vmem:[#allocation6 + $0x88] sm:$0xff] %vm707_vm2, %v3191_v43  ;;  %3212 = vpow2.f32 %v1094_v58  ;;  %v1120_v58 = vmul.f32 1.442695, %v1014_v3  ;;  %v1110_v12 = vmul.f32 1.442695, %v1009_v16  ;;  %v1022_v16 = vmul.f32 %v4241_v15, %v4113_v31 }
 0x448   : > { %v3195_v49 = vpop.eup %3194  ;;  %1190 = vst.msk [vmem:[#allocation6 + $0xd0] sm:$0xff] %vm707_vm2, %v3193_v13  ;;  %3214 = vpow2.f32 %v1066_v11  ;;  %v1092_v11 = vmul.f32 1.442695, %v1000_v29  ;;  %v4267_v13 = vpop.permute.xlu0 %2200  ;;  %v1013_v29 = vmul.f32 %v4210_v62, %v4111_v28  ;;  %v4278_v59 = vrot.slane %v931_v2, %v3953_v32 }
 0x449   : > { %v3197_v5 = vpop.eup %3196  ;;  %1176 = vst.msk [vmem:[#allocation6 + $0x60] sm:$0xff] %vm707_vm2, %v3195_v49  ;;  %3216 = vpow2.f32 %v1116_v48  ;;  %v1010_v48 = vmul.f32 %v4177_v55, %v4138_v63  ;;  %v4272_v49 = vpop.permute.xlu1 %2356 }
 0x44a   : > { %v3199_v43 = vpop.eup %3198  ;;  %1185 = vst.msk [vmem:[#allocation6 + $0xa8] sm:$0xff] %vm707_vm2, %v3197_v5  ;;  %3218 = vpow2.f32 %v1090_v60  ;;  %5198 = vst [vmem:[#allocation33_spill] sm:$0xff] %v4272_v49  ;;  %v1082_v60 = vmul.f32 1.442695, %v995_v1  ;;  %v1008_v1 = vmul.f32 %v4177_v55, %v4140_v0 }
 0x44b   : > { %v3201_v52 = vpop.eup %3200  ;;  %1171 = vst.msk [vmem:[#allocation6 + $0x38] sm:$0xff] %vm707_vm2, %v3199_v43  ;;  %3220 = vpow2.f32 %v1096_v41  ;;  %v1132_v41 = vmul.f32 1.442695, %v1020_v39  ;;  %v1112_v2 = vmul.f32 1.442695, %v1010_v48 }
 0x44c   : > { %v3203_v3 = vpop.eup %3202  ;;  %1196 = vst.msk [vmem:[#allocation6 + $0x100] sm:$0xff] %vm707_vm2, %v3201_v52  ;;  %3222 = vpow2.f32 %v1102_v30  ;;  %v1106_v30 = vmul.f32 1.442695, %v1007_v37 }
 0x44d   : > { %v3205_v5 = vpop.eup %3204  ;;  %1183 = vst.msk [vmem:[#allocation6 + $0x98] sm:$0xff] %vm707_vm2, %v3203_v3  ;;  %3224 = vpow2.f32 %v1120_v58  ;;  %v1017_v58 = vmul.f32 %v4210_v62, %v4115_v45  ;;  %v1118_v3 = vmul.f32 1.442695, %v1013_v29  ;;  %v4297_v49 = vpop.permute.xlu1 %2193 }
 0x44e   : > { %v3207_v43 = vpop.eup %3206  ;;  %1186 = vst.msk [vmem:[#allocation6 + $0xb0] sm:$0xff] %vm707_vm2, %v3205_v5  ;;  %3226 = vpow2.f32 %v1092_v11  ;;  %v1003_v11 = vmul.f32 %v4144_v6, %v4181_v61  ;;  %v4292_v5 = vpop.permute.xlu0 %2130  ;;  %v1015_v6 = vmul.f32 %v4210_v62, %v4119_v47 }
 0x44f   : > { %v3209_v52 = vpop.eup %3208  ;;  %1189 = vst.msk [vmem:[#allocation6 + $0xc8] sm:$0xff] %vm707_vm2, %v3207_v43  ;;  %3228 = vpow2.f32 %v1110_v12  ;;  %v1136_v43 = vmul.f32 1.442695, %v1022_v16  ;;  %v1028_v12 = vmul.f32 %v4278_v59, %v4103_v17 }
 0x450   : > { %v3211_v39 = vpop.eup %3210  ;;  %1198 = vst.msk [vmem:[#allocation6 + $0x110] sm:$0xff] %vm707_vm2, %v3209_v52  ;;  %3230 = vpow2.f32 %v1082_v60  ;;  %v1108_v60 = vmul.f32 1.442695, %v1008_v1  ;;  %v1126_v52 = vmul.f32 1.442695, %v1017_v58 }
 0x451   : > { %v3213_v37 = vpop.eup %3212  ;;  %1184 = vst.msk [vmem:[#allocation6 + $0xa0] sm:$0xff] %vm707_vm2, %v3211_v39  ;;  %3232 = vpow2.f32 %v1132_v41  ;;  %v1018_v41 = vmul.f32 %v4210_v62, %v4138_v63  ;;  %v1098_v17 = vmul.f32 1.442695, %v1003_v11  ;;  %v1148_v39 = vmul.f32 1.442695, %v1028_v12 }
 0x452   : > { %v3215_v48 = vpop.eup %3214  ;;  %1193 = vst.msk [vmem:[#allocation6 + $0xe8] sm:$0xff] %vm707_vm2, %v3213_v37  ;;  %3234 = vpow2.f32 %v1106_v30  ;;  %v1021_v30 = vmul.f32 %v4241_v15, %v4111_v28  ;;  %v1122_v37 = vmul.f32 1.442695, %v1015_v6  ;;  %v1011_v6 = vmul.f32 %v4177_v55, %v4181_v61 }
 0x453   : > { %v3217_v29 = vpop.eup %3216  ;;  %1179 = vst.msk [vmem:[#allocation6 + $0x78] sm:$0xff] %vm707_vm2, %v3215_v48  ;;  %3236 = vpow2.f32 %v1112_v2  ;;  %v1030_v2 = vmul.f32 %v4278_v59, %v4113_v31  ;;  %v4314_v48 = vpop.permute.xlu0 %2173 }
 0x454   : > { %v3219_v16 = vpop.eup %3218  ;;  %1204 = vst.msk [vmem:[#allocation6 + $0x140] sm:$0xff] %vm707_vm2, %v3217_v29  ;;  %3238 = vpow2.f32 %v1118_v3  ;;  %v1016_v3 = vmul.f32 %v4210_v62, %v4140_v0  ;;  %v1128_v29 = vmul.f32 1.442695, %v1018_v41  ;;  %v4319_v31 = vpop.permute.xlu1 %2325 }
 0x455   : > { %v3221_v1 = vpop.eup %3220  ;;  %1191 = vst.msk [vmem:[#allocation6 + $0xd8] sm:$0xff] %vm707_vm2, %v3219_v16  ;;  %3240 = vpow2.f32 %v1136_v43  ;;  %v1025_v43 = vmul.f32 %v4241_v15, %v4115_v45  ;;  %5199 = vst [vmem:[#allocation34_spill] sm:$0xff] %v4319_v31 }
 0x456   : > { %v3223_v58 = vpop.eup %3222  ;;  %1194 = vst.msk [vmem:[#allocation6 + $0xf0] sm:$0xff] %vm707_vm2, %v3221_v1  ;;  %3242 = vpow2.f32 %v1108_v60  ;;  %v1134_v60 = vmul.f32 1.442695, %v1021_v30  ;;  %v1152_v1 = vmul.f32 1.442695, %v1030_v2 }
 0x457   : > { %v3225_v11 = vpop.eup %3224  ;;  %1197 = vst.msk [vmem:[#allocation6 + $0x108] sm:$0xff] %vm707_vm2, %v3223_v58  ;;  %3244 = vpow2.f32 %v1126_v52  ;;  %v1026_v52 = vmul.f32 %v4241_v15, %v4138_v63  ;;  %v1124_v58 = vmul.f32 1.442695, %v1016_v3  ;;  %v1142_v55 = vmul.f32 1.442695, %v1025_v43 }
 0x458   : > { %v3227_v12 = vpop.eup %3226  ;;  %1206 = vst.msk [vmem:[#allocation6 + $0x150] sm:$0xff] %vm707_vm2, %v3225_v11  ;;  %3246 = vpow2.f32 %v1098_v17  ;;  %v1023_v17 = vmul.f32 %v4241_v15, %v4119_v47  ;;  %v1114_v11 = vmul.f32 1.442695, %v1011_v6 }
 0x459   : > { %v3229_v16 = vpop.eup %3228  ;;  %1192 = vst.msk [vmem:[#allocation6 + $0xe0] sm:$0xff] %vm707_vm2, %v3227_v12  ;;  %3248 = vpow2.f32 %v1148_v39  ;;  %v1029_v39 = vmul.f32 %v4278_v59, %v4111_v28  ;;  %v4336_v12 = vpop.permute.xlu0 %2239 }
 0x45a   : > { %v3231_v41 = vpop.eup %3230  ;;  %1201 = vst.msk [vmem:[#allocation6 + $0x128] sm:$0xff] %vm707_vm2, %v3229_v16  ;;  %3250 = vpow2.f32 %v1122_v37  ;;  %v1034_v37 = vmul.f32 %v4278_v59, %v4138_v63  ;;  %v1144_v16 = vmul.f32 1.442695, %v1026_v52  ;;  %v4341_v28 = vpop.permute.xlu1 %2228  ;;  %v1019_v63 = vmul.f32 %v4210_v62, %v4181_v61 }
 0x45b   : > { %v3233_v30 = vpop.eup %3232  ;;  %1187 = vst.msk [vmem:[#allocation6 + $0xb8] sm:$0xff] %vm707_vm2, %v3231_v41  ;;  %3252 = vpow2.f32 %v1128_v29  ;;  %v1024_v29 = vmul.f32 %v4241_v15, %v4140_v0  ;;  %5200 = vst [vmem:[#allocation35_spill] sm:$0xff] %v4341_v28  ;;  %v1150_v41 = vmul.f32 1.442695, %v1029_v39 }
 0x45c   : > { %v3235_v2 = vpop.eup %3234  ;;  %1212 = vst.msk [vmem:[#allocation6 + $0x180] sm:$0xff] %vm707_vm2, %v3233_v30  ;;  %3254 = vpow2.f32 %v1134_v60  ;;  %v1138_v60 = vmul.f32 1.442695, %v1023_v17  ;;  %v1160_v30 = vmul.f32 1.442695, %v1034_v37 }
 0x45d   : > { %v3237_v3 = vpop.eup %3236  ;;  %1199 = vst.msk [vmem:[#allocation6 + $0x118] sm:$0xff] %vm707_vm2, %v3235_v2  ;;  %3256 = vpow2.f32 %v1152_v1  ;;  %v1027_v1 = vmul.f32 %v4241_v15, %v4181_v61  ;;  %v1140_v62 = vmul.f32 1.442695, %v1024_v29  ;;  %v1130_v15 = vmul.f32 1.442695, %v1019_v63  ;;  %v4358_v37 = vpop.permute.xlu0 %2270 }
 0x45e   : > { %v3239_v43 = vpop.eup %3238  ;;  %1202 = vst.msk [vmem:[#allocation6 + $0x130] sm:$0xff] %vm707_vm2, %v3237_v3  ;;  %3258 = vpow2.f32 %v1124_v58  ;;  %v1031_v58 = vmul.f32 %v4278_v59, %v4119_v47  ;;  %v1033_v2 = vmul.f32 %v4278_v59, %v4115_v45  ;;  %v1035_v3 = vmul.f32 %v4278_v59, %v4181_v61 }
 0x45f   : > { %v3241_v6 = vpop.eup %3240  ;;  %1205 = vst.msk [vmem:[#allocation6 + $0x148] sm:$0xff] %vm707_vm2, %v3239_v43  ;;  %3260 = vpow2.f32 %v1142_v55  ;;  %v1032_v55 = vmul.f32 %v4278_v59, %v4140_v0  ;;  %v1146_v47 = vmul.f32 1.442695, %v1027_v1 }
 0x460   : > { %v3243_v52 = vpop.eup %3242  ;;  %1214 = vst.msk [vmem:[#allocation6 + $0x190] sm:$0xff] %vm707_vm2, %v3241_v6  ;;  %3262 = vpow2.f32 %v1114_v11  ;;  %v1154_v29 = vmul.f32 1.442695, %v1031_v58  ;;  %v1158_v63 = vmul.f32 1.442695, %v1033_v2 }
 0x461   : > { %v3245_v17 = vpop.eup %3244  ;;  %1200 = vst.msk [vmem:[#allocation6 + $0x120] sm:$0xff] %vm707_vm2, %v3243_v52  ;;  %3264 = vpow2.f32 %v1144_v16  ;;  %v1156_v45 = vmul.f32 1.442695, %v1032_v55  ;;  %v1162_v59 = vmul.f32 1.442695, %v1035_v3  ;;  %v4369_v1 = vpop.permute.xlu0 %2138 }
 0x462   : > { %v3247_v39 = vpop.eup %3246  ;;  %1209 = vst.msk [vmem:[#allocation6 + $0x168] sm:$0xff] %vm707_vm2, %v3245_v17  ;;  %3266 = vpow2.f32 %v1138_v60 }
 0x463   : > { %v3249_v11 = vpop.eup %3248  ;;  %1195 = vst.msk [vmem:[#allocation6 + $0xf8] sm:$0xff] %vm707_vm2, %v3247_v39  ;;  %3268 = vpow2.f32 %v1150_v41 }
 0x464   : > { %v3251_v16 = vpop.eup %3250  ;;  %1220 = vst.msk [vmem:[#allocation6 + $0x1c0] sm:$0xff] %vm707_vm2, %v3249_v11  ;;  %3270 = vpow2.f32 %v1160_v30 }
 0x465   : > { %v3253_v43 = vpop.eup %3252  ;;  %1207 = vst.msk [vmem:[#allocation6 + $0x158] sm:$0xff] %vm707_vm2, %v3251_v16  ;;  %3272 = vpow2.f32 %v1140_v62  ;;  %v4381_v2 = vpop.permute.xlu0 %2243 }
 0x466   : > { %v864_v0 = vpop.permute.xlu1 %863  ;;  %v3255_v60 = vpop.eup %3254  ;;  %1210 = vst.msk [vmem:[#allocation6 + $0x170] sm:$0xff] %vm707_vm2, %v3253_v43  ;;  %3274 = vpow2.f32 %v1130_v15  ;;  %v5201_v43 = vsub.s32 2, %v3942_v27 }
 0x467   : > { %866 = vst.msk [vmem:[#allocation3] sm:$0xff] %vm707_vm2, %v864_v0  ;;  %v3257_v6 = vpop.eup %3256  ;;  %1213 = vst.msk [vmem:[#allocation6 + $0x188] sm:$0xff] %vm707_vm2, %v3255_v60  ;;  %3276 = vpow2.f32 %v1146_v47 }
 0x468   : > { %v3259_v61 = vpop.eup %3258  ;;  %1222 = vst.msk [vmem:[#allocation6 + $0x1d0] sm:$0xff] %vm707_vm2, %v3257_v6  ;;  %3278 = vpow2.f32 %v1154_v29 }
 0x469   : > { %v3261_v41 = vpop.eup %3260  ;;  %1208 = vst.msk [vmem:[#allocation6 + $0x160] sm:$0xff] %vm707_vm2, %v3259_v61  ;;  %3280 = vpow2.f32 %v1156_v45  ;;  %v4392_v60 = vpop.permute.xlu0 %2309 }
 0x46a   : > { %v3263_v52 = vpop.eup %3262  ;;  %1217 = vst.msk [vmem:[#allocation6 + $0x1a8] sm:$0xff] %vm707_vm2, %v3261_v41  ;;  %3282 = vpow2.f32 %v1158_v63  ;;  %5202 = vst [vmem:[#allocation36_spill] sm:$0xff] %v4392_v60  ;;  %v5203_v63 = vsub.s32 1, %v3942_v27  ;;  %v5205_v41 = vsub.s32 3, %v3942_v27 }
 0x46b   : > { %v3265_v30 = vpop.eup %3264  ;;  %1203 = vst.msk [vmem:[#allocation6 + $0x138] sm:$0xff] %vm707_vm2, %v3263_v52  ;;  %3284 = vpow2.f32 %v1162_v59 }
 0x46c   : > { %v3267_v58 = vpop.eup %3266  ;;  %1218 = vst.msk [vmem:[#allocation6 + $0x1b0] sm:$0xff] %vm707_vm2, %v3265_v30 }
 0x46d   : > { %v3269_v62 = vpop.eup %3268  ;;  %1215 = vst.msk [vmem:[#allocation6 + $0x198] sm:$0xff] %vm707_vm2, %v3267_v58  ;;  %v4399_v59 = vpop.permute.xlu0 %2278 }
 0x46e   : > { %v4374_v17 = vld [vmem:[#allocation3] sm:$0xff]  ;;  %v3271_v39 = vpop.eup %3270  ;;  %1221 = vst.msk [vmem:[#allocation6 + $0x1c8] sm:$0xff] %vm707_vm2, %v3269_v62 }
 0x46f   : > { %v1282_v55 = vrot.slane %v4374_v17, %v3953_v32  ;;  %v3273_v15 = vpop.eup %3272  ;;  %1226 = vst.msk [vmem:[#allocation6 + $0x1f0] sm:$0xff] %vm707_vm2, %v3271_v39  ;;  %v1352_v45 = vrot.slane %v4374_v17, %v5201_v43  ;;  %v1317_v6 = vrot.slane %v4374_v17, %v5203_v63  ;;  %v1387_v52 = vrot.slane %v4374_v17, %v5205_v41 }
 0x470   : > { %v3275_v11 = vpop.eup %3274  ;;  %1216 = vst.msk [vmem:[#allocation6 + $0x1a0] sm:$0xff] %vm707_vm2, %v3273_v15  ;;  %v5208_v39 = vsub.s32 4, %v3942_v27  ;;  %v5214_v43 = vsub.s32 6, %v3942_v27 }
 0x471   : > { %1288 = vbcast.lane.b32.xlu0 %v1282_v55, 264  ;;  %1284 = vbcast.lane.b32.xlu1 %v1282_v55, 256  ;;  %v3277_v47 = vpop.eup %3276  ;;  %1211 = vst.msk [vmem:[#allocation6 + $0x178] sm:$0xff] %vm707_vm2, %v3275_v11  ;;  %v4401_v61 = vpop.permute.xlu0 %2344 }
 0x472   : > { %v3279_v3 = vpop.eup %3278  ;;  %1219 = vst.msk [vmem:[#allocation6 + $0x1b8] sm:$0xff] %vm707_vm2, %v3277_v47  ;;  %5204 = vst [vmem:[#allocation37_spill] sm:$0xff] %v4401_v61  ;;  %v1422_v15 = vrot.slane %v4374_v17, %v5208_v39  ;;  %v1492_v63 = vrot.slane %v4374_v17, %v5214_v43 }
 0x473   : > { %v3281_v16 = vpop.eup %3280  ;;  %1223 = vst.msk [vmem:[#allocation6 + $0x1d8] sm:$0xff] %vm707_vm2, %v3279_v3  ;;  %v5210_v3 = vsub.s32 5, %v3942_v27 }
 0x474   : > { %v3283_v0 = vpop.eup %3282  ;;  %1224 = vst.msk [vmem:[#allocation6 + $0x1e0] sm:$0xff] %vm707_vm2, %v3281_v16 }
 0x475   : > { %1304 = vbcast.lane.b32.xlu0 %v1282_v55, 296  ;;  %1292 = vbcast.lane.b32.xlu1 %v1282_v55, 272  ;;  %v3285_v29 = vpop.eup %3284  ;;  %1225 = vst.msk [vmem:[#allocation6 + $0x1e8] sm:$0xff] %vm707_vm2, %v3283_v0  ;;  %v4406_v30 = vpop.permute.xlu0 %2181  ;;  %v4422_v16 = vrot.slane %v4374_v17, %v5210_v3  ;;  %v5216_v3 = vsub.s32 7, %v3942_v27  ;;  %v879_v27 = vld [vmem:[#allocation5 + $0x8] sm:$0xff] }
 0x476   : > { %1227 = vst.msk [vmem:[#allocation6 + $0x1f8] sm:$0xff] %vm707_vm2, %v3285_v29 }
 0x477   : > { %v4446_v43 = vrot.slane %v4374_v17, %v5216_v3  ;;  %v4458_v17 = vmul.f32 %v879_v27, %v4095_v10 }
 0x479   : > { %1354 = vbcast.lane.b32.xlu0 %v1352_v45, 256  ;;  %1296 = vbcast.lane.b32.xlu1 %v1282_v55, 280  ;;  %v4408_v58 = vpop.permute.xlu0 %2313 }
 0x47a   : > { %5206 = vst [vmem:[#allocation38_spill] sm:$0xff] %v4408_v58 }
 0x47d   : > { %1308 = vbcast.lane.b32.xlu0 %v1282_v55, 304  ;;  %1319 = vbcast.lane.b32.xlu1 %v1317_v6, 256  ;;  %v4410_v62 = vpop.permute.xlu0 %2379 }
 0x47e   : > { %5207 = vst [vmem:[#allocation39_spill] sm:$0xff] %v4410_v62 }
 0x481   : > { %1362 = vbcast.lane.b32.xlu0 %v1352_v45, 272  ;;  %1323 = vbcast.lane.b32.xlu1 %v1317_v6, 264  ;;  %v4415_v11 = vpop.permute.xlu0 %2282 }
 0x482   : > { %5209 = vst [vmem:[#allocation40_spill] sm:$0xff] %v4415_v11 }
 0x485   : > { %1339 = vbcast.lane.b32.xlu0 %v1317_v6, 296  ;;  %1300 = vbcast.lane.b32.xlu1 %v1282_v55, 288  ;;  %v4417_v47 = vpop.permute.xlu0 %2146 }
 0x489   : > { %1389 = vbcast.lane.b32.xlu0 %v1387_v52, 256  ;;  %1327 = vbcast.lane.b32.xlu1 %v1317_v6, 272  ;;  %v4424_v0 = vpop.permute.xlu0 %2251 }
 0x48a   : > { %5211 = vst [vmem:[#allocation41_spill] sm:$0xff] %v4424_v0 }
 0x48d   : > { %1343 = vbcast.lane.b32.xlu0 %v1317_v6, 304  ;;  %1331 = vbcast.lane.b32.xlu1 %v1317_v6, 280 }
 0x491   : > { %1397 = vbcast.lane.b32.xlu0 %v1387_v52, 272  ;;  %1358 = vbcast.lane.b32.xlu1 %v1352_v45, 264 }
 0x495   : > { %1374 = vbcast.lane.b32.xlu0 %v1352_v45, 296  ;;  %1335 = vbcast.lane.b32.xlu1 %v1317_v6, 288 }
 0x499   : > { %1424 = vbcast.lane.b32.xlu0 %v1422_v15, 256  ;;  %1312 = vbcast.lane.b32.xlu1 %v1282_v55, 312  ;;  %v4427_v55 = vpop.permute.xlu0 %2383 }
 0x49a   : > { %5212 = vst [vmem:[#allocation42_spill] sm:$0xff] %v4427_v55 }
 0x49d   : > { %1378 = vbcast.lane.b32.xlu0 %v1352_v45, 304  ;;  %1366 = vbcast.lane.b32.xlu1 %v1352_v45, 280  ;;  %v4430_v29 = vpop.permute.xlu0 %2286 }
 0x49e   : > { %5213 = vst [vmem:[#allocation43_spill] sm:$0xff] %v4430_v29 }
 0x4a1   : > { %1432 = vbcast.lane.b32.xlu0 %v1422_v15, 272  ;;  %1393 = vbcast.lane.b32.xlu1 %v1387_v52, 264  ;;  %v4435_v41 = vpop.permute.xlu0 %2150 }
 0x4a5   : > { %1409 = vbcast.lane.b32.xlu0 %v1387_v52, 296  ;;  %1370 = vbcast.lane.b32.xlu1 %v1352_v45, 288 }
 0x4a9   : > { %1459 = vbcast.lane.b32.xlu0 %v4422_v16, 256  ;;  %1347 = vbcast.lane.b32.xlu1 %v1317_v6, 312  ;;  %v4437_v6 = vpop.permute.xlu0 %2255 }
 0x4ad   : > { %1413 = vbcast.lane.b32.xlu0 %v1387_v52, 304  ;;  %1401 = vbcast.lane.b32.xlu1 %v1387_v52, 280  ;;  %v4441_v39 = vpop.permute.xlu0 %2387 }
 0x4ae   : > { %5215 = vst [vmem:[#allocation44_spill] sm:$0xff] %v4441_v39 }
 0x4b1   : > { %1467 = vbcast.lane.b32.xlu0 %v4422_v16, 272  ;;  %1428 = vbcast.lane.b32.xlu1 %v1422_v15, 264 }
 0x4b5   : > { %1444 = vbcast.lane.b32.xlu0 %v1422_v15, 296  ;;  %1405 = vbcast.lane.b32.xlu1 %v1387_v52, 288 }
 0x4b9   : > { %1494 = vbcast.lane.b32.xlu0 %v1492_v63, 256  ;;  %1382 = vbcast.lane.b32.xlu1 %v1352_v45, 312  ;;  %v4449_v45 = vpop.permute.xlu0 %2290 }
 0x4ba   : > { %5217 = vst [vmem:[#allocation45_spill] sm:$0xff] %v4449_v45 }
 0x4bd   : > { %1448 = vbcast.lane.b32.xlu0 %v1422_v15, 304  ;;  %1436 = vbcast.lane.b32.xlu1 %v1422_v15, 280  ;;  %v4454_v55 = vpop.permute.xlu0 %2154 }
 0x4c1   : > { %1502 = vbcast.lane.b32.xlu0 %v1492_v63, 272  ;;  %1463 = vbcast.lane.b32.xlu1 %v4422_v16, 264  ;;  %v4460_v3 = vpop.permute.xlu0 %2259 }
 0x4c2   : > { %5218 = vst [vmem:[#allocation46_spill] sm:$0xff] %v4460_v3 }
 0x4c5   : > { %1479 = vbcast.lane.b32.xlu0 %v4422_v16, 296  ;;  %1440 = vbcast.lane.b32.xlu1 %v1422_v15, 288  ;;  %v4464_v39 = vpop.permute.xlu0 %2391 }
 0x4c6   : > { %5219 = vst [vmem:[#allocation47_spill] sm:$0xff] %v4464_v39 }
 0x4c9   : > { %1529 = vbcast.lane.b32.xlu0 %v4446_v43, 256  ;;  %1417 = vbcast.lane.b32.xlu1 %v1387_v52, 312  ;;  %v1237_v52 = vrot.slane %v4458_v17, %v4091_v7 }
 0x4cb   : > { %v1253_v62 = vrot.slane %v1237_v52, %v4091_v7  ;;  %v1245_v61 = vcombine.high %v1237_v52, %v1237_v52  ;;  %v1729_v52 = vld [vmem:[#allocation6 + $0x10] sm:$0xff] }
 0x4cd   : > { %1471 = vbcast.lane.b32.xlu1 %v4422_v16, 280  ;;  %1483 = vbcast.lane.b32.xlu0 %v4422_v16, 304  ;;  %v4470_v10 = vrot.slane %v1253_v62, %v3953_v32  ;;  %v1275_v39 = vcombine.high %v1253_v62, %v1253_v62 }
 0x4d1   : > { %1498 = vbcast.lane.b32.xlu1 %v1492_v63, 264  ;;  %1537 = vbcast.lane.b32.xlu0 %v4446_v43, 272 }
 0x4d5   : > { %1475 = vbcast.lane.b32.xlu1 %v4422_v16, 288  ;;  %1514 = vbcast.lane.b32.xlu0 %v1492_v63, 296 }
 0x4d9   : > { %1452 = vbcast.lane.b32.xlu1 %v1422_v15, 312  ;;  %1518 = vbcast.lane.b32.xlu0 %v1492_v63, 304 }
 0x4dd   : > { %1506 = vbcast.lane.b32.xlu1 %v1492_v63, 280  ;;  %1522 = vbcast.lane.b32.xlu0 %v1492_v63, 312 }
 0x4e1   : > { %1533 = vbcast.lane.b32.xlu1 %v4446_v43, 264  ;;  %1553 = vbcast.lane.b32.xlu0 %v4446_v43, 304 }
 0x4e3   : > { %v1285_v27 = vpop.permute.xlu1 %1284  ;;  %v1289_v9 = vpop.permute.xlu0 %1288 }
 0x4e4   : > { %v1599_v15 = vmul.f32 %v4470_v10, %v1285_v27  ;;  %v1600_v8 = vmul.f32 %v4470_v10, %v1289_v9  ;;  %v4484_v9 = vrot.slane %v1275_v39, %v3953_v32 }
 0x4e5   : > { %1510 = vbcast.lane.b32.xlu1 %v1492_v63, 288  ;;  %2294 = vbcast.lane.b32.xlu0 %v3979_v38, 304  ;;  %v1735_v63 = vmul.f32 0.0, %v1727_v57 }
 0x4e6   : > { %1663 = vst.msk [vmem:[#allocation7] sm:$0xff] %vm707_vm2, %v1599_v15  ;;  %1664 = vst.msk [vmem:[#allocation7 + $0x8] sm:$0xff] %vm707_vm2, %v1600_v8  ;;  %v4487_v8 = vrot.slane %v1245_v61, %v4091_v7 }
 0x4e7   : > { %v1293_v31 = vpop.permute.xlu1 %1292  ;;  %v1305_v51 = vpop.permute.xlu0 %1304 }
 0x4e8   : > { %v1601_v28 = vmul.f32 %v4470_v10, %v1293_v31  ;;  %v1604_v45 = vmul.f32 %v4470_v10, %v1305_v51  ;;  %v1736_v51 = vmul.f32 0.0, %v1728_v54  ;;  %v4497_v54 = vrot.slane %v4487_v8, %v3953_v32 }
 0x4e9   : > { %1487 = vbcast.lane.b32.xlu1 %v4422_v16, 312  ;;  %2158 = vbcast.lane.b32.xlu0 %v3963_v34, 312 }
 0x4ea   : > { %1665 = vst.msk [vmem:[#allocation7 + $0x10] sm:$0xff] %vm707_vm2, %v1601_v28  ;;  %1668 = vst.msk [vmem:[#allocation7 + $0x28] sm:$0xff] %vm707_vm2, %v1604_v45  ;;  %v1732_v28 = vld [vmem:[#allocation6 + $0x28] sm:$0xff] }
 0x4eb   : > { %v1297_v62 = vpop.permute.xlu1 %1296  ;;  %v1355_v31 = vpop.permute.xlu0 %1354 }
 0x4ec   : > { %v1602_v27 = vmul.f32 %v4470_v10, %v1297_v62  ;;  %v1615_v16 = vmul.f32 %v4484_v9, %v1355_v31  ;;  %v1737_v62 = vmul.f32 0.0, %v1729_v52  ;;  %v1740_v31 = vmul.f32 0.0, %v1732_v28 }
 0x4ed   : > { %v1743_v34 = vld [vmem:[#allocation7] sm:$0xff]  ;;  %v1744_v15 = vld [vmem:[#allocation7 + $0x8] sm:$0xff]  ;;  %1541 = vbcast.lane.b32.xlu1 %v4446_v43, 280  ;;  %2329 = vbcast.lane.b32.xlu0 %v3988_v40, 304 }
 0x4ee   : > { %v1751_v39 = vadd.f32 %v1743_v34, %v1735_v63  ;;  %v1752_v45 = vadd.f32 %v1744_v15, %v1736_v51  ;;  %1666 = vst.msk [vmem:[#allocation7 + $0x18] sm:$0xff] %vm707_vm2, %v1602_v27  ;;  %1679 = vst.msk [vmem:[#allocation7 + $0x80] sm:$0xff] %vm707_vm2, %v1615_v16  ;;  %v1730_v34 = vld [vmem:[#allocation6 + $0x18] sm:$0xff] }
 0x4ef   : > { %v1320_v57 = vpop.permute.xlu1 %1319  ;;  %v1309_v61 = vpop.permute.xlu0 %1308 }
 0x4f0   : > { %1759 = vst.msk [vmem:[#allocation7] sm:$0xff] %vm707_vm2, %v1751_v39  ;;  %1760 = vst.msk [vmem:[#allocation7 + $0x8] sm:$0xff] %vm707_vm2, %v1752_v45  ;;  %v1607_v29 = vmul.f32 %v4497_v54, %v1320_v57  ;;  %v1605_v63 = vmul.f32 %v4470_v10, %v1309_v61  ;;  %v1738_v57 = vmul.f32 0.0, %v1730_v34 }
 0x4f1   : > { %v1745_v51 = vld [vmem:[#allocation7 + $0x10] sm:$0xff]  ;;  %v1748_v27 = vld [vmem:[#allocation7 + $0x28] sm:$0xff]  ;;  %1545 = vbcast.lane.b32.xlu1 %v4446_v43, 288  ;;  %2298 = vbcast.lane.b32.xlu0 %v3979_v38, 312 }
 0x4f2   : > { %v4505_v16 = vadd.f32 %v1745_v51, %v1737_v62  ;;  %v1756_v15 = vadd.f32 %v1748_v27, %v1740_v31  ;;  %1671 = vst.msk [vmem:[#allocation7 + $0x40] sm:$0xff] %vm707_vm2, %v1607_v29  ;;  %1669 = vst.msk [vmem:[#allocation7 + $0x30] sm:$0xff] %vm707_vm2, %v1605_v63  ;;  %v1733_v62 = vld [vmem:[#allocation6 + $0x30] sm:$0xff]  ;;  %v1277_v31 = vcombine.high %v4487_v8, %v4487_v8  ;;  %v1768_v63 = vld [vmem:[#allocation6 + $0x40] sm:$0xff] }
 0x4f3   : > { %v1324_v52 = vpop.permute.xlu1 %1323  ;;  %v1363_v28 = vpop.permute.xlu0 %1362  ;;  %v1776_v34 = vmul.f32 %v1768_v63, %v1751_v39 }
 0x4f4   : > { %1761 = vst.msk [vmem:[#allocation7 + $0x10] sm:$0xff] %vm707_vm2, %v4505_v16  ;;  %1764 = vst.msk [vmem:[#allocation7 + $0x28] sm:$0xff] %vm707_vm2, %v1756_v15  ;;  %v1608_v61 = vmul.f32 %v4497_v54, %v1324_v52  ;;  %v1617_v3 = vmul.f32 %v4484_v9, %v1363_v28  ;;  %v1741_v52 = vmul.f32 0.0, %v1733_v62  ;;  %v4533_v39 = vrot.slane %v1277_v31, %v3953_v32  ;;  %v1769_v62 = vld [vmem:[#allocation6 + $0x48] sm:$0xff] }
 0x4f5   : > { %v1746_v38 = vld [vmem:[#allocation7 + $0x18] sm:$0xff]  ;;  %1549 = vbcast.lane.b32.xlu1 %v4446_v43, 296  ;;  %2333 = vbcast.lane.b32.xlu0 %v3988_v40, 312 }
 0x4f6   : > { %v4516_v29 = vadd.f32 %v1746_v38, %v1738_v57  ;;  %1672 = vst.msk [vmem:[#allocation7 + $0x48] sm:$0xff] %vm707_vm2, %v1608_v61  ;;  %1681 = vst.msk [vmem:[#allocation7 + $0x90] sm:$0xff] %vm707_vm2, %v1617_v3  ;;  %v1810_v61 = vld [vmem:[#allocation6 + $0x80] sm:$0xff] }
 0x4f7   : > { %v1301_v51 = vpop.permute.xlu1 %1300  ;;  %v1340_v27 = vpop.permute.xlu0 %1339 }
 0x4f8   : > { %1762 = vst.msk [vmem:[#allocation7 + $0x18] sm:$0xff] %vm707_vm2, %v4516_v29  ;;  %v1603_v28 = vmul.f32 %v4470_v10, %v1301_v51  ;;  %v1612_v40 = vmul.f32 %v4497_v54, %v1340_v27 }
 0x4f9   : > { %v1785_v57 = vld [vmem:[#allocation7 + $0x40] sm:$0xff]  ;;  %v1749_v38 = vld [vmem:[#allocation7 + $0x30] sm:$0xff]  ;;  %2360 = vbcast.lane.b32.xlu1 %v3997_v42, 296  ;;  %2368 = vbcast.lane.b32.xlu0 %v3997_v42, 312 }
 0x4fa   : > { %v1793_v3 = vadd.f32 %v1785_v57, %v1776_v34  ;;  %v4528_v8 = vadd.f32 %v1749_v38, %v1741_v52  ;;  %1667 = vst.msk [vmem:[#allocation7 + $0x20] sm:$0xff] %vm707_vm2, %v1603_v28  ;;  %1676 = vst.msk [vmem:[#allocation7 + $0x68] sm:$0xff] %vm707_vm2, %v1612_v40  ;;  %v1777_v34 = vmul.f32 %v1769_v62, %v1752_v45  ;;  %v1731_v40 = vld [vmem:[#allocation6 + $0x20] sm:$0xff]  ;;  %v1773_v45 = vld [vmem:[#allocation6 + $0x68] sm:$0xff] }
 0x4fb   : > { %v1328_v63 = vpop.permute.xlu1 %1327  ;;  %v1390_v51 = vpop.permute.xlu0 %1389  ;;  %v1827_v38 = vld [vmem:[#allocation7 + $0x80] sm:$0xff] }
 0x4fc   : > { %1801 = vst.msk [vmem:[#allocation7 + $0x40] sm:$0xff] %vm707_vm2, %v1793_v3  ;;  %v1818_v27 = vmul.f32 %v1810_v61, %v1793_v3  ;;  %1765 = vst.msk [vmem:[#allocation7 + $0x30] sm:$0xff] %vm707_vm2, %v4528_v8  ;;  %v1609_v52 = vmul.f32 %v4497_v54, %v1328_v63  ;;  %v1623_v28 = vmul.f32 %v4533_v39, %v1390_v51  ;;  %v1739_v63 = vmul.f32 0.0, %v1731_v40  ;;  %v1852_v40 = vld [vmem:[#allocation6 + $0xc0] sm:$0xff] }
 0x4fd   : > { %v1786_v57 = vld [vmem:[#allocation7 + $0x48] sm:$0xff]  ;;  %1557 = vbcast.lane.b32.xlu1 %v4446_v43, 312  ;;  %v1230_v3 = vcombine.high %v4458_v17, %v4458_v17  ;;  %v1781_v51 = vmul.f32 %v1773_v45, %v1756_v15 }
 0x4fe   : > { %v4541_v31 = vadd.f32 %v1786_v57, %v1777_v34  ;;  %1673 = vst.msk [vmem:[#allocation7 + $0x50] sm:$0xff] %vm707_vm2, %v1609_v52  ;;  %v1835_v0 = vadd.f32 %v1827_v38, %v1818_v27  ;;  %1687 = vst.msk [vmem:[#allocation7 + $0xc0] sm:$0xff] %vm707_vm2, %v1623_v28  ;;  %v1770_v57 = vld [vmem:[#allocation6 + $0x50] sm:$0xff] }
 0x4ff   : > { %v1332_v61 = vpop.permute.xlu1 %1331  ;;  %v1344_v62 = vpop.permute.xlu0 %1343  ;;  %v4560_v15 = vrot.slane %v1230_v3, %v4091_v7 }
 0x500   : > { %1802 = vst.msk [vmem:[#allocation7 + $0x48] sm:$0xff] %vm707_vm2, %v4541_v31  ;;  %1843 = vst.msk [vmem:[#allocation7 + $0x80] sm:$0xff] %vm707_vm2, %v1835_v0  ;;  %v1610_v43 = vmul.f32 %v4497_v54, %v1332_v61  ;;  %v1613_v34 = vmul.f32 %v4497_v54, %v1344_v62  ;;  %v1860_v61 = vmul.f32 %v1852_v40, %v1835_v0  ;;  %v1812_v0 = vld [vmem:[#allocation6 + $0x90] sm:$0xff] }
 0x501   : > { %v1747_v27 = vld [vmem:[#allocation7 + $0x20] sm:$0xff]  ;;  %v1790_v52 = vld [vmem:[#allocation7 + $0x68] sm:$0xff]  ;;  %2263 = vbcast.lane.b32.xlu1 %v3970_v36, 312  ;;  %v1778_v36 = vmul.f32 %v1770_v57, %v4505_v16  ;;  %v4576_v16 = vrot.slane %v4560_v15, %v4091_v7  ;;  %v1774_v57 = vld [vmem:[#allocation6 + $0x70] sm:$0xff] }
 0x502   : > { %v4553_v28 = vadd.f32 %v1747_v27, %v1739_v63  ;;  %v4555_v17 = vadd.f32 %v1790_v52, %v1781_v51  ;;  %1674 = vst.msk [vmem:[#allocation7 + $0x58] sm:$0xff] %vm707_vm2, %v1610_v43  ;;  %1677 = vst.msk [vmem:[#allocation7 + $0x70] sm:$0xff] %vm707_vm2, %v1613_v34  ;;  %v1771_v27 = vld [vmem:[#allocation6 + $0x58] sm:$0xff] }
 0x503   : > { %v1359_v38 = vpop.permute.xlu1 %1358  ;;  %v1398_v45 = vpop.permute.xlu0 %1397  ;;  %v1779_v52 = vmul.f32 %v1771_v27, %v4516_v29 }
 0x504   : > { %1763 = vst.msk [vmem:[#allocation7 + $0x20] sm:$0xff] %vm707_vm2, %v4553_v28  ;;  %1806 = vst.msk [vmem:[#allocation7 + $0x68] sm:$0xff] %vm707_vm2, %v4555_v17  ;;  %v1616_v62 = vmul.f32 %v4484_v9, %v1359_v38  ;;  %v1625_v63 = vmul.f32 %v4533_v39, %v1398_v45 }
 0x505   : > { %v1787_v51 = vld [vmem:[#allocation7 + $0x50] sm:$0xff]  ;;  %v1869_v3 = vld [vmem:[#allocation7 + $0xc0] sm:$0xff]  ;;  %2395 = vbcast.lane.b32.xlu1 %v4008_v44, 296 }
 0x506   : > { %v1795_v43 = vadd.f32 %v1787_v51, %v1778_v36  ;;  %v4570_v34 = vadd.f32 %v1869_v3, %v1860_v61  ;;  %1680 = vst.msk [vmem:[#allocation7 + $0x88] sm:$0xff] %vm707_vm2, %v1616_v62  ;;  %1689 = vst.msk [vmem:[#allocation7 + $0xd0] sm:$0xff] %vm707_vm2, %v1625_v63  ;;  %v1782_v36 = vmul.f32 %v1774_v57, %v4528_v8  ;;  %v1829_v3 = vld [vmem:[#allocation7 + $0x90] sm:$0xff] }
 0x507   : > { %v1336_v40 = vpop.permute.xlu1 %1335  ;;  %v1375_v38 = vpop.permute.xlu0 %1374  ;;  %v4594_v8 = vrot.slane %v4576_v16, %v3953_v32 }
 0x508   : > { %1803 = vst.msk [vmem:[#allocation7 + $0x50] sm:$0xff] %vm707_vm2, %v1795_v43  ;;  %v1820_v45 = vmul.f32 %v1812_v0, %v1795_v43  ;;  %1885 = vst.msk [vmem:[#allocation7 + $0xc0] sm:$0xff] %vm707_vm2, %v4570_v34  ;;  %v1611_v61 = vmul.f32 %v4497_v54, %v1336_v40  ;;  %v1620_v62 = vmul.f32 %v4484_v9, %v1375_v38  ;;  %v1811_v43 = vld [vmem:[#allocation6 + $0x88] sm:$0xff]  ;;  %v1854_v0 = vld [vmem:[#allocation6 + $0xd0] sm:$0xff] }
 0x509   : > { %v1788_v63 = vld [vmem:[#allocation7 + $0x58] sm:$0xff]  ;;  %v1791_v51 = vld [vmem:[#allocation7 + $0x70] sm:$0xff]  ;;  %2364 = vbcast.lane.b32.xlu1 %v3997_v42, 304  ;;  %v1819_v42 = vmul.f32 %v1811_v43, %v4541_v31  ;;  %v1772_v31 = vld [vmem:[#allocation6 + $0x60] sm:$0xff] }
 0x50a   : > { %v4586_v29 = vadd.f32 %v1788_v63, %v1779_v52  ;;  %v4588_v27 = vadd.f32 %v1791_v51, %v1782_v36  ;;  %v1837_v58 = vadd.f32 %v1829_v3, %v1820_v45  ;;  %1675 = vst.msk [vmem:[#allocation7 + $0x60] sm:$0xff] %vm707_vm2, %v1611_v61  ;;  %1684 = vst.msk [vmem:[#allocation7 + $0xa8] sm:$0xff] %vm707_vm2, %v1620_v62  ;;  %v1815_v51 = vld [vmem:[#allocation6 + $0xa8] sm:$0xff] }
 0x50b   : > { %v1313_v57 = vpop.permute.xlu1 %1312  ;;  %v1425_v40 = vpop.permute.xlu0 %1424  ;;  %v1823_v43 = vmul.f32 %v1815_v51, %v4555_v17  ;;  %v1894_v17 = vld [vmem:[#allocation6 + $0x100] sm:$0xff] }
 0x50c   : > { %1804 = vst.msk [vmem:[#allocation7 + $0x58] sm:$0xff] %vm707_vm2, %v4586_v29  ;;  %1807 = vst.msk [vmem:[#allocation7 + $0x70] sm:$0xff] %vm707_vm2, %v4588_v27  ;;  %v1862_v52 = vmul.f32 %v1854_v0, %v1837_v58  ;;  %v1606_v38 = vmul.f32 %v4470_v10, %v1313_v57  ;;  %v1631_v45 = vmul.f32 %v4594_v8, %v1425_v40 }
 0x50d   : > { %1845 = vst.msk [vmem:[#allocation7 + $0x90] sm:$0xff] %vm707_vm2, %v1837_v58  ;;  %v1828_v36 = vld [vmem:[#allocation7 + $0x88] sm:$0xff]  ;;  %v1871_v61 = vld [vmem:[#allocation7 + $0xd0] sm:$0xff]  ;;  %2399 = vbcast.lane.b32.xlu1 %v4008_v44, 304  ;;  %v1780_v10 = vmul.f32 %v1772_v31, %v4553_v28  ;;  %v1246_v28 = vcombine.high %v4560_v15, %v4560_v15  ;;  %v1902_v31 = vmul.f32 %v1894_v17, %v4570_v34 }
 0x50e   : > { %v4605_v62 = vadd.f32 %v1828_v36, %v1819_v42  ;;  %v4607_v63 = vadd.f32 %v1871_v61, %v1862_v52  ;;  %1670 = vst.msk [vmem:[#allocation7 + $0x38] sm:$0xff] %vm707_vm2, %v1606_v38  ;;  %1695 = vst.msk [vmem:[#allocation7 + $0x100] sm:$0xff] %vm707_vm2, %v1631_v45  ;;  %v1734_v52 = vld [vmem:[#allocation6 + $0x38] sm:$0xff] }
 0x50f   : > { %v1367_v3 = vpop.permute.xlu1 %1366  ;;  %v1379_v58 = vpop.permute.xlu0 %1378 }
 0x510   : > { %1844 = vst.msk [vmem:[#allocation7 + $0x88] sm:$0xff] %vm707_vm2, %v4605_v62  ;;  %1887 = vst.msk [vmem:[#allocation7 + $0xd0] sm:$0xff] %vm707_vm2, %v4607_v63  ;;  %v1618_v0 = vmul.f32 %v4484_v9, %v1367_v3  ;;  %v1621_v57 = vmul.f32 %v4484_v9, %v1379_v58 }
 0x511   : > { %v1789_v40 = vld [vmem:[#allocation7 + $0x60] sm:$0xff]  ;;  %v1832_v42 = vld [vmem:[#allocation7 + $0xa8] sm:$0xff]  ;;  %2403 = vbcast.lane.b32.xlu1 %v4008_v44, 312  ;;  %v1742_v44 = vmul.f32 0.0, %v1734_v52 }
 0x512   : > { %v4620_v38 = vadd.f32 %v1789_v40, %v1780_v10  ;;  %v4622_v45 = vadd.f32 %v1832_v42, %v1823_v43  ;;  %1682 = vst.msk [vmem:[#allocation7 + $0x98] sm:$0xff] %vm707_vm2, %v1618_v0  ;;  %1685 = vst.msk [vmem:[#allocation7 + $0xb0] sm:$0xff] %vm707_vm2, %v1621_v57  ;;  %v4642_v0 = vrot.slane %v1246_v28, %v4091_v7  ;;  %v1813_v57 = vld [vmem:[#allocation6 + $0x98] sm:$0xff]  ;;  %v1816_v40 = vld [vmem:[#allocation6 + $0xb0] sm:$0xff] }
 0x513   : > { %v1394_v36 = vpop.permute.xlu1 %1393  ;;  %v1433_v61 = vpop.permute.xlu0 %1432  ;;  %v1821_v52 = vmul.f32 %v1813_v57, %v4586_v29  ;;  %v1824_v17 = vmul.f32 %v1816_v40, %v4588_v27  ;;  %v3140_v29 = vld [vmem:[%s5220_s23] sm:$0xff]   ;;  %v1853_v27 = vld [vmem:[#allocation6 + $0xc8] sm:$0xff] }
 0x514   : > { %1805 = vst.msk [vmem:[#allocation7 + $0x60] sm:$0xff] %vm707_vm2, %v4620_v38  ;;  %1848 = vst.msk [vmem:[#allocation7 + $0xa8] sm:$0xff] %vm707_vm2, %v4622_v45  ;;  %v1624_v51 = vmul.f32 %v4533_v39, %v1394_v36  ;;  %v1633_v3 = vmul.f32 %v4594_v8, %v1433_v61  ;;  %v1861_v57 = vmul.f32 %v1853_v27, %v4605_v62  ;;  %3020 = vmatpush3.bf16.msra.mxu1 %v3140_v29  ;;  %v1857_v62 = vld [vmem:[#allocation6 + $0xe8] sm:$0xff]  ;;  %v2072_v60 = vld [vmem:[#allocation7 + $0x58] sm:$0xff] }
 0x515   : > { %v1750_v58 = vld [vmem:[#allocation7 + $0x38] sm:$0xff]  ;;  %v1911_v10 = vld [vmem:[#allocation7 + $0x100] sm:$0xff] }
 0x516   : > { %v4635_v43 = vadd.f32 %v1750_v58, %v1742_v44  ;;  %v4637_v15 = vadd.f32 %v1911_v10, %v1902_v31  ;;  %1688 = vst.msk [vmem:[#allocation7 + $0xc8] sm:$0xff] %vm707_vm2, %v1624_v51  ;;  %1697 = vst.msk [vmem:[#allocation7 + $0x110] sm:$0xff] %vm707_vm2, %v1633_v3  ;;  %v4660_v51 = vrot.slane %v4642_v0, %v3953_v32  ;;  %v1896_v3 = vld [vmem:[#allocation6 + $0x110] sm:$0xff] }
 0x517   : > { %v1371_v34 = vpop.permute.xlu1 %1370  ;;  %v1410_v42 = vpop.permute.xlu0 %1409  ;;  %v1904_v40 = vmul.f32 %v1896_v3, %v4607_v63  ;;  %v1865_v3 = vmul.f32 %v1857_v62, %v4622_v45  ;;  %v1936_v45 = vld [vmem:[#allocation6 + $0x140] sm:$0xff] }
 0x518   : > { %1766 = vst.msk [vmem:[#allocation7 + $0x38] sm:$0xff] %vm707_vm2, %v4635_v43  ;;  %1927 = vst.msk [vmem:[#allocation7 + $0x100] sm:$0xff] %vm707_vm2, %v4637_v15  ;;  %v1619_v36 = vmul.f32 %v4484_v9, %v1371_v34  ;;  %v1628_v61 = vmul.f32 %v4533_v39, %v1410_v42  ;;  %v1944_v62 = vmul.f32 %v1936_v45, %v4637_v15  ;;  %v1855_v15 = vld [vmem:[#allocation6 + $0xd8] sm:$0xff] }
 0x519   : > { %v1830_v7 = vld [vmem:[#allocation7 + $0x98] sm:$0xff]  ;;  %v1833_v28 = vld [vmem:[#allocation7 + $0xb0] sm:$0xff] }
 0x51a   : > { %v4652_v44 = vadd.f32 %v1830_v7, %v1821_v52  ;;  %v4654_v31 = vadd.f32 %v1833_v28, %v1824_v17  ;;  %1683 = vst.msk [vmem:[#allocation7 + $0xa0] sm:$0xff] %vm707_vm2, %v1619_v36  ;;  %1692 = vst.msk [vmem:[#allocation7 + $0xe8] sm:$0xff] %vm707_vm2, %v1628_v61  ;;  %v3141_v52 = vld [vmem:[%s5220_s23 + $0x8] sm:$0xff]   ;;  %v5221_v61 = vmov 0.0  }
 0x51b   : > { %v1348_v58 = vpop.permute.xlu1 %1347  ;;  %v1460_v10 = vpop.permute.xlu0 %1459  ;;  %3021 = vmatprep.subr.bf16.mxu1 %v5221_v61 }
 0x51c   : > { %1846 = vst.msk [vmem:[#allocation7 + $0x98] sm:$0xff] %vm707_vm2, %v4652_v44  ;;  %1849 = vst.msk [vmem:[#allocation7 + $0xb0] sm:$0xff] %vm707_vm2, %v4654_v31  ;;  %v1614_v34 = vmul.f32 %v4497_v54, %v1348_v58  ;;  %v1639_v42 = vmul.f32 %v4660_v51, %v1460_v10  ;;  %v1814_v54 = vld [vmem:[#allocation6 + $0xa0] sm:$0xff]  ;;  %3022 = vmatpush3.bf16.msra.mxu1 %v3141_v52  ;;  %v1863_v45 = vmul.f32 %v1855_v15, %v4652_v44  ;;  %v1938_v44 = vld [vmem:[#allocation6 + $0x150] sm:$0xff] }
 0x51d   : > { %v1870_v17 = vld [vmem:[#allocation7 + $0xc8] sm:$0xff]  ;;  %v1913_v36 = vld [vmem:[#allocation7 + $0x110] sm:$0xff]  ;;  %v1822_v27 = vmul.f32 %v1814_v54, %v4620_v38  ;;  %3023 = vmatprep.subr.bf16.mxu1 %v5221_v61  ;;  %v1775_v38 = vld [vmem:[#allocation6 + $0x78] sm:$0xff] }
 0x51e   : > { %v4677_v7 = vadd.f32 %v1870_v17, %v1861_v57  ;;  %v4679_v28 = vadd.f32 %v1913_v36, %v1904_v40  ;;  %1678 = vst.msk [vmem:[#allocation7 + $0x78] sm:$0xff] %vm707_vm2, %v1614_v34  ;;  %1703 = vst.msk [vmem:[#allocation7 + $0x140] sm:$0xff] %vm707_vm2, %v1639_v42  ;;  %v3142_v57 = vld [vmem:[%s5220_s23 + $0x10] sm:$0xff]   ;;  %v1783_v54 = vmul.f32 %v1775_v38, %v4635_v43 }
 0x51f   : > { %v1402_v63 = vpop.permute.xlu1 %1401  ;;  %v1414_v29 = vpop.permute.xlu0 %1413  ;;  %v1276_v43 = vcombine.high %v4576_v16, %v4576_v16 }
 0x520   : > { %1886 = vst.msk [vmem:[#allocation7 + $0xc8] sm:$0xff] %vm707_vm2, %v4677_v7  ;;  %1929 = vst.msk [vmem:[#allocation7 + $0x110] sm:$0xff] %vm707_vm2, %v4679_v28  ;;  %v1626_v58 = vmul.f32 %v4533_v39, %v1402_v63  ;;  %v1629_v10 = vmul.f32 %v4533_v39, %v1414_v29  ;;  %3024 = vmatpush3.bf16.msra.mxu1 %v3142_v57  ;;  %v1946_v15 = vmul.f32 %v1938_v44, %v4679_v28 }
 0x521   : > { %v1831_v40 = vld [vmem:[#allocation7 + $0xa0] sm:$0xff]  ;;  %v1874_v34 = vld [vmem:[#allocation7 + $0xe8] sm:$0xff]  ;;  %3025 = vmatprep.subr.bf16.mxu1 %v5221_v61 }
 0x522   : > { %v4695_v42 = vadd.f32 %v1831_v40, %v1822_v27  ;;  %v4697_v17 = vadd.f32 %v1874_v34, %v1865_v3  ;;  %1690 = vst.msk [vmem:[#allocation7 + $0xd8] sm:$0xff] %vm707_vm2, %v1626_v58  ;;  %1693 = vst.msk [vmem:[#allocation7 + $0xf0] sm:$0xff] %vm707_vm2, %v1629_v10  ;;  %v3143_v27 = vld [vmem:[%s5220_s23 + $0x18] sm:$0xff]  }
 0x523   : > { %v1429_v36 = vpop.permute.xlu1 %1428  ;;  %v1468_v52 = vpop.permute.xlu0 %1467  ;;  %v1858_v34 = vld [vmem:[#allocation6 + $0xf0] sm:$0xff] }
 0x524   : > { %1847 = vst.msk [vmem:[#allocation7 + $0xa0] sm:$0xff] %vm707_vm2, %v4695_v42  ;;  %1890 = vst.msk [vmem:[#allocation7 + $0xe8] sm:$0xff] %vm707_vm2, %v4697_v17  ;;  %v1632_v63 = vmul.f32 %v4594_v8, %v1429_v36  ;;  %v1641_v29 = vmul.f32 %v4660_v51, %v1468_v52  ;;  %v1866_v61 = vmul.f32 %v1858_v34, %v4654_v31  ;;  %3026 = vmatpush3.bf16.msra.mxu1 %v3143_v27 }
 0x525   : > { %v1792_v3 = vld [vmem:[#allocation7 + $0x78] sm:$0xff]  ;;  %v1953_v58 = vld [vmem:[#allocation7 + $0x140] sm:$0xff] }
 0x526   : > { %v1800_v10 = vadd.f32 %v1792_v3, %v1783_v54  ;;  %v1961_v40 = vadd.f32 %v1953_v58, %v1944_v62  ;;  %1696 = vst.msk [vmem:[#allocation7 + $0x108] sm:$0xff] %vm707_vm2, %v1632_v63  ;;  %1705 = vst.msk [vmem:[#allocation7 + $0x150] sm:$0xff] %vm707_vm2, %v1641_v29  ;;  %v4726_v29 = vrot.slane %v1276_v43, %v3953_v32  ;;  %v1895_v3 = vld [vmem:[#allocation6 + $0x108] sm:$0xff] }
 0x527   : > { %v1406_v57 = vpop.permute.xlu1 %1405  ;;  %v1445_v38 = vpop.permute.xlu0 %1444  ;;  %v1903_v27 = vmul.f32 %v1895_v3, %v4677_v7 }
 0x528   : > { %1808 = vst.msk [vmem:[#allocation7 + $0x78] sm:$0xff] %vm707_vm2, %v1800_v10  ;;  %1969 = vst.msk [vmem:[#allocation7 + $0x140] sm:$0xff] %vm707_vm2, %v1961_v40  ;;  %v1627_v36 = vmul.f32 %v4533_v39, %v1406_v57  ;;  %v1636_v52 = vmul.f32 %v4594_v8, %v1445_v38 }
 0x529   : > { %v1872_v54 = vld [vmem:[#allocation7 + $0xd8] sm:$0xff]  ;;  %v1875_v62 = vld [vmem:[#allocation7 + $0xf0] sm:$0xff] }
 0x52a   : > { %v1880_v16 = vadd.f32 %v1872_v54, %v1863_v45  ;;  %v1883_v63 = vadd.f32 %v1875_v62, %v1866_v61  ;;  %1691 = vst.msk [vmem:[#allocation7 + $0xe0] sm:$0xff] %vm707_vm2, %v1627_v36  ;;  %1700 = vst.msk [vmem:[#allocation7 + $0x128] sm:$0xff] %vm707_vm2, %v1636_v52  ;;  %v1856_v36 = vld [vmem:[#allocation6 + $0xe0] sm:$0xff]  ;;  %v1899_v52 = vld [vmem:[#allocation6 + $0x128] sm:$0xff] }
 0x52b   : > { %v1383_v58 = vpop.permute.xlu1 %1382  ;;  %v1495_v31 = vpop.permute.xlu0 %1494  ;;  %v1907_v28 = vmul.f32 %v1899_v52, %v4697_v17 }
 0x52c   : > { %1888 = vst.msk [vmem:[#allocation7 + $0xd8] sm:$0xff] %vm707_vm2, %v1880_v16  ;;  %1891 = vst.msk [vmem:[#allocation7 + $0xf0] sm:$0xff] %vm707_vm2, %v1883_v63  ;;  %v1622_v34 = vmul.f32 %v4484_v9, %v1383_v58  ;;  %v1647_v57 = vmul.f32 %v4726_v29, %v1495_v31  ;;  %v1864_v9 = vmul.f32 %v1856_v36, %v4695_v42 }
 0x52d   : > { %v1912_v38 = vld [vmem:[#allocation7 + $0x108] sm:$0xff]  ;;  %v1955_v45 = vld [vmem:[#allocation7 + $0x150] sm:$0xff] }
 0x52e   : > { %v4734_v43 = vadd.f32 %v1912_v38, %v1903_v27  ;;  %v4736_v61 = vadd.f32 %v1955_v45, %v1946_v15  ;;  %1686 = vst.msk [vmem:[#allocation7 + $0xb8] sm:$0xff] %vm707_vm2, %v1622_v34  ;;  %1711 = vst.msk [vmem:[#allocation7 + $0x180] sm:$0xff] %vm707_vm2, %v1647_v57  ;;  %v1817_v15 = vld [vmem:[#allocation6 + $0xb8] sm:$0xff]  ;;  %v1978_v34 = vld [vmem:[#allocation6 + $0x180] sm:$0xff] }
 0x52f   : > { %v1437_v54 = vpop.permute.xlu1 %1436  ;;  %v1449_v7 = vpop.permute.xlu0 %1448  ;;  %v1825_v17 = vmul.f32 %v1817_v15, %v1800_v10  ;;  %v1986_v38 = vmul.f32 %v1978_v34, %v1961_v40  ;;  %v1900_v10 = vld [vmem:[#allocation6 + $0x130] sm:$0xff] }
 0x530   : > { %1928 = vst.msk [vmem:[#allocation7 + $0x108] sm:$0xff] %vm707_vm2, %v4734_v43  ;;  %1971 = vst.msk [vmem:[#allocation7 + $0x150] sm:$0xff] %vm707_vm2, %v4736_v61  ;;  %v1634_v62 = vmul.f32 %v4594_v8, %v1437_v54  ;;  %v1637_v3 = vmul.f32 %v4594_v8, %v1449_v7 }
 0x531   : > { %v1873_v44 = vld [vmem:[#allocation7 + $0xe0] sm:$0xff]  ;;  %v1916_v58 = vld [vmem:[#allocation7 + $0x128] sm:$0xff] }
 0x532   : > { %v4748_v31 = vadd.f32 %v1873_v44, %v1864_v9  ;;  %v4750_v27 = vadd.f32 %v1916_v58, %v1907_v28  ;;  %1698 = vst.msk [vmem:[#allocation7 + $0x118] sm:$0xff] %vm707_vm2, %v1634_v62  ;;  %1701 = vst.msk [vmem:[#allocation7 + $0x130] sm:$0xff] %vm707_vm2, %v1637_v3  ;;  %v1278_v28 = vcombine.high %v4642_v0, %v4642_v0  ;;  %v1897_v62 = vld [vmem:[#allocation6 + $0x118] sm:$0xff] }
 0x533   : > { %v1464_v57 = vpop.permute.xlu1 %1463  ;;  %v1503_v42 = vpop.permute.xlu0 %1502  ;;  %v1905_v44 = vmul.f32 %v1897_v62, %v1880_v16  ;;  %v1908_v58 = vmul.f32 %v1900_v10, %v1883_v63  ;;  %v1937_v16 = vld [vmem:[#allocation6 + $0x148] sm:$0xff]  ;;  %v1980_v63 = vld [vmem:[#allocation6 + $0x190] sm:$0xff] }
 0x534   : > { %1889 = vst.msk [vmem:[#allocation7 + $0xe0] sm:$0xff] %vm707_vm2, %v4748_v31  ;;  %1932 = vst.msk [vmem:[#allocation7 + $0x128] sm:$0xff] %vm707_vm2, %v4750_v27  ;;  %v1640_v45 = vmul.f32 %v4660_v51, %v1464_v57  ;;  %v1649_v36 = vmul.f32 %v4726_v29, %v1503_v42  ;;  %v2061_v57 = vld [vmem:[#allocation7] sm:$0xff]  ;;  %v2062_v42 = vld [vmem:[#allocation7 + $0x8] sm:$0xff] }
 0x535   : > { %v1834_v52 = vld [vmem:[#allocation7 + $0xb8] sm:$0xff]  ;;  %v1995_v54 = vld [vmem:[#allocation7 + $0x180] sm:$0xff]  ;;  %v2063_v62 = vld [vmem:[#allocation7 + $0x10] sm:$0xff]  ;;  %v2405_v10 = vmul.f32 %v4292_v5, %v2061_v57 }
 0x536   : > { %v4760_v7 = vadd.f32 %v1834_v52, %v1825_v17  ;;  %v4762_v9 = vadd.f32 %v1995_v54, %v1986_v38  ;;  %1704 = vst.msk [vmem:[#allocation7 + $0x148] sm:$0xff] %vm707_vm2, %v1640_v45  ;;  %1713 = vst.msk [vmem:[#allocation7 + $0x190] sm:$0xff] %vm707_vm2, %v1649_v36  ;;  %v4781_v36 = vrot.slane %v1278_v28, %v3953_v32 }
 0x537   : > { %v1441_v40 = vpop.permute.xlu1 %1440  ;;  %v1480_v3 = vpop.permute.xlu0 %1479  ;;  %v1988_v32 = vmul.f32 %v1980_v63, %v4736_v61  ;;  %v2407_v57 = vmul.f32 %v4369_v1, %v2063_v62  ;;  %v1941_v61 = vld [vmem:[#allocation6 + $0x168] sm:$0xff]  ;;  %v2069_v63 = vld [vmem:[#allocation7 + $0x40] sm:$0xff] }
 0x538   : > { %1850 = vst.msk [vmem:[#allocation7 + $0xb8] sm:$0xff] %vm707_vm2, %v4760_v7  ;;  %2011 = vst.msk [vmem:[#allocation7 + $0x180] sm:$0xff] %vm707_vm2, %v4762_v9  ;;  %v1635_v15 = vmul.f32 %v4594_v8, %v1441_v40  ;;  %v1644_v34 = vmul.f32 %v4660_v51, %v1480_v3  ;;  %v2406_v40 = vmul.f32 %v4062_v20, %v2062_v42  ;;  %v2064_v20 = vld [vmem:[#allocation7 + $0x18] sm:$0xff]  ;;  %v1898_v42 = vld [vmem:[#allocation6 + $0x120] sm:$0xff] }
 0x539   : > { %v1914_v17 = vld [vmem:[#allocation7 + $0x118] sm:$0xff]  ;;  %v1917_v0 = vld [vmem:[#allocation7 + $0x130] sm:$0xff]  ;;  %v1945_v3 = vmul.f32 %v1937_v16, %v4734_v43  ;;  %v2070_v43 = vld [vmem:[#allocation7 + $0x48] sm:$0xff]  ;;  %v1949_v1 = vmul.f32 %v1941_v61, %v4750_v27 }
 0x53a   : > { %v4774_v38 = vadd.f32 %v1914_v17, %v1905_v44  ;;  %v4776_v45 = vadd.f32 %v1917_v0, %v1908_v58  ;;  %1699 = vst.msk [vmem:[#allocation7 + $0x120] sm:$0xff] %vm707_vm2, %v1635_v15  ;;  %1708 = vst.msk [vmem:[#allocation7 + $0x168] sm:$0xff] %vm707_vm2, %v1644_v34  ;;  %v2469_v0 = vsel %vm707_vm2, %v2405_v10, 0.0  ;;  %v2470_v16 = vsel %vm707_vm2, %v2406_v40, 0.0  ;;  %v2067_v27 = vld [vmem:[#allocation7 + $0x30] sm:$0xff]  ;;  %v1859_v61 = vld [vmem:[#allocation6 + $0xf8] sm:$0xff] }
 0x53b   : > { %v1418_v52 = vpop.permute.xlu1 %1417  ;;  %v1530_v54 = vpop.permute.xlu0 %1529  ;;  %v2408_v40 = vmul.f32 %v4081_v53, %v2064_v20  ;;  %v2413_v20 = vmul.f32 %v4243_v25, %v2069_v63 }
 0x53c   : > { %1930 = vst.msk [vmem:[#allocation7 + $0x118] sm:$0xff] %vm707_vm2, %v4774_v38  ;;  %1933 = vst.msk [vmem:[#allocation7 + $0x130] sm:$0xff] %vm707_vm2, %v4776_v45  ;;  %v1630_v28 = vmul.f32 %v4533_v39, %v1418_v52  ;;  %v1655_v44 = vmul.f32 %v4781_v36, %v1530_v54  ;;  %v1906_v52 = vmul.f32 %v1898_v42, %v4748_v31  ;;  %v2066_v31 = vld [vmem:[#allocation7 + $0x28] sm:$0xff]  ;;  %v2472_v42 = vsel %vm707_vm2, %v2407_v57, 0.0 }
 0x53d   : > { %v1954_v58 = vld [vmem:[#allocation7 + $0x148] sm:$0xff]  ;;  %v1997_v15 = vld [vmem:[#allocation7 + $0x190] sm:$0xff]  ;;  %v2474_v63 = vsel %vm707_vm2, %v2408_v40, 0.0 }
 0x53e   : > { %v4793_v34 = vadd.f32 %v1954_v58, %v1945_v3  ;;  %v4795_v5 = vadd.f32 %v1997_v15, %v1988_v32  ;;  %1694 = vst.msk [vmem:[#allocation7 + $0xf8] sm:$0xff] %vm707_vm2, %v1630_v28  ;;  %1719 = vst.msk [vmem:[#allocation7 + $0x1c0] sm:$0xff] %vm707_vm2, %v1655_v44  ;;  %v2065_v3 = vld [vmem:[#allocation7 + $0x20] sm:$0xff]  ;;  %v2071_v32 = vld [vmem:[#allocation7 + $0x50] sm:$0xff]  ;;  %v2414_v15 = vmul.f32 %v4058_v18, %v2070_v43 }
 0x53f   : > { %v1472_v17 = vpop.permute.xlu1 %1471  ;;  %v1484_v39 = vpop.permute.xlu0 %1483  ;;  %v2409_v53 = vmul.f32 %v4417_v47, %v2065_v3  ;;  %v1867_v18 = vmul.f32 %v1859_v61, %v4760_v7  ;;  %v2073_v47 = vld [vmem:[#allocation7 + $0x60] sm:$0xff]  ;;  %v2074_v7 = vld [vmem:[#allocation7 + $0x68] sm:$0xff]  ;;  %v2490_v61 = vsel %vm707_vm2, %v2413_v20, 0.0 }
 0x540   : > { %1970 = vst.msk [vmem:[#allocation7 + $0x148] sm:$0xff] %vm707_vm2, %v4793_v34  ;;  %2013 = vst.msk [vmem:[#allocation7 + $0x190] sm:$0xff] %vm707_vm2, %v4795_v5  ;;  %v1642_v54 = vmul.f32 %v4660_v51, %v1472_v17  ;;  %v1645_v62 = vmul.f32 %v4660_v51, %v1484_v39  ;;  %v2020_v17 = vld [vmem:[#allocation6 + $0x1c0] sm:$0xff]  ;;  %v2417_v40 = vmul.f32 %v4406_v30, %v2073_v47  ;;  %v1979_v47 = vld [vmem:[#allocation6 + $0x188] sm:$0xff] }
 0x541   : > { %v1915_v10 = vld [vmem:[#allocation7 + $0x120] sm:$0xff]  ;;  %v1958_v28 = vld [vmem:[#allocation7 + $0x168] sm:$0xff]  ;;  %v2028_v57 = vmul.f32 %v2020_v17, %v4762_v9 }
 0x542   : > { %v4811_v44 = vadd.f32 %v1915_v10, %v1906_v52  ;;  %v4813_v58 = vadd.f32 %v1958_v28, %v1949_v1  ;;  %1706 = vst.msk [vmem:[#allocation7 + $0x158] sm:$0xff] %vm707_vm2, %v1642_v54  ;;  %1709 = vst.msk [vmem:[#allocation7 + $0x170] sm:$0xff] %vm707_vm2, %v1645_v62  ;;  %v2415_v52 = vmul.f32 %v4314_v48, %v2071_v32  ;;  %v2077_v9 = vld [vmem:[#allocation7 + $0x80] sm:$0xff]  ;;  %v2491_v10 = vsel %vm707_vm2, %v2414_v15, 0.0  ;;  %v2078_v28 = vld [vmem:[#allocation7 + $0x88] sm:$0xff] }
 0x543   : > { %v1499_v39 = vpop.permute.xlu1 %1498  ;;  %v1538_v11 = vpop.permute.xlu0 %1537  ;;  %v2471_v1 = vadd.f32 %v2470_v16, %v2469_v0  ;;  %v2410_v48 = vmul.f32 %v4435_v41, %v2066_v31  ;;  %v2411_v0 = vmul.f32 %v4454_v55, %v2067_v27  ;;  %v1939_v41 = vld [vmem:[#allocation6 + $0x158] sm:$0xff]  ;;  %v1942_v31 = vld [vmem:[#allocation6 + $0x170] sm:$0xff]  ;;  %v2421_v20 = vmul.f32 %v4267_v13, %v2077_v9 }
 0x544   : > { %1931 = vst.msk [vmem:[#allocation7 + $0x120] sm:$0xff] %vm707_vm2, %v4811_v44  ;;  %1974 = vst.msk [vmem:[#allocation7 + $0x168] sm:$0xff] %vm707_vm2, %v4813_v58  ;;  %v1648_v43 = vmul.f32 %v4726_v29, %v1499_v39  ;;  %v1657_v54 = vmul.f32 %v4781_v36, %v1538_v11  ;;  %v2416_v11 = vmul.f32 %v4070_v24, %v2072_v60  ;;  %v2493_v17 = vsel %vm707_vm2, %v2415_v52, 0.0 }
 0x545   : > { %v1876_v62 = vld [vmem:[#allocation7 + $0xf8] sm:$0xff]  ;;  %v2037_v25 = vld [vmem:[#allocation7 + $0x1c0] sm:$0xff]  ;;  %v2473_v16 = vadd.f32 %v2472_v42, %v2471_v1  ;;  %v2476_v42 = vsel %vm707_vm2, %v2409_v53, 0.0  ;;  %v1947_v24 = vmul.f32 %v1939_v41, %v4774_v38  ;;  %v1950_v60 = vmul.f32 %v1942_v31, %v4776_v45 }
 0x546   : > { %v4833_v3 = vadd.f32 %v1876_v62, %v1867_v18  ;;  %v2045_v32 = vadd.f32 %v2037_v25, %v2028_v57  ;;  %1712 = vst.msk [vmem:[#allocation7 + $0x188] sm:$0xff] %vm707_vm2, %v1648_v43  ;;  %1721 = vst.msk [vmem:[#allocation7 + $0x1d0] sm:$0xff] %vm707_vm2, %v1657_v54  ;;  %v2418_v53 = vmul.f32 %v4100_v14, %v2074_v7  ;;  %v2495_v38 = vsel %vm707_vm2, %v2416_v11, 0.0  ;;  %v2085_v45 = vld [vmem:[#allocation7 + $0xc0] sm:$0xff]  ;;  %v2022_v62 = vld [vmem:[#allocation6 + $0x1d0] sm:$0xff] }
 0x547   : > { %v1476_v55 = vpop.permute.xlu1 %1475  ;;  %v1515_v27 = vpop.permute.xlu0 %1514  ;;  %v2475_v52 = vadd.f32 %v2474_v63, %v2473_v16  ;;  %v2492_v18 = vadd.f32 %v2491_v10, %v2490_v61  ;;  %v2422_v57 = vmul.f32 %v4060_v19, %v2078_v28  ;;  %v2478_v16 = vsel %vm707_vm2, %v2410_v48, 0.0  ;;  %v2079_v10 = vld [vmem:[#allocation7 + $0x90] sm:$0xff]  ;;  %v2080_v28 = vld [vmem:[#allocation7 + $0x98] sm:$0xff] }
 0x548   : > { %1892 = vst.msk [vmem:[#allocation7 + $0xf8] sm:$0xff] %vm707_vm2, %v4833_v3  ;;  %2053 = vst.msk [vmem:[#allocation7 + $0x1c0] sm:$0xff] %vm707_vm2, %v2045_v32  ;;  %v1643_v15 = vmul.f32 %v4660_v51, %v1476_v55  ;;  %v1652_v39 = vmul.f32 %v4726_v29, %v1515_v27  ;;  %v2497_v19 = vsel %vm707_vm2, %v2417_v40, 0.0  ;;  %v1987_v32 = vmul.f32 %v1979_v47, %v4793_v34 }
 0x549   : > { %v1956_v30 = vld [vmem:[#allocation7 + $0x158] sm:$0xff]  ;;  %v1959_v1 = vld [vmem:[#allocation7 + $0x170] sm:$0xff]  ;;  %v2477_v13 = vadd.f32 %v2476_v42, %v2475_v52  ;;  %v2494_v63 = vadd.f32 %v2493_v17, %v2492_v18  ;;  %v2030_v7 = vmul.f32 %v2022_v62, %v4795_v5  ;;  %v4871_v31 = vsel %vm707_vm2, %v2411_v0, 0.0  ;;  %v1940_v5 = vld [vmem:[#allocation6 + $0x160] sm:$0xff] }
 0x54a   : > { %v4853_v43 = vadd.f32 %v1956_v30, %v1947_v24  ;;  %v4855_v54 = vadd.f32 %v1959_v1, %v1950_v60  ;;  %1707 = vst.msk [vmem:[#allocation7 + $0x160] sm:$0xff] %vm707_vm2, %v1643_v15  ;;  %1716 = vst.msk [vmem:[#allocation7 + $0x1a8] sm:$0xff] %vm707_vm2, %v1652_v39  ;;  %v2511_v27 = vsel %vm707_vm2, %v2421_v20, 0.0  ;;  %v2429_v40 = vmul.f32 %v4064_v21, %v2085_v45  ;;  %v2086_v0 = vld [vmem:[#allocation7 + $0xc8] sm:$0xff]  ;;  %v2076_v39 = vld [vmem:[#allocation7 + $0x78] sm:$0xff] }
 0x54b   : > { %v1453_v14 = vpop.permute.xlu1 %1452  ;;  %v1519_v25 = vpop.permute.xlu0 %1518  ;;  %v2496_v55 = vadd.f32 %v2495_v38, %v2494_v63  ;;  %v2499_v61 = vsel %vm707_vm2, %v2418_v53, 0.0  ;;  %v2512_v17 = vsel %vm707_vm2, %v2422_v57, 0.0  ;;  %v1983_v24 = vld [vmem:[#allocation6 + $0x1a8] sm:$0xff]  ;;  %v2081_v30 = vld [vmem:[#allocation7 + $0xa0] sm:$0xff]  ;;  %v2423_v21 = vmul.f32 %v4066_v22, %v2079_v10  ;;  %v2087_v45 = vld [vmem:[#allocation7 + $0xd0] sm:$0xff] }
 0x54c   : > { %1972 = vst.msk [vmem:[#allocation7 + $0x158] sm:$0xff] %vm707_vm2, %v4853_v43  ;;  %1975 = vst.msk [vmem:[#allocation7 + $0x170] sm:$0xff] %vm707_vm2, %v4855_v54  ;;  %v1638_v9 = vmul.f32 %v4594_v8, %v1453_v14  ;;  %v1653_v11 = vmul.f32 %v4726_v29, %v1519_v25  ;;  %v2075_v8 = vld [vmem:[#allocation7 + $0x70] sm:$0xff]  ;;  %v2424_v1 = vmul.f32 %v4077_v50, %v2080_v28  ;;  %v2532_v25 = vsel %vm707_vm2, %v2429_v40, 0.0 }
 0x54d   : > { %v1996_v48 = vld [vmem:[#allocation7 + $0x188] sm:$0xff]  ;;  %v2039_v41 = vld [vmem:[#allocation7 + $0x1d0] sm:$0xff]  ;;  %v4883_v20 = vadd.f32 %v2478_v16, %v2477_v13  ;;  %v2498_v52 = vadd.f32 %v2497_v19, %v2496_v55  ;;  %v1948_v53 = vmul.f32 %v1940_v5, %v4811_v44  ;;  %v1991_v18 = vmul.f32 %v1983_v24, %v4813_v58  ;;  %v1901_v19 = vld [vmem:[#allocation6 + $0x138] sm:$0xff] }
 0x54e   : > { %v4875_v42 = vadd.f32 %v1996_v48, %v1987_v32  ;;  %v2047_v34 = vadd.f32 %v2039_v41, %v2030_v7  ;;  %1702 = vst.msk [vmem:[#allocation7 + $0x138] sm:$0xff] %vm707_vm2, %v1638_v9  ;;  %1717 = vst.msk [vmem:[#allocation7 + $0x1b0] sm:$0xff] %vm707_vm2, %v1653_v11  ;;  %v2419_v50 = vmul.f32 %v4197_v35, %v2075_v8  ;;  %v2082_v44 = vld [vmem:[#allocation7 + $0xa8] sm:$0xff]  ;;  %v1984_v35 = vld [vmem:[#allocation6 + $0x1b0] sm:$0xff]  ;;  %v2514_v9 = vsel %vm707_vm2, %v2423_v21, 0.0 }
 0x54f   : > { %v1507_v60 = vpop.permute.xlu1 %1506  ;;  %v1523_v15 = vpop.permute.xlu0 %1522  ;;  %v2513_v62 = vadd.f32 %v2512_v17, %v2511_v27  ;;  %v2430_v14 = vmul.f32 %v4336_v12, %v2086_v0  ;;  %v2420_v58 = vmul.f32 %v4297_v49, %v2076_v39  ;;  %v2425_v63 = vmul.f32 %v4087_v4, %v2081_v30  ;;  %v2093_v41 = vld [vmem:[#allocation7 + $0x100] sm:$0xff]  ;;  %v2083_v55 = vld [vmem:[#allocation7 + $0xb0] sm:$0xff]  ;;  %v1981_v24 = vld [vmem:[#allocation6 + $0x198] sm:$0xff] }
 0x550   : > { %2012 = vst.msk [vmem:[#allocation7 + $0x188] sm:$0xff] %vm707_vm2, %v4875_v42  ;;  %2055 = vst.msk [vmem:[#allocation7 + $0x1d0] sm:$0xff] %vm707_vm2, %v2047_v34  ;;  %v1650_v57 = vmul.f32 %v4726_v29, %v1507_v60  ;;  %v1654_v38 = vmul.f32 %v4726_v29, %v1523_v15  ;;  %v2500_v12 = vadd.f32 %v2499_v61, %v2498_v52  ;;  %v2516_v11 = vsel %vm707_vm2, %v2424_v1, 0.0  ;;  %v2090_v52 = vld [vmem:[#allocation7 + $0xe8] sm:$0xff] }
 0x551   : > { %v1957_v22 = vld [vmem:[#allocation7 + $0x160] sm:$0xff]  ;;  %v2000_v47 = vld [vmem:[#allocation7 + $0x1a8] sm:$0xff]  ;;  %v2431_v10 = vmul.f32 %v4381_v2, %v2087_v45  ;;  %v1909_v49 = vmul.f32 %v1901_v19, %v4833_v3  ;;  %v1992_v4 = vmul.f32 %v1984_v35, %v4855_v54  ;;  %v2426_v2 = vmul.f32 %v4152_v46, %v2082_v44  ;;  %v2095_v54 = vld [vmem:[#allocation7 + $0x110] sm:$0xff] }
 0x552   : > { %v4895_v13 = vadd.f32 %v1957_v22, %v1948_v53  ;;  %v4897_v16 = vadd.f32 %v2000_v47, %v1991_v18  ;;  %1714 = vst.msk [vmem:[#allocation7 + $0x198] sm:$0xff] %vm707_vm2, %v1650_v57  ;;  %1718 = vst.msk [vmem:[#allocation7 + $0x1b8] sm:$0xff] %vm707_vm2, %v1654_v38  ;;  %v2501_v34 = vsel %vm707_vm2, %v2419_v50, 0.0  ;;  %v2515_v5 = vadd.f32 %v2514_v9, %v2513_v62  ;;  %v2094_v46 = vld [vmem:[#allocation7 + $0x108] sm:$0xff]  ;;  %v2088_v38 = vld [vmem:[#allocation7 + $0xd8] sm:$0xff] }
 0x553   : > { %v1534_v32 = vpop.permute.xlu1 %1533  ;;  %v1554_v7 = vpop.permute.xlu0 %1553  ;;  %v2533_v8 = vsel %vm707_vm2, %v2430_v14, 0.0  ;;  %v2503_v17 = vsel %vm707_vm2, %v2420_v58, 0.0  ;;  %v2518_v0 = vsel %vm707_vm2, %v2425_v63, 0.0  ;;  %v2437_v15 = vmul.f32 %v4358_v37, %v2093_v41  ;;  %v2101_v37 = vld [vmem:[#allocation7 + $0x140] sm:$0xff]  ;;  %v2102_v62 = vld [vmem:[#allocation7 + $0x148] sm:$0xff]  ;;  %v2026_v58 = vld [vmem:[#allocation6 + $0x1f0] sm:$0xff] }
 0x554   : > { %1973 = vst.msk [vmem:[#allocation7 + $0x160] sm:$0xff] %vm707_vm2, %v4895_v13  ;;  %2016 = vst.msk [vmem:[#allocation7 + $0x1a8] sm:$0xff] %vm707_vm2, %v4897_v16  ;;  %v1656_v28 = vmul.f32 %v4781_v36, %v1534_v32  ;;  %v1661_v48 = vmul.f32 %v4781_v36, %v1554_v7  ;;  %v2427_v30 = vmul.f32 %v4248_v26, %v2083_v55  ;;  %v2535_v26 = vsel %vm707_vm2, %v2431_v10, 0.0  ;;  %v2103_v9 = vld [vmem:[#allocation7 + $0x150] sm:$0xff] }
 0x555   : > { %v1918_v27 = vld [vmem:[#allocation7 + $0x138] sm:$0xff]  ;;  %v2001_v40 = vld [vmem:[#allocation7 + $0x1b0] sm:$0xff]  ;;  %v2502_v21 = vadd.f32 %v2501_v34, %v2500_v12  ;;  %v2517_v1 = vadd.f32 %v2516_v11, %v2515_v5  ;;  %v1989_v53 = vmul.f32 %v1981_v24, %v4853_v43  ;;  %v4934_v57 = vadd.f32 %v4871_v31, %v4883_v20  ;;  %v2021_v20 = vld [vmem:[#allocation6 + $0x1c8] sm:$0xff] }
 0x556   : > { %v4917_v61 = vadd.f32 %v1918_v27, %v1909_v49  ;;  %v2009_v3 = vadd.f32 %v2001_v40, %v1992_v4  ;;  %1720 = vst.msk [vmem:[#allocation7 + $0x1c8] sm:$0xff] %vm707_vm2, %v1656_v28  ;;  %1725 = vst.msk [vmem:[#allocation7 + $0x1f0] sm:$0xff] %vm707_vm2, %v1661_v48  ;;  %v2439_v22 = vmul.f32 %v4399_v59, %v2095_v54  ;;  %v2520_v43 = vsel %vm707_vm2, %v2426_v2, 0.0  ;;  %v2096_v12 = vld [vmem:[#allocation7 + $0x118] sm:$0xff]  ;;  %v2089_v49 = vld [vmem:[#allocation7 + $0xe0] sm:$0xff] }
 0x557   : > { %v1511_v60 = vpop.permute.xlu1 %1510  ;;  %v4924_v39 = vpop.permute.xlu0 %2294  ;;  %v2504_v47 = vadd.f32 %v2503_v17, %v2502_v21  ;;  %v2519_v50 = vadd.f32 %v2518_v0, %v2517_v1  ;;  %v2534_v14 = vadd.f32 %v2533_v8, %v2532_v25  ;;  %v2434_v31 = vmul.f32 %v4437_v6, %v2090_v52  ;;  %v5222_v11 = vld [vmem:[#allocation36_spill] sm:$0xff]  ;;  %v1982_v2 = vld [vmem:[#allocation6 + $0x1a0] sm:$0xff]  ;;  %v5224_v17 = vld [vmem:[#allocation38_spill] sm:$0xff] }
 0x558   : > { %1934 = vst.msk [vmem:[#allocation7 + $0x138] sm:$0xff] %vm707_vm2, %v4917_v61  ;;  %2017 = vst.msk [vmem:[#allocation7 + $0x1b0] sm:$0xff] %vm707_vm2, %v2009_v3  ;;  %v1651_v18 = vmul.f32 %v4726_v29, %v1511_v60  ;;  %v2438_v29 = vmul.f32 %v4068_v23, %v2094_v46  ;;  %v2553_v63 = vsel %vm707_vm2, %v2437_v15, 0.0  ;;  %v2522_v59 = vsel %vm707_vm2, %v2427_v30, 0.0  ;;  %v2097_v34 = vld [vmem:[#allocation7 + $0x120] sm:$0xff]  ;;  %v5223_v5 = vld [vmem:[#allocation40_spill] sm:$0xff] }
 0x559   : > { %v1998_v45 = vld [vmem:[#allocation7 + $0x198] sm:$0xff]  ;;  %v2445_v25 = vmul.f32 %v4075_v33, %v2101_v37  ;;  %v2432_v32 = vmul.f32 %v4083_v56, %v2088_v38  ;;  %v2029_v23 = vmul.f32 %v2021_v20, %v4875_v42  ;;  %v2034_v7 = vmul.f32 %v2026_v58, %v2009_v3  ;;  %v2091_v42 = vld [vmem:[#allocation7 + $0xf0] sm:$0xff]  ;;  %v5225_v24 = vld [vmem:[#allocation41_spill] sm:$0xff] }
 0x55a   : > { %v4938_v44 = vadd.f32 %v1998_v45, %v1989_v53  ;;  %1715 = vst.msk [vmem:[#allocation7 + $0x1a0] sm:$0xff] %vm707_vm2, %v1651_v18  ;;  %v2446_v10 = vmul.f32 %v5222_v11, %v2102_v62  ;;  %v2556_v48 = vsel %vm707_vm2, %v2439_v22, 0.0  ;;  %v2505_v33 = vrot.slane %v2504_v47, 4  ;;  %v2104_v54 = vld [vmem:[#allocation7 + $0x158] sm:$0xff]  ;;  %v5226_v45 = vld [vmem:[#allocation46_spill] sm:$0xff]  ;;  %v5227_v62 = vld [vmem:[#allocation43_spill] sm:$0xff] }
 0x55b   : > { %v1488_v19 = vpop.permute.xlu1 %1487  ;;  %v2159_v35 = vpop.permute.xlu0 %2158  ;;  %v2521_v41 = vadd.f32 %v2520_v43, %v2519_v50  ;;  %v2536_v56 = vadd.f32 %v2535_v26, %v2534_v14  ;;  %v2554_v40 = vsel %vm707_vm2, %v2438_v29, 0.0  ;;  %v2440_v8 = vmul.f32 %v5223_v5, %v2096_v12  ;;  %v2105_v38 = vld [vmem:[#allocation7 + $0x160] sm:$0xff]  ;;  %v2084_v29 = vld [vmem:[#allocation7 + $0xb8] sm:$0xff]  ;;  %v5228_v43 = vld [vmem:[#allocation30_spill] sm:$0xff] }
 0x55c   : > { %2014 = vst.msk [vmem:[#allocation7 + $0x198] sm:$0xff] %vm707_vm2, %v4938_v44  ;;  %v1646_v6 = vmul.f32 %v4660_v51, %v1488_v19  ;;  %v4957_v51 = vsel %vm707_vm2, %v2434_v31, 0.0  ;;  %v2447_v0 = vmul.f32 %v5224_v17, %v2103_v9  ;;  %v2433_v60 = vmul.f32 %v5225_v24, %v2089_v49  ;;  %v2068_v19 = vld [vmem:[#allocation7 + $0x38] sm:$0xff]  ;;  %v2110_v24 = vld [vmem:[#allocation7 + $0x188] sm:$0xff] }
 0x55d   : > { %v2038_v4 = vld [vmem:[#allocation7 + $0x1c8] sm:$0xff]  ;;  %v2043_v28 = vld [vmem:[#allocation7 + $0x1f0] sm:$0xff]  ;;  %v2537_v46 = vsel %vm707_vm2, %v2432_v32, 0.0  ;;  %v1990_v15 = vmul.f32 %v1982_v2, %v4895_v13  ;;  %v2574_v21 = vsel %vm707_vm2, %v2445_v25, 0.0  ;;  %v2575_v1 = vsel %vm707_vm2, %v2446_v10, 0.0  ;;  %v5230_v10 = vld [vmem:[#allocation45_spill] sm:$0xff] }
 0x55e   : > { %v2046_v55 = vadd.f32 %v2038_v4, %v2029_v23  ;;  %v2051_v27 = vadd.f32 %v2043_v28, %v2034_v7  ;;  %1710 = vst.msk [vmem:[#allocation7 + $0x178] sm:$0xff] %vm707_vm2, %v1646_v6  ;;  %v2555_v53 = vadd.f32 %v2554_v40, %v2553_v63  ;;  %v4969_v18 = vadd.f32 %v2505_v33, %v2504_v47  ;;  %v2098_v13 = vld [vmem:[#allocation7 + $0x128] sm:$0xff]  ;;  %v2109_v47 = vld [vmem:[#allocation7 + $0x180] sm:$0xff]  ;;  %v1943_v63 = vld [vmem:[#allocation6 + $0x178] sm:$0xff] }
 0x55f   : > { %v1542_v3 = vpop.permute.xlu1 %1541  ;;  %v4971_v37 = vadd.f32 %v2522_v59, %v2521_v41  ;;  %v4973_v26 = vpop.permute.xlu0 %2329  ;;  %v4976_v22 = vmul.f32 %v5226_v45, %v2091_v42  ;;  %v2441_v14 = vmul.f32 %v5227_v62, %v2097_v34  ;;  %v2448_v31 = vmul.f32 %v5228_v43, %v2104_v54  ;;  %v5229_v6 = vld [vmem:[#allocation32_spill] sm:$0xff]  ;;  %v5231_v33 = vld [vmem:[#allocation35_spill] sm:$0xff]  ;;  %v2106_v34 = vld [vmem:[#allocation7 + $0x168] sm:$0xff] }
 0x560   : > { %2054 = vst.msk [vmem:[#allocation7 + $0x1c8] sm:$0xff] %vm707_vm2, %v2046_v55  ;;  %2059 = vst.msk [vmem:[#allocation7 + $0x1f0] sm:$0xff] %vm707_vm2, %v2051_v27  ;;  %v1658_v30 = vmul.f32 %v4781_v36, %v1542_v3  ;;  %v2538_v20 = vadd.f32 %v2537_v46, %v2536_v56  ;;  %v2558_v58 = vsel %vm707_vm2, %v2440_v8, 0.0  ;;  %v2576_v59 = vadd.f32 %v2575_v1, %v2574_v21  ;;  %v5232_v56 = vld [vmem:[#allocation27_spill] sm:$0xff]  ;;  %v2023_v2 = vld [vmem:[#allocation6 + $0x1d8] sm:$0xff] }
 0x561   : > { %v1999_v52 = vld [vmem:[#allocation7 + $0x1a0] sm:$0xff]  ;;  %v2577_v25 = vsel %vm707_vm2, %v2447_v0, 0.0  ;;  %v2539_v23 = vsel %vm707_vm2, %v2433_v60, 0.0  ;;  %v1951_v7 = vmul.f32 %v1943_v63, %v4917_v61  ;;  %v2412_v12 = vmul.f32 %v2159_v35, %v2068_v19  ;;  %v2099_v27 = vld [vmem:[#allocation7 + $0x130] sm:$0xff]  ;;  %v2002_v45 = vld [vmem:[#allocation7 + $0x1b8] sm:$0xff] }
 0x562   : > { %v4978_v50 = vadd.f32 %v1999_v52, %v1990_v15  ;;  %1722 = vst.msk [vmem:[#allocation7 + $0x1d8] sm:$0xff] %vm707_vm2, %v1658_v30  ;;  %v2449_v9 = vmul.f32 %v5229_v6, %v2105_v38  ;;  %v2442_v49 = vmul.f32 %v5230_v10, %v2098_v13  ;;  %v2557_v4 = vadd.f32 %v2556_v48, %v2555_v53  ;;  %v1985_v48 = vld [vmem:[#allocation6 + $0x1b8] sm:$0xff]  ;;  %v5233_v52 = vld [vmem:[#allocation34_spill] sm:$0xff]  ;;  %v2107_v63 = vld [vmem:[#allocation7 + $0x170] sm:$0xff] }
 0x563   : > { %v1546_v32 = vpop.permute.xlu1 %1545  ;;  %v2428_v41 = vmul.f32 %v5231_v33, %v2084_v29  ;;  %v2453_v55 = vmul.f32 %v5232_v56, %v2109_v47  ;;  %v2560_v40 = vsel %vm707_vm2, %v2441_v14, 0.0  ;;  %v2579_v61 = vsel %vm707_vm2, %v2448_v31, 0.0  ;;  %v2299_v17 = vpop.permute.xlu0 %2298  ;;  %v2100_v38 = vld [vmem:[#allocation7 + $0x138] sm:$0xff]  ;;  %v2111_v14 = vld [vmem:[#allocation7 + $0x190] sm:$0xff]  ;;  %v5234_v29 = vld [vmem:[#allocation37_spill] sm:$0xff] }
 0x564   : > { %2015 = vst.msk [vmem:[#allocation7 + $0x1a0] sm:$0xff] %vm707_vm2, %v4978_v50  ;;  %v1659_v11 = vmul.f32 %v4781_v36, %v1546_v32  ;;  %v2540_v35 = vadd.f32 %v2539_v23, %v2538_v20  ;;  %v2559_v5 = vadd.f32 %v2558_v58, %v2557_v4  ;;  %v2443_v8 = vmul.f32 %v4924_v39, %v2099_v27  ;;  %v5235_v10 = vld [vmem:[#allocation29_spill] sm:$0xff] }
 0x565   : > { %v1960_v28 = vld [vmem:[#allocation7 + $0x178] sm:$0xff]  ;;  %v2031_v3 = vmul.f32 %v2023_v2, %v4938_v44  ;;  %v2578_v54 = vadd.f32 %v2577_v25, %v2576_v59  ;;  %v2482_v46 = vsel %vm707_vm2, %v2412_v12, 0.0  ;;  %v2581_v15 = vsel %vm707_vm2, %v2449_v9, 0.0  ;;  %v2024_v59 = vld [vmem:[#allocation6 + $0x1e0] sm:$0xff] }
 0x566   : > { %v1968_v42 = vadd.f32 %v1960_v28, %v1951_v7  ;;  %1723 = vst.msk [vmem:[#allocation7 + $0x1e0] sm:$0xff] %vm707_vm2, %v1659_v11  ;;  %v2561_v21 = vadd.f32 %v2560_v40, %v2559_v5  ;;  %v2524_v1 = vsel %vm707_vm2, %v2428_v41, 0.0  ;;  %v2450_v53 = vmul.f32 %v5233_v52, %v2106_v34  ;;  %v2112_v11 = vld [vmem:[#allocation7 + $0x198] sm:$0xff]  ;;  %v2025_v41 = vld [vmem:[#allocation6 + $0x1e8] sm:$0xff] }
 0x567   : > { %v1550_v0 = vpop.permute.xlu1 %1549  ;;  %v2580_v44 = vadd.f32 %v2579_v61, %v2578_v54  ;;  %v2444_v62 = vmul.f32 %v2299_v17, %v2100_v38  ;;  %v2454_v43 = vmul.f32 %v5234_v29, %v2110_v24  ;;  %v2562_v47 = vsel %vm707_vm2, %v2442_v49, 0.0  ;;  %v2334_v4 = vpop.permute.xlu0 %2333  ;;  %v2118_v61 = vld [vmem:[#allocation7 + $0x1c8] sm:$0xff]  ;;  %v2117_v24 = vld [vmem:[#allocation7 + $0x1c0] sm:$0xff]  ;;  %v2092_v38 = vld [vmem:[#allocation7 + $0xf8] sm:$0xff] }
 0x568   : > { %1976 = vst.msk [vmem:[#allocation7 + $0x178] sm:$0xff] %vm707_vm2, %v1968_v42  ;;  %v1993_v60 = vmul.f32 %v1985_v48, %v1968_v42  ;;  %v1660_v30 = vmul.f32 %v4781_v36, %v1550_v0  ;;  %v2507_v20 = vrot.slane %v4969_v18, 2  ;;  %v2483_v58 = vadd.f32 %v2482_v46, %v4934_v57  ;;  %v5237_v46 = vld [vmem:[#allocation33_spill] sm:$0xff] }
 0x569   : > { %v2040_v39 = vld [vmem:[#allocation7 + $0x1d8] sm:$0xff]  ;;  %v2582_v19 = vadd.f32 %v2581_v15, %v2580_v44  ;;  %v2564_v32 = vsel %vm707_vm2, %v2443_v8, 0.0  ;;  %v2451_v23 = vmul.f32 %v4973_v26, %v2107_v63  ;;  %v2032_v7 = vmul.f32 %v2024_v59, %v4978_v50  ;;  %v2114_v59 = vld [vmem:[#allocation7 + $0x1a8] sm:$0xff] }
 0x56a   : > { %v2048_v13 = vadd.f32 %v2040_v39, %v2031_v3  ;;  %1724 = vst.msk [vmem:[#allocation7 + $0x1e8] sm:$0xff] %vm707_vm2, %v1660_v30  ;;  %v5007_v31 = vadd.f32 %v2002_v45, %v1993_v60  ;;  %v2595_v12 = vsel %vm707_vm2, %v2453_v55, 0.0  ;;  %v2563_v6 = vadd.f32 %v2562_v47, %v2561_v21  ;;  %v2119_v21 = vld [vmem:[#allocation7 + $0x1d0] sm:$0xff] }
 0x56b   : > { %v5012_v25 = vpop.permute.xlu1 %2360  ;;  %v2525_v57 = vadd.f32 %v2524_v1, %v4971_v37  ;;  %v2455_v49 = vmul.f32 %v5235_v10, %v2111_v14  ;;  %v2542_v28 = vadd.f32 %v4957_v51, %v2540_v35  ;;  %v2583_v33 = vsel %vm707_vm2, %v2450_v53, 0.0  ;;  %v2113_v42 = vld [vmem:[#allocation7 + $0x1a0] sm:$0xff]  ;;  %v5236_v51 = vld [vmem:[#allocation31_spill] sm:$0xff]  ;;  %v5239_v14 = vld [vmem:[#allocation28_spill] sm:$0xff] }
 0x56c   : > { %2056 = vst.msk [vmem:[#allocation7 + $0x1d8] sm:$0xff] %vm707_vm2, %v2048_v13  ;;  %2018 = vst.msk [vmem:[#allocation7 + $0x1b8] sm:$0xff] %vm707_vm2, %v5007_v31  ;;  %v2566_v50 = vsel %vm707_vm2, %v2444_v62, 0.0  ;;  %v2596_v56 = vsel %vm707_vm2, %v2454_v43, 0.0  ;;  %v2565_v55 = vadd.f32 %v2564_v32, %v2563_v6  ;;  %v2484_v27 = vrot.slane %v2483_v58, 4  ;;  %v5238_v1 = vld [vmem:[#allocation39_spill] sm:$0xff] }
 0x56d   : > { %v2041_v9 = vld [vmem:[#allocation7 + $0x1e0] sm:$0xff]  ;;  %v2584_v40 = vadd.f32 %v2583_v33, %v2582_v19  ;;  %v2033_v37 = vmul.f32 %v2025_v41, %v4897_v16  ;;  %v2585_v5 = vsel %vm707_vm2, %v2451_v23, 0.0  ;;  %v2456_v35 = vmul.f32 %v5236_v51, %v2112_v11  ;;  %v2027_v11 = vld [vmem:[#allocation6 + $0x1f8] sm:$0xff] }
 0x56e   : > { %v2049_v26 = vadd.f32 %v2041_v9, %v2032_v7  ;;  %v2526_v3 = vrot.slane %v2525_v57, 4  ;;  %v2567_v54 = vadd.f32 %v2566_v50, %v2565_v55  ;;  %v2597_v0 = vadd.f32 %v2596_v56, %v2595_v12  ;;  %v5241_v33 = vld [vmem:[#allocation44_spill] sm:$0xff] }
 0x56f   : > { %v1558_v2 = vpop.permute.xlu1 %1557  ;;  %v2108_v34 = vld [vmem:[#allocation7 + $0x178] sm:$0xff]  ;;  %v2543_v16 = vsel %vm707_vm2, %v4976_v22, 0.0  ;;  %v2457_v15 = vmul.f32 %v5237_v46, %v2113_v42  ;;  %v2462_v39 = vmul.f32 %v5238_v1, %v2118_v61  ;;  %v2485_v52 = vadd.f32 %v2484_v27, %v2483_v58  ;;  %v5242_v61 = vld [vmem:[#allocation47_spill] sm:$0xff] }
 0x570   : > { %2057 = vst.msk [vmem:[#allocation7 + $0x1e0] sm:$0xff] %vm707_vm2, %v2049_v26  ;;  %v1662_v8 = vmul.f32 %v4781_v36, %v1558_v2  ;;  %v2452_v48 = vmul.f32 %v2334_v4, %v2108_v34  ;;  %v5039_v36 = vadd.f32 %v2507_v20, %v4969_v18  ;;  %v2586_v53 = vadd.f32 %v2585_v5, %v2584_v40  ;;  %v5240_v18 = vld [vmem:[#allocation42_spill] sm:$0xff] }
 0x571   : > { %v2042_v17 = vld [vmem:[#allocation7 + $0x1e8] sm:$0xff]  ;;  %v2544_v45 = vadd.f32 %v2543_v16, %v2542_v28  ;;  %v2598_v22 = vsel %vm707_vm2, %v2455_v49, 0.0  ;;  %v2600_v13 = vsel %vm707_vm2, %v2456_v35, 0.0  ;;  %v2461_v29 = vmul.f32 %v5239_v14, %v2117_v24  ;;  %v2123_v14 = vld [vmem:[#allocation7 + $0x1f0] sm:$0xff] }
 0x572   : > { %v2050_v60 = vadd.f32 %v2042_v17, %v2033_v37  ;;  %1726 = vst.msk [vmem:[#allocation7 + $0x1f8] sm:$0xff] %vm707_vm2, %v1662_v8  ;;  %v2587_v30 = vsel %vm707_vm2, %v2452_v48, 0.0  ;;  %v2527_v43 = vadd.f32 %v2526_v3, %v2525_v57  ;;  %v2599_v47 = vadd.f32 %v2598_v22, %v2597_v0  ;;  %v2369_v37 = vpop.permute.xlu0 %2368  ;;  %v2115_v17 = vld [vmem:[#allocation7 + $0x1b0] sm:$0xff]  ;;  %v2965_v0 = vld [vmem:[%s5243_s12] ss:$0 sm:$0xff] }
 0x573   : > { %v2264_v44 = vpop.permute.xlu1 %2263  ;;  %v2588_v63 = vadd.f32 %v2587_v30, %v2586_v53  ;;  %v2120_v19 = vld [vmem:[#allocation7 + $0x1d8] sm:$0xff]  ;;  %v2463_v20 = vmul.f32 %v5240_v18, %v2119_v21  ;;  %v2568_v58 = vrot.slane %v2567_v54, 4  ;;  %v2602_v32 = vsel %vm707_vm2, %v2457_v15, 0.0 }
 0x574   : > { %2058 = vst.msk [vmem:[#allocation7 + $0x1e8] sm:$0xff] %vm707_vm2, %v2050_v60  ;;  %v2436_v62 = vmul.f32 %v2264_v44, %v2092_v38  ;;  %v2617_v7 = vsel %vm707_vm2, %v2462_v39, 0.0  ;;  %v2486_v12 = vrot.slane %v2485_v52, 2  ;;  %v2458_v6 = vmul.f32 %v5012_v25, %v2114_v59  ;;  %v2116_v40 = vld [vmem:[#allocation7 + $0x1b8] sm:$0xff] }
 0x575   : > { %v2601_v9 = vadd.f32 %v2600_v13, %v2599_v47  ;;  %v2509_v4 = vrot.slane %v5039_v36, 1  ;;  %v2035_v28 = vmul.f32 %v2027_v11, %v5007_v31  ;;  %v2464_v26 = vmul.f32 %v5241_v33, %v2120_v19  ;;  %v3286_v44 = vld [vmem:[#allocation5 + $0x8] sm:$0xff] }
 0x576   : > { %v2545_v23 = vsel %vm707_vm2, %v2436_v62, 0.0  ;;  %v2616_v50 = vsel %vm707_vm2, %v2461_v29, 0.0  ;;  %v2589_v55 = vrot.slane %v2588_v63, 4  ;;  %v2528_v42 = vrot.slane %v2527_v43, 2 }
 0x577   : > { %v2546_v10 = vadd.f32 %v2545_v23, %v2544_v45  ;;  %v2396_v57 = vpop.permute.xlu1 %2395  ;;  %v2121_v49 = vld [vmem:[#allocation7 + $0x1e0] sm:$0xff]  ;;  %v2603_v41 = vadd.f32 %v2602_v32, %v2601_v9  ;;  %v2618_v25 = vadd.f32 %v2617_v7, %v2616_v50  ;;  %v2569_v2 = vadd.f32 %v2568_v58, %v2567_v54 }
 0x578   : > { %v2465_v5 = vmul.f32 %v5242_v61, %v2121_v49  ;;  %v2487_v51 = vadd.f32 %v2486_v12, %v2485_v52  ;;  %v2604_v35 = vsel %vm707_vm2, %v2458_v6, 0.0  ;;  %v2619_v48 = vsel %vm707_vm2, %v2463_v20, 0.0 }
 0x579   : > { %v2044_v56 = vld [vmem:[#allocation7 + $0x1f8] sm:$0xff]  ;;  %v2547_v27 = vrot.slane %v2546_v10, 4  ;;  %v2460_v16 = vmul.f32 %v2369_v37, %v2116_v40  ;;  %v2621_v24 = vsel %vm707_vm2, %v2464_v26, 0.0  ;;  %v2605_v46 = vadd.f32 %v2604_v35, %v2603_v41 }
 0x57a   : > { %v2052_v34 = vadd.f32 %v2044_v56, %v2035_v28  ;;  %v2590_v15 = vadd.f32 %v2589_v55, %v2588_v63  ;;  %v2620_v21 = vadd.f32 %v2619_v48, %v2618_v25  ;;  %v2529_v1 = vadd.f32 %v2528_v42, %v2527_v43 }
 0x57b   : > { %v2548_v31 = vadd.f32 %v2547_v27, %v2546_v10  ;;  %v2122_v8 = vld [vmem:[#allocation7 + $0x1e8] sm:$0xff]  ;;  %v2365_v3 = vpop.permute.xlu1 %2364  ;;  %v2570_v39 = vrot.slane %v2569_v2, 2  ;;  %v2623_v52 = vsel %vm707_vm2, %v2465_v5, 0.0  ;;  %v5064_v38 = vmul.f32 %v3286_v44, %v2965_v0 }
 0x57c   : > { %2060 = vst.msk [vmem:[#allocation7 + $0x1f8] sm:$0xff] %vm707_vm2, %v2052_v34  ;;  %v2466_v54 = vmul.f32 %v2396_v57, %v2122_v8  ;;  %v2459_v60 = vmul.f32 %v2365_v3, %v2115_v17  ;;  %v2622_v22 = vadd.f32 %v2621_v24, %v2620_v21  ;;  %v2488_v29 = vrot.slane %v2487_v51, 1 }
 0x57d   : > { %v2549_v30 = vrot.slane %v2548_v31, 2  ;;  %v2608_v47 = vsel %vm707_vm2, %v2460_v16, 0.0  ;;  %v2591_v43 = vrot.slane %v2590_v15, 2  ;;  %v2510_v59 = vadd.f32 %v2509_v4, %v5039_v36 }
 0x57e   : > { %v2606_v53 = vsel %vm707_vm2, %v2459_v60, 0.0  ;;  %v2625_v63 = vsel %vm707_vm2, %v2466_v54, 0.0  ;;  %v2624_v20 = vadd.f32 %v2623_v52, %v2622_v22  ;;  %v2530_v32 = vrot.slane %v2529_v1, 1 }
 0x57f   : > { %v2550_v45 = vadd.f32 %v2549_v30, %v2548_v31  ;;  %v2607_v13 = vadd.f32 %v2606_v53, %v2605_v46  ;;  %v2400_v62 = vpop.permute.xlu1 %2399  ;;  %v2571_v23 = vadd.f32 %v2570_v39, %v2569_v2  ;;  %v2645_v10 = vrot.slane %v5064_v38, 1 }
 0x580   : > { %v2467_v19 = vmul.f32 %v2400_v62, %v2123_v14  ;;  %v2626_v12 = vadd.f32 %v2625_v63, %v2624_v20  ;;  %v2489_v57 = vadd.f32 %v2488_v29, %v2487_v51  ;;  %v2592_v28 = vadd.f32 %v2591_v43, %v2590_v15  ;;  %v2700_v20 = vld [vmem:[#allocation4] sm:$0xff] }
 0x581   : > { %v2551_v18 = vrot.slane %v2550_v45, 1  ;;  %v2609_v58 = vadd.f32 %v2608_v47, %v2607_v13  ;;  %v2531_v41 = vadd.f32 %v2530_v32, %v2529_v1  ;;  %v2661_v56 = vadd.f32 %v2645_v10, %v2510_v59 }
 0x582   : > { %v2627_v7 = vsel %vm707_vm2, %v2467_v19, 0.0  ;;  %v2572_v55 = vrot.slane %v2571_v23, 1  ;;  %v2647_v4 = vrot.slane %v5064_v38, 3  ;;  %v2646_v37 = vrot.slane %v5064_v38, 2 }
 0x583   : > { %v2610_v6 = vrot.slane %v2609_v58, 4  ;;  %v2404_v9 = vpop.permute.xlu1 %2403  ;;  %v2124_v11 = vld [vmem:[#allocation7 + $0x1f8] sm:$0xff]  ;;  %v2552_v33 = vadd.f32 %v2551_v18, %v2550_v45  ;;  %v2628_v50 = vadd.f32 %v2627_v7, %v2626_v12  ;;  %v2660_v25 = vadd.f32 %v5064_v38, %v2489_v57 }
 0x584   : > { %v2468_v49 = vmul.f32 %v2404_v9, %v2124_v11  ;;  %v2593_v42 = vrot.slane %v2592_v28, 1  ;;  %v2662_v5 = vadd.f32 %v2646_v37, %v2531_v41  ;;  %v2676_v51 = vrot.slane %v2661_v56, 7 }
 0x585   : > { %v2611_v26 = vadd.f32 %v2610_v6, %v2609_v58  ;;  %v2663_v2 = vadd.f32 %v2647_v4, %v2552_v33  ;;  %v2573_v35 = vadd.f32 %v2572_v55, %v2571_v23  ;;  %v2648_v3 = vrot.slane %v5064_v38, 4 }
 0x586   : > { %v2629_v36 = vsel %vm707_vm2, %v2468_v49, 0.0  ;;  %v2678_v48 = vsel %vm2677_vm5, %v2676_v51, %v2660_v25  ;;  %v2594_v17 = vadd.f32 %v2593_v42, %v2592_v28  ;;  %v2679_v24 = vrot.slane %v2662_v5, 6 }
 0x587   : > { %v2612_v27 = vrot.slane %v2611_v26, 2  ;;  %v2630_v40 = vadd.f32 %v2629_v36, %v2628_v50  ;;  %v2682_v0 = vrot.slane %v2663_v2, 5  ;;  %v2664_v60 = vadd.f32 %v2648_v3, %v2573_v35 }
 0x588   : > { %v2650_v46 = vrot.slane %v5064_v38, 6  ;;  %v2649_v15 = vrot.slane %v5064_v38, 5  ;;  %v2681_v21 = vsel %vm2680_vm6, %v2679_v24, %v2678_v48  ;;  %v2651_v45 = vrot.slane %v5064_v38, 7 }
 0x589   : > { %v2613_v34 = vadd.f32 %v2612_v27, %v2611_v26  ;;  %v2631_v61 = vrot.slane %v2630_v40, 4  ;;  %v2684_v52 = vsel %vm2683_vm7, %v2682_v0, %v2681_v21  ;;  %v2685_v44 = vrot.slane %v2664_v60, 4 }
 0x58a   : > { %v2665_v39 = vadd.f32 %v2649_v15, %v2594_v17 }
 0x58b   : > { %v2614_v31 = vrot.slane %v2613_v34, 1  ;;  %v2632_v8 = vadd.f32 %v2631_v61, %v2630_v40  ;;  %v2687_v13 = vsel %vm2686_vm8, %v2685_v44, %v2684_v52 }
 0x58c   : > { %v2688_v14 = vrot.slane %v2665_v39, 3 }
 0x58d   : > { %v2615_v16 = vadd.f32 %v2614_v31, %v2613_v34  ;;  %v2633_v54 = vrot.slane %v2632_v8, 2 }
 0x58e   : > { %v2690_v47 = vsel %vm2689_vm9, %v2688_v14, %v2687_v13 }
 0x58f   : > { %v2634_v30 = vadd.f32 %v2633_v54, %v2632_v8  ;;  %v2666_v1 = vadd.f32 %v2650_v46, %v2615_v16 }
 0x591   : > { %v2635_v53 = vrot.slane %v2634_v30, 1  ;;  %v2691_v62 = vrot.slane %v2666_v1, 2 }
 0x593   : > { %v2636_v22 = vadd.f32 %v2635_v53, %v2634_v30  ;;  %v2693_v19 = vsel %vm2692_vm10, %v2691_v62, %v2690_v47 }
 0x595   : > { %v2667_v29 = vadd.f32 %v2651_v45, %v2636_v22 }
 0x597   : > { %v2694_v63 = vrot.slane %v2667_v29, 1 }
 0x599   : > { %v2696_v43 = vsel %vm2695_vm11, %v2694_v63, %v2693_v19 }
 0x59a   : > { %2698 = vst.msk [vmem:[#allocation2] sm:$0xff] %vm707_vm2, %v2696_v43 }
 0x5a1   : > { %v2699_v18 = vld [vmem:[#allocation2] sm:$0xff] }
 0x5a2   : > { %v2701_v38 = vmul.f32 %v2700_v20, %v2699_v18 }
 0x5a4   : > { %v2702_v58 = vpack.c.bf16 %v2701_v38, %v2701_v38 }
 0x5a6   : > { %3028 = vmatmul.mubr.msk.bf16.vlgmr.msra.gmra.mrb[4].mxu1 %vm707_vm2, %v2702_v58 }
 0x679   : > { %v2772_v59 = vpop.f32.mrb[4].mxu1 }
 0x67a   : > { %2778 = vst [vmem:[%s550_s22] sm:$0xff] %v2772_v59  ;;  %v3029_v32 = vpop.f32.mrb[5].mxu1 }
 0x67b   : > { %v2775_v23 = vpop.f32.mrb[6].mxu1 }
 0x67c   : > { %3472 = shalt.err (!%p3469_p6)
}
 0x67d   : > { %s3473_s16 = scalar_lea.hbm %s5088_s24, 128  ;;  %s3477_s4 = scalar_lea.hbm %s5244_s20, 256 }
 0x67e   : > { %p3474_p11 = scmp.ne.s32.totalorder %s5088_s24, %s3473_s16  ;;  %p3478_p12 = scmp.lt.u32.totalorder %s5088_s24, %s5244_s20 }
 0x67f   : > { %p3479_p3 = scmp.lt.u32.totalorder %s3477_s4, %s3473_s16  ;;  %p3481_p0 = scmp.lt.u32.totalorder %s3473_s16, %s5088_s24 }
 0x680   : > { %p3475_p1 = pnand %p3474_p11, %p5245_p2 }
 0x681   : > { %p3480_p13 = por %p3479_p3, %p3478_p12 }
 0x682   : > { %p3476_p9 = pneg %p3475_p1 }
 0x683   : > { %p3482_p4 = por %p3481_p0, %p3480_p13 }
 0x685   : > { %p3483_p10 = pnand %p3482_p4, %p3476_p9 }
 0x687   : > { %3486 = shalt.err (!%p3483_p10)
}
 0x688   : > { %3051 = dma.vmem_to_hbm [thread:$0]  (%p5245_p2), %s5083_s11, 128, %s5088_s24, %s2780_s5   ;;  %v3030_v7 = vpop.f32.mrb[7].mxu1 }
 0x689 PF: > { %s2805_s22 = sand.u32 1, %s3529_s25   ;;  %p5246_p5 = scmp.ne.s32.totalorder %s5180_s21, 0 }
 0x68a   : > { %p5247_p7 = scmp.ge.s32.totalorder %s3541_s28, 2  ;;  %s2806_s10 = scalar_lea.sflag [#allocation10], %s2805_s22 }
 0x68c   : > { %p3074_p8 = pnand %p5247_p7, %p5246_p5 }
 0x68e   : > { %3524 = dma.done.wait (!%p3074_p8), %s2806_s10, 128  }
 0x68f   : > { %3526 = vsyncadd (!%p3074_p8), %s2806_s10, 4294967168  ;;  %s5248_s18 = sld [smem:[#allocation26_spill]]  ;;  %p31_p6 = scmp.ge.s32.totalorder %s3777_s9, 4  }
 0x690   : > { %s5249_s25 = smov %s3533_s26  ;;  %s5250_s26 = smov %s3537_s27 }
 0x691   : > { %s5252_s28 = smov %s3777_s9  ;;  %33 = sbr.rel (!%p31_p6) target bundleno = 19 (0x13), region = 161 }
 0x695   : > { %s5251_s27 = smov %s5248_s18 }
 0x698   :  { %2811 = vsyncpa [#allocation9], 1 }
 0x699   :  { %2813 = vsyncpa [#allocation9 + $0x1], 1 }
 0x69a   :  { %2814 = vsyncpa [#allocation12], 1 }
 0x69b   :  { %2816 = vsyncpa [#allocation12 + $0x1], 1 }
 0x69c   :  { %2817 = vsyncpa [#allocation15], 1 }
 0x69d   :  { %2818 = vsyncpa [#allocation18], 1 }
 0x69e   :  { %2819 = vsyncpa [#allocation10], 1 }
 0x69f   :  { %2821 = vsyncpa [#allocation10 + $0x1], 1 }

</bundles_post_ra>
